<compile_context>
chip_gen: v6e
topology: v6e:2x2x1
jax: 0.10.0
libtpu: 0.0.40
codegen_flags: <defaults>
</compile_context>

<pallas_src>
import math

import jax
import jax.numpy as jnp
from jax import lax
from jax.experimental import pallas as pl
from jax.experimental.pallas import tpu as pltpu


# --------------------------------------------------------------------------- #
# helpers
# --------------------------------------------------------------------------- #

def _pick_tile(dim, cap):
    """Largest power-of-two divisor of `dim` in [8, cap]; falls back to `dim`.

    NOTE: the fallback returns the full dimension (one giant tile) when no
    power-of-two >= 8 divides it; fine for the even spatial sizes used here.
    """
    best = None
    t = 8
    limit = min(cap, dim)
    while t <= limit:
        if dim % t == 0:
            best = t
        t *= 2
    return best if best is not None else dim


# --------------------------------------------------------------------------- #
# 1) fused theta / phi / g 1x1 convolutions (single pass over x, full-K GEMM)
# --------------------------------------------------------------------------- #

def _qkv_kernel(x_ref, wt_ref, wpg_ref, theta_ref, pg_ref):
    # x: (tm, C) bf16; weights already bf16; single jnp.dot per output, no
    # accumulator / K-axis epilogue (K = C fits in one block).
    x = x_ref[...]
    theta_ref[...] = jnp.dot(
        x, wt_ref[...], preferred_element_type=jnp.float32).astype(theta_ref.dtype)
    pg_ref[...] = jnp.dot(
        x, wpg_ref[...], preferred_element_type=jnp.float32).astype(pg_ref.dtype)


def _qkv_proj(x_rows_bf16, w_theta_t, w_pg_t):
    """x_rows (M, C) bf16 -> theta (M, C8) bf16, phi||g (M, C8+C2) bf16."""
    M, C = x_rows_bf16.shape
    C8 = w_theta_t.shape[1]
    Dpg = w_pg_t.shape[1]
    # Big M tiles (DMA-setup amortization) but keep >=2 grid programs when
    # possible so both v7x TensorCores get work.
    tm = _pick_tile(M, cap=min(512, max(8, M // 2)))
    grid = (M // tm,)
    return pl.pallas_call(
        _qkv_kernel,
        out_shape=(jax.ShapeDtypeStruct((M, C8), jnp.bfloat16),
                   jax.ShapeDtypeStruct((M, Dpg), jnp.bfloat16)),
        grid_spec=pltpu.PrefetchScalarGridSpec(
            num_scalar_prefetch=0,
            grid=grid,
            in_specs=[pl.BlockSpec((tm, C), lambda i: (i, 0)),
                      pl.BlockSpec((C, C8), lambda i: (0, 0)),
                      pl.BlockSpec((C, Dpg), lambda i: (0, 0))],
            out_specs=(pl.BlockSpec((tm, C8), lambda i: (i, 0)),
                       pl.BlockSpec((tm, Dpg), lambda i: (i, 0)))),
        compiler_params=pltpu.CompilerParams(dimension_semantics=("parallel",)),
    )(x_rows_bf16, w_theta_t, w_pg_t)


# --------------------------------------------------------------------------- #
# 2) fused MaxPool2d(2, stride=2) over the phi||g slab (one launch)
# --------------------------------------------------------------------------- #

def _pool2x2_kernel(x_ref, o_ref):
    x = x_ref[...]                                          # (tr, 2, OW, 2, D)
    m = jnp.maximum(x[:, 0, :, :, :], x[:, 1, :, :, :])     # H-pair max
    o_ref[...] = jnp.maximum(m[:, :, 0, :], m[:, :, 1, :])  # W-pair max


def _maxpool_2x2(x_rows, B, H, W, D):
    """x_rows (B*H*W, D) in (b, h, w) row order -> (B, (H/2)*(W/2), D)."""
    OH, OW = H // 2, W // 2
    x5 = x_rows.reshape(B * OH, 2, OW, 2, D)   # pure row-major split (free)
    R = B * OH
    tr = _pick_tile(R, cap=256)
    out = pl.pallas_call(
        _pool2x2_kernel,
        out_shape=jax.ShapeDtypeStruct((R, OW, D), x_rows.dtype),
        grid_spec=pltpu.PrefetchScalarGridSpec(
            num_scalar_prefetch=0,
            grid=(R // tr,),
            in_specs=[pl.BlockSpec((tr, 2, OW, 2, D),
                                   lambda i: (i, 0, 0, 0, 0))],
            out_specs=pl.BlockSpec((tr, OW, D), lambda i: (i, 0, 0))),
        compiler_params=pltpu.CompilerParams(dimension_semantics=("parallel",)),
    )(x5)
    return out.reshape(B, OH * OW, D)


# --------------------------------------------------------------------------- #
# 3) flash attention + fused output 1x1 conv (gamma folded) + residual
# --------------------------------------------------------------------------- #

def _attn_kernel(q_ref, k_ref, v_ref, x_ref, wo_ref, o_ref, m_sc, l_sc, acc_sc):
    kv = pl.program_id(2)

    @pl.when(kv == 0)
    def _init():
        m_sc[...] = jnp.full_like(m_sc, -jnp.inf)
        l_sc[...] = jnp.zeros_like(l_sc)
        acc_sc[...] = jnp.zeros_like(acc_sc)

    # scores = theta_tile @ phi_tile^T, bf16 MXU operands, f32 accumulation
    s = lax.dot_general(q_ref[...], k_ref[...],
                        dimension_numbers=(((1,), (1,)), ((), ())),
                        preferred_element_type=jnp.float32)       # (tq, tkv)

    m_prev = m_sc[...]
    m_new = jnp.maximum(m_prev, jnp.max(s, axis=-1, keepdims=True))
    alpha = jnp.exp(m_prev - m_new)
    p = jnp.exp(s - m_new)
    l_sc[...] = alpha * l_sc[...] + jnp.sum(p, axis=-1, keepdims=True)
    acc_sc[...] = alpha * acc_sc[...] + jnp.dot(
        p.astype(jnp.bfloat16), v_ref[...], preferred_element_type=jnp.float32)
    m_sc[...] = m_new

    @pl.when(kv == pl.num_programs(2) - 1)
    def _finalize():
        # out = x + (softmax @ g) @ (gamma * w_o)^T   -- conv + residual fused
        attn_g = acc_sc[...] * pl.reciprocal(l_sc[...], approx=True)  # (tq, C2)
        proj = jnp.dot(attn_g.astype(jnp.bfloat16), wo_ref[...],
                       preferred_element_type=jnp.float32)            # (tq, C)
        o_ref[...] = (x_ref[...] + proj).astype(o_ref.dtype)


def _attention(theta, phi_p, g_p, x_res, w_o_scaled):
    """theta (B,HW,C8) bf16, phi_p (B,HW4,C8) bf16, g_p (B,HW4,C2) bf16,
    x_res (B,HW,C) f32, w_o_scaled (C2,C) bf16 -> out (B,HW,C) f32."""
    B, HW, C8 = theta.shape
    _, HW4, C2 = g_p.shape
    C = x_res.shape[-1]
    tq = _pick_tile(HW, cap=128)     # keep live f32 s/p intermediates small
    tkv = _pick_tile(HW4, cap=256)
    grid = (B, HW // tq, HW4 // tkv)
    return pl.pallas_call(
        _attn_kernel,
        out_shape=jax.ShapeDtypeStruct((B, HW, C), jnp.float32),
        grid_spec=pltpu.PrefetchScalarGridSpec(
            num_scalar_prefetch=0,
            grid=grid,
            in_specs=[
                pl.BlockSpec((None, tq, C8), lambda b, qi, ki: (b, qi, 0)),
                pl.BlockSpec((None, tkv, C8), lambda b, qi, ki: (b, ki, 0)),
                pl.BlockSpec((None, tkv, C2), lambda b, qi, ki: (b, ki, 0)),
                pl.BlockSpec((None, tq, C), lambda b, qi, ki: (b, qi, 0)),
                pl.BlockSpec((C2, C), lambda b, qi, ki: (0, 0)),
            ],
            out_specs=pl.BlockSpec((None, tq, C), lambda b, qi, ki: (b, qi, 0)),
            scratch_shapes=[pltpu.VMEM((tq, 1), jnp.float32),
                            pltpu.VMEM((tq, 1), jnp.float32),
                            pltpu.VMEM((tq, C2), jnp.float32)]),
        compiler_params=pltpu.CompilerParams(
            dimension_semantics=("parallel", "parallel", "arbitrary")),
    )(theta, phi_p, g_p, x_res, w_o_scaled)


# --------------------------------------------------------------------------- #
# parameters (spectral-normalized 1x1 conv weights, synthetic init)
# --------------------------------------------------------------------------- #

def _spectral_norm(w, key, eps=1e-12, n_iter=10):
    """Effective torch spectral_norm weight at inference: w / sigma_max(w)."""
    u = jax.random.normal(key, (w.shape[0],), jnp.float32)
    u = u / (jnp.linalg.norm(u) + eps)
    v = None
    for _ in range(n_iter):
        v = w.T @ u
        v = v / (jnp.linalg.norm(v) + eps)
        u = w @ v
        u = u / (jnp.linalg.norm(u) + eps)
    sigma = u @ (w @ v)
    return w / sigma


def build_params(key, in_channels):
    c, c8, c2 = in_channels, in_channels // 8, in_channels // 2
    ks = jax.random.split(key, 4)

    def conv_w(k, cout, cin):
        w = jax.random.normal(k, (cout, cin), jnp.float32) / math.sqrt(cin)
        return _spectral_norm(w, jax.random.fold_in(k, 1))

    return dict(
        w_theta=conv_w(ks[0], c8, c),
        w_phi=conv_w(ks[1], c8, c),
        w_g=conv_w(ks[2], c2, c),
        w_o=conv_w(ks[3], c, c2),
        # PyTorch initializes gamma to 0 (out == x); use a nonzero synthetic
        # value so the full attention path is actually exercised.
        gamma=jnp.asarray(0.5, jnp.float32),
    )


# --------------------------------------------------------------------------- #
# forward
# --------------------------------------------------------------------------- #

def self_attn_forward(params, x):
    B, C, H, W = x.shape
    assert C % 8 == 0 and H % 2 == 0 and W % 2 == 0
    C8, C2 = C // 8, C // 2
    HW = H * W

    # NCHW -> channels-last rows; one layout conversion at each model boundary.
    x_nhwc = jnp.transpose(x, (0, 2, 3, 1))                    # (B, H, W, C)
    x_res_f32 = x_nhwc.reshape(B, HW, C)                       # f32 residual
    x_rows_bf16 = x_nhwc.reshape(B * HW, C).astype(jnp.bfloat16)

    # bf16 inference weights; gamma folded into the output projection weight.
    w_theta_t = params["w_theta"].T.astype(jnp.bfloat16)                      # (C, C8)
    w_pg_t = jnp.concatenate([params["w_phi"], params["w_g"]],
                             axis=0).T.astype(jnp.bfloat16)                   # (C, C8+C2)
    w_o_scaled = (params["gamma"] * params["w_o"]).T.astype(jnp.bfloat16)     # (C2, C)

    # Fused theta / phi / g 1x1 convolutions (x read from HBM once).
    theta, pg = _qkv_proj(x_rows_bf16, w_theta_t, w_pg_t)      # (M,C8), (M,C8+C2)

    # One fused MaxPool2d(2,2) over the concatenated phi||g slab.
    pg_p = _maxpool_2x2(pg, B, H, W, C8 + C2)                  # (B, HW/4, C8+C2)
    phi_p = pg_p[:, :, :C8]
    g_p = pg_p[:, :, C8:]

    # Flash attention with output conv + gamma + residual fused in the finalize.
    out_rows = _attention(theta.reshape(B, HW, C8), phi_p, g_p,
                          x_res_f32, w_o_scaled)               # (B, HW, C) f32

    return jnp.transpose(out_rows.reshape(B, H, W, C), (0, 3, 1, 2))


# --------------------------------------------------------------------------- #
# pure-JAX reference (loose numerical sanity check)
# --------------------------------------------------------------------------- #

def reference_forward(params, x):
    B, C, H, W = x.shape
    C8, C2 = C // 8, C // 2
    HW, HW4 = H * W, (H // 2) * (W // 2)
    theta = jnp.einsum("oc,bchw->bohw", params["w_theta"], x).reshape(B, C8, HW)
    phi = jnp.einsum("oc,bchw->bohw", params["w_phi"], x)
    phi = phi.reshape(B, C8, H // 2, 2, W // 2, 2).max(axis=(3, 5)).reshape(B, C8, HW4)
    attn = jax.nn.softmax(jnp.einsum("bop,boq->bpq", theta, phi), axis=-1)
    g = jnp.einsum("oc,bchw->bohw", params["w_g"], x)
    g = g.reshape(B, C2, H // 2, 2, W // 2, 2).max(axis=(3, 5)).reshape(B, C2, HW4)
    attn_g = jnp.einsum("boq,bpq->bop", g, attn).reshape(B, C2, H, W)
    o = jnp.einsum("co,bohw->bchw", params["w_o"], attn_g)
    return x + params["gamma"] * o


# --------------------------------------------------------------------------- #
# main
# --------------------------------------------------------------------------- #

if __name__ == "__main__":
    key = jax.random.PRNGKey(0)
    in_channels = 64
    params = build_params(jax.random.fold_in(key, 1), in_channels)
    x = jax.random.normal(jax.random.fold_in(key, 2), (2, in_channels, 16, 16),
                          jnp.float32)

    fwd = jax.jit(self_attn_forward)
    out = jax.block_until_ready(fwd(params, x))

    assert out.shape == x.shape, out.shape
    assert bool(jnp.all(jnp.isfinite(out)))

    # Loose sanity check vs a plain-JAX f32 reference (bf16 activations + approx
    # reciprocal in the Pallas path are a deliberate precision tradeoff).
    ref = reference_forward(params, x)
    err = float(jnp.max(jnp.abs(out - ref)))
    assert err < 1e-1, f"max abs error vs reference: {err}"

    print("KERNEL_OK")
</pallas_src>

<mosaic_0001>
module attributes {stable_mosaic.version = 11 : i64} {
  func.func @_pool2x2_kernel(%arg0: i32, %arg1: memref<16x2x8x2x40xbf16, #tpu.memory_space<vmem>>, %arg2: memref<16x8x40xbf16, #tpu.memory_space<vmem>>) attributes {dimension_semantics = [#tpu.dimension_semantics<parallel>], iteration_bounds = array<i64: 1>, scalar_prefetch = 0 : i64, scratch_operands = 0 : i64, tpu.core_type = #tpu.core_type<tc>, window_params = [{transform_indices = @transform_0, window_bounds = array<i64: 16, 2, 8, 2, 40>}, {transform_indices = @transform_1, window_bounds = array<i64: 16, 8, 40>}]} {
    %c0 = arith.constant 0 : index
    %c0_0 = arith.constant 0 : index
    %c0_1 = arith.constant 0 : index
    %c0_2 = arith.constant 0 : index
    %c0_3 = arith.constant 0 : index
    %0 = vector.load %arg1[%c0, %c0_0, %c0_1, %c0_2, %c0_3] : memref<16x2x8x2x40xbf16, #tpu.memory_space<vmem>>, vector<16x2x8x2x40xbf16>
    %1 = vector.extract_strided_slice %0 {offsets = [0, 0, 0, 0, 0], sizes = [16, 1, 8, 2, 40], strides = [1, 1, 1, 1, 1]} : vector<16x2x8x2x40xbf16> to vector<16x1x8x2x40xbf16>
    %2 = vector.shape_cast %1 : vector<16x1x8x2x40xbf16> to vector<16x8x2x40xbf16>
    %3 = vector.extract_strided_slice %0 {offsets = [0, 1, 0, 0, 0], sizes = [16, 1, 8, 2, 40], strides = [1, 1, 1, 1, 1]} : vector<16x2x8x2x40xbf16> to vector<16x1x8x2x40xbf16>
    %4 = vector.shape_cast %3 : vector<16x1x8x2x40xbf16> to vector<16x8x2x40xbf16>
    %5 = arith.maximumf %2, %4 : vector<16x8x2x40xbf16>
    %6 = vector.extract_strided_slice %5 {offsets = [0, 0, 0, 0], sizes = [16, 8, 1, 40], strides = [1, 1, 1, 1]} : vector<16x8x2x40xbf16> to vector<16x8x1x40xbf16>
    %7 = vector.shape_cast %6 : vector<16x8x1x40xbf16> to vector<16x8x40xbf16>
    %8 = vector.extract_strided_slice %5 {offsets = [0, 0, 1, 0], sizes = [16, 8, 1, 40], strides = [1, 1, 1, 1]} : vector<16x8x2x40xbf16> to vector<16x8x1x40xbf16>
    %9 = vector.shape_cast %8 : vector<16x8x1x40xbf16> to vector<16x8x40xbf16>
    %10 = arith.maximumf %7, %9 : vector<16x8x40xbf16>
    %c0_4 = arith.constant 0 : index
    %c0_5 = arith.constant 0 : index
    %c0_6 = arith.constant 0 : index
    %11 = vector.load %arg2[%c0_4, %c0_5, %c0_6] : memref<16x8x40xbf16, #tpu.memory_space<vmem>>, vector<16x8x40xbf16>
    tpu.vector_store %arg2[%c0_4, %c0_5, %c0_6], %10 {strides = array<i32>} : memref<16x8x40xbf16, #tpu.memory_space<vmem>>, vector<16x8x40xbf16>,
    return
  }
  func.func @transform_0(%arg0: i32) -> (i32, i32, i32, i32, i32) {
    %c0_i32 = arith.constant 0 : i32
    %c0_i32_0 = arith.constant 0 : i32
    %c0_i32_1 = arith.constant 0 : i32
    %c0_i32_2 = arith.constant 0 : i32
    %c0_i32_3 = arith.constant 0 : i32
    return %arg0, %c0_i32, %c0_i32_0, %c0_i32_1, %c0_i32_2 : i32, i32, i32, i32, i32
  }
  func.func @transform_1(%arg0: i32) -> (i32, i32, i32) {
    %c0_i32 = arith.constant 0 : i32
    %c0_i32_0 = arith.constant 0 : i32
    %c0_i32_1 = arith.constant 0 : i32
    return %arg0, %c0_i32, %c0_i32_0 : i32, i32, i32
  }
}

module attributes {stable_mosaic.version = 11 : i64} {
  func.func @_qkv_kernel(%arg0: i32, %arg1: memref<256x64xbf16, #tpu.memory_space<vmem>>, %arg2: memref<64x8xbf16, #tpu.memory_space<vmem>>, %arg3: memref<64x40xbf16, #tpu.memory_space<vmem>>, %arg4: memref<256x8xbf16, #tpu.memory_space<vmem>>, %arg5: memref<256x40xbf16, #tpu.memory_space<vmem>>) attributes {dimension_semantics = [#tpu.dimension_semantics<parallel>], iteration_bounds = array<i64: 2>, scalar_prefetch = 0 : i64, scratch_operands = 0 : i64, tpu.core_type = #tpu.core_type<tc>, window_params = [{transform_indices = @transform_0, window_bounds = array<i64: 256, 64>}, {pipeline_mode = #tpu.pipeline_mode<synchronous>, transform_indices = @transform_1, window_bounds = array<i64: 64, 8>}, {pipeline_mode = #tpu.pipeline_mode<synchronous>, transform_indices = @transform_2, window_bounds = array<i64: 64, 40>}, {transform_indices = @transform_3, window_bounds = array<i64: 256, 8>}, {transform_indices = @transform_4, window_bounds = array<i64: 256, 40>}]} {
    %c0 = arith.constant 0 : index
    %c0_0 = arith.constant 0 : index
    %0 = vector.load %arg1[%c0, %c0_0] : memref<256x64xbf16, #tpu.memory_space<vmem>>, vector<256x64xbf16>
    %c0_1 = arith.constant 0 : index
    %c0_2 = arith.constant 0 : index
    %1 = vector.load %arg2[%c0_1, %c0_2] : memref<64x8xbf16, #tpu.memory_space<vmem>>, vector<64x8xbf16>
    %cst = arith.constant dense<0.000000e+00> : vector<256x8xf32>
    %2 = tpu.matmul %0, %1, %cst {dimension_numbers = #tpu.dot_dimension_numbers<[1], [0], [0], [1], [0, 0, 1, 1], [], []>} : vector<256x64xbf16>, vector<64x8xbf16>, vector<256x8xf32> -> vector<256x8xf32>
    %3 = arith.truncf %2 : vector<256x8xf32> to vector<256x8xbf16>
    %c0_3 = arith.constant 0 : index
    %c0_4 = arith.constant 0 : index
    %4 = vector.load %arg4[%c0_3, %c0_4] : memref<256x8xbf16, #tpu.memory_space<vmem>>, vector<256x8xbf16>
    tpu.vector_store %arg4[%c0_3, %c0_4], %3 {strides = array<i32>} : memref<256x8xbf16, #tpu.memory_space<vmem>>, vector<256x8xbf16>,
    %c0_5 = arith.constant 0 : index
    %c0_6 = arith.constant 0 : index
    %5 = vector.load %arg3[%c0_5, %c0_6] : memref<64x40xbf16, #tpu.memory_space<vmem>>, vector<64x40xbf16>
    %cst_7 = arith.constant dense<0.000000e+00> : vector<256x40xf32>
    %6 = tpu.matmul %0, %5, %cst_7 {dimension_numbers = #tpu.dot_dimension_numbers<[1], [0], [0], [1], [0, 0, 1, 1], [], []>} : vector<256x64xbf16>, vector<64x40xbf16>, vector<256x40xf32> -> vector<256x40xf32>
    %7 = arith.truncf %6 : vector<256x40xf32> to vector<256x40xbf16>
    %c0_8 = arith.constant 0 : index
    %c0_9 = arith.constant 0 : index
    %8 = vector.load %arg5[%c0_8, %c0_9] : memref<256x40xbf16, #tpu.memory_space<vmem>>, vector<256x40xbf16>
    tpu.vector_store %arg5[%c0_8, %c0_9], %7 {strides = array<i32>} : memref<256x40xbf16, #tpu.memory_space<vmem>>, vector<256x40xbf16>,
    return
  }
  func.func @transform_0(%arg0: i32) -> (i32, i32) {
    %c0_i32 = arith.constant 0 : i32
    %c0_i32_0 = arith.constant 0 : i32
    return %arg0, %c0_i32 : i32, i32
  }
  func.func @transform_1(%arg0: i32) -> (i32, i32) {
    %c0_i32 = arith.constant 0 : i32
    %c0_i32_0 = arith.constant 0 : i32
    %c0_i32_1 = arith.constant 0 : i32
    return %c0_i32, %c0_i32_0 : i32, i32
  }
  func.func @transform_2(%arg0: i32) -> (i32, i32) {
    %c0_i32 = arith.constant 0 : i32
    %c0_i32_0 = arith.constant 0 : i32
    %c0_i32_1 = arith.constant 0 : i32
    return %c0_i32, %c0_i32_0 : i32, i32
  }
  func.func @transform_3(%arg0: i32) -> (i32, i32) {
    %c0_i32 = arith.constant 0 : i32
    %c0_i32_0 = arith.constant 0 : i32
    return %arg0, %c0_i32 : i32, i32
  }
  func.func @transform_4(%arg0: i32) -> (i32, i32) {
    %c0_i32 = arith.constant 0 : i32
    %c0_i32_0 = arith.constant 0 : i32
    return %arg0, %c0_i32 : i32, i32
  }
}

module attributes {stable_mosaic.version = 11 : i64} {
  func.func @_attn_kernel(%arg0: i32, %arg1: i32, %arg2: i32, %arg3: memref<1x128x8xbf16, #tpu.memory_space<vmem>>, %arg4: memref<1x64x8xbf16, #tpu.memory_space<vmem>>, %arg5: memref<1x64x32xbf16, #tpu.memory_space<vmem>>, %arg6: memref<1x128x64xf32, #tpu.memory_space<vmem>>, %arg7: memref<32x64xbf16, #tpu.memory_space<vmem>>, %arg8: memref<1x128x64xf32, #tpu.memory_space<vmem>>, %arg9: memref<128x1xf32, #tpu.memory_space<vmem>>, %arg10: memref<128x1xf32, #tpu.memory_space<vmem>>, %arg11: memref<128x32xf32, #tpu.memory_space<vmem>>) attributes {dimension_semantics = [#tpu.dimension_semantics<parallel>, #tpu.dimension_semantics<parallel>, #tpu.dimension_semantics<arbitrary>], iteration_bounds = array<i64: 2, 2, 1>, scalar_prefetch = 0 : i64, scratch_operands = 3 : i64, tpu.core_type = #tpu.core_type<tc>, window_params = [{transform_indices = @transform_0, window_bounds = array<i64: 1, 128, 8>}, {transform_indices = @transform_1, window_bounds = array<i64: 1, 64, 8>}, {transform_indices = @transform_2, window_bounds = array<i64: 1, 64, 32>}, {transform_indices = @transform_3, window_bounds = array<i64: 1, 128, 64>}, {pipeline_mode = #tpu.pipeline_mode<synchronous>, transform_indices = @transform_4, window_bounds = array<i64: 32, 64>}, {transform_indices = @transform_5, window_bounds = array<i64: 1, 128, 64>}]} {
    %c0_i32 = arith.constant 0 : i32
    %0 = arith.cmpi eq, %arg2, %c0_i32 : i32
    %1 = arith.extui %0 : i1 to i32
    %c0_i32_0 = arith.constant 0 : i32
    %2 = arith.cmpi ne, %1, %c0_i32_0 : i32
    scf.if %2 {
      %cst_26 = arith.constant 0xFF800000 : f32
      %36 = vector.broadcast %cst_26 : f32 to vector<128x1xf32>
      %c0_27 = arith.constant 0 : index
      %c0_28 = arith.constant 0 : index
      %37 = vector.load %arg9[%c0_27, %c0_28] : memref<128x1xf32, #tpu.memory_space<vmem>>, vector<128x1xf32>
      tpu.vector_store %arg9[%c0_27, %c0_28], %36 {strides = array<i32>} : memref<128x1xf32, #tpu.memory_space<vmem>>, vector<128x1xf32>,
      %cst_29 = arith.constant 0.000000e+00 : f32
      %38 = vector.broadcast %cst_29 : f32 to vector<128x1xf32>
      %c0_30 = arith.constant 0 : index
      %c0_31 = arith.constant 0 : index
      %39 = vector.load %arg10[%c0_30, %c0_31] : memref<128x1xf32, #tpu.memory_space<vmem>>, vector<128x1xf32>
      tpu.vector_store %arg10[%c0_30, %c0_31], %38 {strides = array<i32>} : memref<128x1xf32, #tpu.memory_space<vmem>>, vector<128x1xf32>,
      %cst_32 = arith.constant 0.000000e+00 : f32
      %40 = vector.broadcast %cst_32 : f32 to vector<128x32xf32>
      %c0_33 = arith.constant 0 : index
      %c0_34 = arith.constant 0 : index
      %41 = vector.load %arg11[%c0_33, %c0_34] : memref<128x32xf32, #tpu.memory_space<vmem>>, vector<128x32xf32>
      tpu.vector_store %arg11[%c0_33, %c0_34], %40 {strides = array<i32>} : memref<128x32xf32, #tpu.memory_space<vmem>>, vector<128x32xf32>,
    } else {
    }
    %c0 = arith.constant 0 : index
    %c0_1 = arith.constant 0 : index
    %c0_2 = arith.constant 0 : index
    %3 = vector.load %arg3[%c0, %c0_1, %c0_2] : memref<1x128x8xbf16, #tpu.memory_space<vmem>>, vector<1x128x8xbf16>
    %4 = vector.shape_cast %3 : vector<1x128x8xbf16> to vector<128x8xbf16>
    %c0_3 = arith.constant 0 : index
    %c0_4 = arith.constant 0 : index
    %c0_5 = arith.constant 0 : index
    %5 = vector.load %arg4[%c0_3, %c0_4, %c0_5] : memref<1x64x8xbf16, #tpu.memory_space<vmem>>, vector<1x64x8xbf16>
    %6 = vector.shape_cast %5 : vector<1x64x8xbf16> to vector<64x8xbf16>
    %cst = arith.constant dense<0.000000e+00> : vector<128x64xf32>
    %7 = tpu.matmul %4, %6, %cst {dimension_numbers = #tpu.dot_dimension_numbers<[1], [1], [0], [0], [0, 0, 1, 0], [], []>} : vector<128x8xbf16>, vector<64x8xbf16>, vector<128x64xf32> -> vector<128x64xf32>
    %c0_6 = arith.constant 0 : index
    %c0_7 = arith.constant 0 : index
    %8 = vector.load %arg9[%c0_6, %c0_7] : memref<128x1xf32, #tpu.memory_space<vmem>>, vector<128x1xf32>
    %cst_8 = arith.constant dense<0xFF800000> : vector<128xf32>
    %9 = vector.multi_reduction <maximumf>, %7, %cst_8 [1] : vector<128x64xf32> to vector<128xf32>
    %10 = vector.shape_cast %9 : vector<128xf32> to vector<128x1xf32>
    %11 = arith.maximumf %8, %10 : vector<128x1xf32>
    %12 = arith.subf %8, %11 : vector<128x1xf32>
    %13 = math.exp %12 : vector<128x1xf32>
    %14 = vector.broadcast %11 : vector<128x1xf32> to vector<128x64xf32>
    %15 = arith.subf %7, %14 : vector<128x64xf32>
    %16 = math.exp %15 : vector<128x64xf32>
    %c0_9 = arith.constant 0 : index
    %c0_10 = arith.constant 0 : index
    %17 = vector.load %arg10[%c0_9, %c0_10] : memref<128x1xf32, #tpu.memory_space<vmem>>, vector<128x1xf32>
    %18 = arith.mulf %13, %17 : vector<128x1xf32>
    %cst_11 = arith.constant dense<0.000000e+00> : vector<128xf32>
    %19 = vector.multi_reduction <add>, %16, %cst_11 [1] : vector<128x64xf32> to vector<128xf32>
    %20 = vector.shape_cast %19 : vector<128xf32> to vector<128x1xf32>
    %21 = arith.addf %18, %20 : vector<128x1xf32>
    %c0_12 = arith.constant 0 : index
    %c0_13 = arith.constant 0 : index
    %22 = vector.load %arg10[%c0_12, %c0_13] : memref<128x1xf32, #tpu.memory_space<vmem>>, vector<128x1xf32>
    tpu.vector_store %arg10[%c0_12, %c0_13], %21 {strides = array<i32>} : memref<128x1xf32, #tpu.memory_space<vmem>>, vector<128x1xf32>,
    %c0_14 = arith.constant 0 : index
    %c0_15 = arith.constant 0 : index
    %23 = vector.load %arg11[%c0_14, %c0_15] : memref<128x32xf32, #tpu.memory_space<vmem>>, vector<128x32xf32>
    %24 = vector.broadcast %13 : vector<128x1xf32> to vector<128x32xf32>
    %25 = arith.mulf %24, %23 : vector<128x32xf32>
    %26 = arith.truncf %16 : vector<128x64xf32> to vector<128x64xbf16>
    %c0_16 = arith.constant 0 : index
    %c0_17 = arith.constant 0 : index
    %c0_18 = arith.constant 0 : index
    %27 = vector.load %arg5[%c0_16, %c0_17, %c0_18] : memref<1x64x32xbf16, #tpu.memory_space<vmem>>, vector<1x64x32xbf16>
    %28 = vector.shape_cast %27 : vector<1x64x32xbf16> to vector<64x32xbf16>
    %cst_19 = arith.constant dense<0.000000e+00> : vector<128x32xf32>
    %29 = tpu.matmul %26, %28, %cst_19 {dimension_numbers = #tpu.dot_dimension_numbers<[1], [0], [0], [1], [0, 0, 1, 1], [], []>} : vector<128x64xbf16>, vector<64x32xbf16>, vector<128x32xf32> -> vector<128x32xf32>
    %30 = arith.addf %25, %29 : vector<128x32xf32>
    %c0_20 = arith.constant 0 : index
    %c0_21 = arith.constant 0 : index
    %31 = vector.load %arg11[%c0_20, %c0_21] : memref<128x32xf32, #tpu.memory_space<vmem>>, vector<128x32xf32>
    tpu.vector_store %arg11[%c0_20, %c0_21], %30 {strides = array<i32>} : memref<128x32xf32, #tpu.memory_space<vmem>>, vector<128x32xf32>,
    %c0_22 = arith.constant 0 : index
    %c0_23 = arith.constant 0 : index
    %32 = vector.load %arg9[%c0_22, %c0_23] : memref<128x1xf32, #tpu.memory_space<vmem>>, vector<128x1xf32>
    tpu.vector_store %arg9[%c0_22, %c0_23], %11 {strides = array<i32>} : memref<128x1xf32, #tpu.memory_space<vmem>>, vector<128x1xf32>,
    %c0_i32_24 = arith.constant 0 : i32
    %33 = arith.cmpi eq, %arg2, %c0_i32_24 : i32
    %34 = arith.extui %33 : i1 to i32
    %c0_i32_25 = arith.constant 0 : i32
    %35 = arith.cmpi ne, %34, %c0_i32_25 : i32
    scf.if %35 {
      %c0_26 = arith.constant 0 : index
      %c0_27 = arith.constant 0 : index
      %36 = vector.load %arg11[%c0_26, %c0_27] : memref<128x32xf32, #tpu.memory_space<vmem>>, vector<128x32xf32>
      %c0_28 = arith.constant 0 : index
      %c0_29 = arith.constant 0 : index
      %37 = vector.load %arg10[%c0_28, %c0_29] : memref<128x1xf32, #tpu.memory_space<vmem>>, vector<128x1xf32>
      %38 = tpu.reciprocal %37 {approx = true} : vector<128x1xf32> -> vector<128x1xf32>
      %39 = vector.broadcast %38 : vector<128x1xf32> to vector<128x32xf32>
      %40 = arith.mulf %36, %39 : vector<128x32xf32>
      %41 = arith.truncf %40 : vector<128x32xf32> to vector<128x32xbf16>
      %c0_30 = arith.constant 0 : index
      %c0_31 = arith.constant 0 : index
      %42 = vector.load %arg7[%c0_30, %c0_31] : memref<32x64xbf16, #tpu.memory_space<vmem>>, vector<32x64xbf16>
      %cst_32 = arith.constant dense<0.000000e+00> : vector<128x64xf32>
      %43 = tpu.matmul %41, %42, %cst_32 {dimension_numbers = #tpu.dot_dimension_numbers<[1], [0], [0], [1], [0, 0, 1, 1], [], []>} : vector<128x32xbf16>, vector<32x64xbf16>, vector<128x64xf32> -> vector<128x64xf32>
      %c0_33 = arith.constant 0 : index
      %c0_34 = arith.constant 0 : index
      %c0_35 = arith.constant 0 : index
      %44 = vector.load %arg6[%c0_33, %c0_34, %c0_35] : memref<1x128x64xf32, #tpu.memory_space<vmem>>, vector<1x128x64xf32>
      %45 = vector.shape_cast %44 : vector<1x128x64xf32> to vector<128x64xf32>
      %46 = arith.addf %45, %43 : vector<128x64xf32>
      %c0_36 = arith.constant 0 : index
      %c0_37 = arith.constant 0 : index
      %c0_38 = arith.constant 0 : index
      %47 = vector.load %arg8[%c0_36, %c0_37, %c0_38] : memref<1x128x64xf32, #tpu.memory_space<vmem>>, vector<1x128x64xf32>
      %48 = vector.shape_cast %47 : vector<1x128x64xf32> to vector<128x64xf32>
      %49 = vector.shape_cast %46 : vector<128x64xf32> to vector<1x128x64xf32>
      tpu.vector_store %arg8[%c0_36, %c0_37, %c0_38], %49 {strides = array<i32>} : memref<1x128x64xf32, #tpu.memory_space<vmem>>, vector<1x128x64xf32>,
    } else {
    }
    return
  }
  func.func @transform_0(%arg0: i32, %arg1: i32, %arg2: i32) -> (i32, i32, i32) {
    %c0_i32 = arith.constant 0 : i32
    %c0_i32_0 = arith.constant 0 : i32
    return %arg0, %arg1, %c0_i32 : i32, i32, i32
  }
  func.func @transform_1(%arg0: i32, %arg1: i32, %arg2: i32) -> (i32, i32, i32) {
    %c0_i32 = arith.constant 0 : i32
    %c0_i32_0 = arith.constant 0 : i32
    return %arg0, %arg2, %c0_i32 : i32, i32, i32
  }
  func.func @transform_2(%arg0: i32, %arg1: i32, %arg2: i32) -> (i32, i32, i32) {
    %c0_i32 = arith.constant 0 : i32
    %c0_i32_0 = arith.constant 0 : i32
    return %arg0, %arg2, %c0_i32 : i32, i32, i32
  }
  func.func @transform_3(%arg0: i32, %arg1: i32, %arg2: i32) -> (i32, i32, i32) {
    %c0_i32 = arith.constant 0 : i32
    %c0_i32_0 = arith.constant 0 : i32
    return %arg0, %arg1, %c0_i32 : i32, i32, i32
  }
  func.func @transform_4(%arg0: i32, %arg1: i32, %arg2: i32) -> (i32, i32) {
    %c0_i32 = arith.constant 0 : i32
    %c0_i32_0 = arith.constant 0 : i32
    %c0_i32_1 = arith.constant 0 : i32
    return %c0_i32, %c0_i32_0 : i32, i32
  }
  func.func @transform_5(%arg0: i32, %arg1: i32, %arg2: i32) -> (i32, i32, i32) {
    %c0_i32 = arith.constant 0 : i32
    %c0_i32_0 = arith.constant 0 : i32
    return %arg0, %arg1, %c0_i32 : i32, i32, i32
  }
}

</mosaic_0001>

<bundles_post_ra>
// kernel: self_attn_forward.3
= control target key start
LH: loop header
LB: loop body
LE: loop exit
PB: predicated region body
PF: predicated region fallthrough
CT: control target
= control target key end

     0   :  { %s1557_s15 = smov 0   ;;  %s1788_s0 = inlined_call_operand.vmem [shape: bf16[512,64], index: 0, kind: input, shape index: {}]   ;;  %s1789_s1 = inlined_call_operand.vmem [shape: bf16[64,8], index: 1, kind: input, shape index: {}]   ;;  %s1790_s2 = inlined_call_operand.vmem [shape: bf16[64,40], index: 2, kind: input, shape index: {}]   ;;  %s1791_s3 = inlined_call_operand.vmem [shape: bf16[512,8], index: 3, kind: output, shape index: {0}]   ;;  %s1792_s4 = inlined_call_operand.vmem [shape: bf16[512,40], index: 4, kind: output, shape index: {1}]  }
   0x1 LB: > { %s1175_s16 = sadd.s32 4294967295, %s1530_s15   ;;  %p1179_p0 = scmp.ge.s32.totalorder %s1530_s15, 1  ;;  %s1530_s15 = sphi %s1557_s15, %s15_s15  }
   0x2   : > { %p166_p1 = scmp.lt.s32.totalorder %s1530_s15, 3 }
   0x4   : > { %p167_p2 = pnand %p1179_p0, %p166_p1 }
   0x5   : > { %s1180_s19 = sshll.u32 (!%p167_p2), %s1175_s16, 5 }
   0x6   : > { %170 = sbr.rel (%p167_p2) target bundleno = 287 (0x11f), region = 32  ;;  %p198_p3 = scmp.lt.s32.totalorder (!%p167_p2), %s1180_s19, 63 }
   0xb   : > { %v1500_v0 = vld [vmem:[%s1789_s1 + $0x18] sm:$0xff]   ;;  %v1502_v2 = vld [vmem:[%s1789_s1 + $0x10] sm:$0xff]   ;;  %s1794_s19 = smov (!%p198_p3, %s1180_s19), 63  ;;  %v1504_v4 = vld [vmem:[%s1789_s1 + $0x8] sm:$0xff]   ;;  %vm360_vm0 = vcmask 523264   ;;  %vm698_vm1 = vcmask 60416  }
   0xc   : > { %v1501_v1 = vld [vmem:[%s1790_s2 + $0x18] sm:$0xff]   ;;  %1412 = vmatprep.subr.bf16.mxu0 %v1500_v0  ;;  %v1503_v3 = vld [vmem:[%s1790_s2 + $0x10] sm:$0xff]   ;;  %v1505_v5 = vld [vmem:[%s1790_s2 + $0x8] sm:$0xff]   ;;  %s1583_s30 = sshll.u32 %s1794_s19, 2  ;;  %vm1052_vm2 = vcmask 322560  }
   0xd   : > { %1452 = vmatprep.subr.bf16.mxu1 %v1501_v1  ;;  %1413 = vmatpush3.bf16.msra.mxu0 %v1500_v0  ;;  %s1589_s7 = scalar_lea.vmem %s1788_s0, %s1583_s30  ;;  %v1506_v6 = vld [vmem:[%s1789_s1] sm:$0xff]   ;;  %s1649_s14 = scalar_lea.vmem %s1791_s3, %s1583_s30 }
   0xe   : > { %1453 = vmatpush3.bf16.msra.mxu1 %v1501_v1  ;;  %1414 = vmatprep.subr.bf16.mxu0 %v1502_v2  ;;  %v1508_v7 = vld [vmem:[%s1589_s7] sm:$0xff]   ;;  %v1509_v9 = vld [vmem:[%s1589_s7 + $0x8] sm:$0xff]   ;;  %v1510_v10 = vld [vmem:[%s1589_s7 + $0x10] sm:$0xff]   ;;  %s1655_s18 = scalar_lea.vmem %s1792_s4, %s1583_s30 }
   0xf   : > { %1454 = vmatprep.subr.bf16.mxu1 %v1503_v3  ;;  %v1507_v8 = vld [vmem:[%s1790_s2] sm:$0xff]   ;;  %1420 = vmatprep.mubr.msk.bf16.mxu0 %vm360_vm0, %v1508_v7  ;;  %v1511_v11 = vld [vmem:[%s1589_s7 + $0x18] sm:$0xff]   ;;  %v1513_v13 = vld [vmem:[%s1589_s7 + $0x28] sm:$0xff]  }
  0x10   : > { %1460 = vmatprep.mubr.msk.bf16.mxu1 %vm360_vm0, %v1508_v7  ;;  %v1512_v12 = vld [vmem:[%s1589_s7 + $0x20] sm:$0xff]   ;;  %v1514_v14 = vld [vmem:[%s1589_s7 + $0x30] sm:$0xff]   ;;  %v1515_v15 = vld [vmem:[%s1589_s7 + $0x38] sm:$0xff]  }
  0x11   : > { %1415 = vmatpush3.bf16.msra.mxu0 %v1502_v2  ;;  %v1516_v16 = vld [vmem:[%s1589_s7 + $0x40] sm:$0xff]   ;;  %v1517_v17 = vld [vmem:[%s1589_s7 + $0x48] sm:$0xff]   ;;  %v1518_v18 = vld [vmem:[%s1589_s7 + $0x50] sm:$0xff]  }
  0x12   : > { %1455 = vmatpush3.bf16.msra.mxu1 %v1503_v3  ;;  %1416 = vmatprep.subr.bf16.mxu0 %v1504_v4  ;;  %v1519_v19 = vld [vmem:[%s1589_s7 + $0x58] sm:$0xff]   ;;  %v1520_v20 = vld [vmem:[%s1589_s7 + $0x60] sm:$0xff]   ;;  %v1521_v21 = vld [vmem:[%s1589_s7 + $0x68] sm:$0xff]  }
  0x13   : > { %1456 = vmatprep.subr.bf16.mxu1 %v1505_v5  ;;  %v1522_v22 = vld [vmem:[%s1589_s7 + $0x70] sm:$0xff]   ;;  %v1523_v23 = vld [vmem:[%s1589_s7 + $0x78] sm:$0xff]  }
  0x15   : > { %1417 = vmatpush3.bf16.msra.mxu0 %v1504_v4 }
  0x16   : > { %1457 = vmatpush3.bf16.msra.mxu1 %v1505_v5  ;;  %1418 = vmatprep.subr.bf16.mxu0 %v1506_v6 }
  0x17   : > { %1458 = vmatprep.subr.bf16.mxu1 %v1507_v8 }
  0x19   : > { %1419 = vmatpush3.bf16.msra.mxu0 %v1506_v6 }
  0x1a   : > { %1459 = vmatpush3.bf16.msra.mxu1 %v1507_v8 }
  0x1c   : > { %1421 = vmatmul.mubr.msk.bf16.vlgmr.msra.gmra.mxu0 %vm360_vm0, %v1509_v9 }
  0x1d   : > { %1461 = vmatmul.mubr.msk.bf16.vlgmr.msra.gmra.mxu1 %vm360_vm0, %v1509_v9  ;;  %1424 = vmatprep.mubr.msk.bf16.mxu0 %vm360_vm0, %v1510_v10 }
  0x1e   : > { %1464 = vmatprep.mubr.msk.bf16.mxu1 %vm360_vm0, %v1510_v10 }
  0x24   : > { %1425 = vmatmul.mubr.msk.bf16.gmra.mxu0 %vm360_vm0, %v1511_v11 }
  0x25   : > { %1465 = vmatmul.mubr.msk.bf16.gmra.mxu1 %vm360_vm0, %v1511_v11  ;;  %1428 = vmatprep.mubr.msk.bf16.mxu0 %vm360_vm0, %v1512_v12 }
  0x26   : > { %1468 = vmatprep.mubr.msk.bf16.mxu1 %vm360_vm0, %v1512_v12 }
  0x2c   : > { %1429 = vmatmul.mubr.msk.bf16.gmra.mxu0 %vm360_vm0, %v1513_v13 }
  0x2d   : > { %1469 = vmatmul.mubr.msk.bf16.gmra.mxu1 %vm360_vm0, %v1513_v13  ;;  %1432 = vmatprep.mubr.msk.bf16.mxu0 %vm360_vm0, %v1514_v14 }
  0x2e   : > { %1472 = vmatprep.mubr.msk.bf16.mxu1 %vm360_vm0, %v1514_v14 }
  0x34   : > { %1433 = vmatmul.mubr.msk.bf16.gmra.mxu0 %vm360_vm0, %v1515_v15 }
  0x35   : > { %1473 = vmatmul.mubr.msk.bf16.gmra.mxu1 %vm360_vm0, %v1515_v15  ;;  %1436 = vmatprep.mubr.msk.bf16.mxu0 %vm360_vm0, %v1516_v16 }
  0x36   : > { %1476 = vmatprep.mubr.msk.bf16.mxu1 %vm360_vm0, %v1516_v16 }
  0x3c   : > { %1437 = vmatmul.mubr.msk.bf16.gmra.mxu0 %vm360_vm0, %v1517_v17 }
  0x3d   : > { %1477 = vmatmul.mubr.msk.bf16.gmra.mxu1 %vm360_vm0, %v1517_v17  ;;  %1440 = vmatprep.mubr.msk.bf16.mxu0 %vm360_vm0, %v1518_v18 }
  0x3e   : > { %1480 = vmatprep.mubr.msk.bf16.mxu1 %vm360_vm0, %v1518_v18 }
  0x44   : > { %1441 = vmatmul.mubr.msk.bf16.gmra.mxu0 %vm360_vm0, %v1519_v19 }
  0x45   : > { %1481 = vmatmul.mubr.msk.bf16.gmra.mxu1 %vm360_vm0, %v1519_v19  ;;  %1444 = vmatprep.mubr.msk.bf16.mxu0 %vm360_vm0, %v1520_v20 }
  0x46   : > { %1484 = vmatprep.mubr.msk.bf16.mxu1 %vm360_vm0, %v1520_v20 }
  0x4c   : > { %1445 = vmatmul.mubr.msk.bf16.gmra.mxu0 %vm360_vm0, %v1521_v21 }
  0x4d   : > { %1485 = vmatmul.mubr.msk.bf16.gmra.mxu1 %vm360_vm0, %v1521_v21  ;;  %1448 = vmatprep.mubr.msk.bf16.mxu0 %vm360_vm0, %v1522_v22 }
  0x4e   : > { %1488 = vmatprep.mubr.msk.bf16.mxu1 %vm360_vm0, %v1522_v22 }
  0x54   : > { %1449 = vmatmul.mubr.msk.bf16.gmra.mxu0 %vm360_vm0, %v1523_v23 }
  0x55   : > { %1489 = vmatmul.mubr.msk.bf16.gmra.mxu1 %vm360_vm0, %v1523_v23 }
  0xdc   : > { %v1422_v24 = vpop.f32.mrf.mxu0 }
  0xdd   : > { %v1310_v25 = vpack.c.bf16 %v1422_v24, %v1422_v24  ;;  %v1462_v26 = vpop.f32.mrf.mxu1 }
  0xde   : > { %v1342_v27 = vpack.c.bf16 %v1462_v26, %v1462_v26  ;;  %v443_v28 = vpop.f32.mrf.mxu0 }
  0xdf   : > { %701 = vst.msk [vmem:[%s1649_s14 + $0x8] sm:$0xf] %vm698_vm1, %v1310_v25  ;;  %v1308_v29 = vpack.c.bf16 %v443_v28, %v443_v28  ;;  %v797_v30 = vpop.f32.mrf.mxu1 }
  0xe0   : > { %1055 = vst.msk [vmem:[%s1655_s18 + $0x8] sm:$0xf] %vm1052_vm2, %v1342_v27  ;;  %v1340_v31 = vpack.c.bf16 %v797_v30, %v797_v30  ;;  %v1423_v32 = vpop.f32.mrf.mxu0 }
  0xe1   : > { %699 = vst.msk [vmem:[%s1649_s14] sm:$0xf] %vm698_vm1, %v1308_v29  ;;  %v1311_v33 = vpack.c.bf16 %v1423_v32, %v1423_v32  ;;  %v1463_v34 = vpop.f32.mrf.mxu1 }
  0xe2   : > { %1053 = vst.msk [vmem:[%s1655_s18] sm:$0xf] %vm1052_vm2, %v1340_v31  ;;  %v1343_v35 = vpack.c.bf16 %v1463_v34, %v1463_v34  ;;  %v446_v36 = vpop.f32.mrf.mxu0 }
  0xe3   : > { %702 = vst.msk [vmem:[%s1649_s14 + $0xc] sm:$0xf] %vm698_vm1, %v1311_v33  ;;  %v1309_v37 = vpack.c.bf16 %v446_v36, %v446_v36  ;;  %v800_v38 = vpop.f32.mrf.mxu1 }
  0xe4   : > { %1056 = vst.msk [vmem:[%s1655_s18 + $0xc] sm:$0xf] %vm1052_vm2, %v1343_v35  ;;  %v1341_v39 = vpack.c.bf16 %v800_v38, %v800_v38  ;;  %v1426_v40 = vpop.f32.mrf.mxu0 }
  0xe5   : > { %700 = vst.msk [vmem:[%s1649_s14 + $0x4] sm:$0xf] %vm698_vm1, %v1309_v37  ;;  %v1314_v41 = vpack.c.bf16 %v1426_v40, %v1426_v40  ;;  %v1466_v42 = vpop.f32.mrf.mxu1 }
  0xe6   : > { %1054 = vst.msk [vmem:[%s1655_s18 + $0x4] sm:$0xf] %vm1052_vm2, %v1341_v39  ;;  %v1346_v43 = vpack.c.bf16 %v1466_v42, %v1466_v42  ;;  %v459_v44 = vpop.f32.mrf.mxu0 }
  0xe7   : > { %705 = vst.msk [vmem:[%s1649_s14 + $0x18] sm:$0xf] %vm698_vm1, %v1314_v41  ;;  %v1312_v45 = vpack.c.bf16 %v459_v44, %v459_v44  ;;  %v813_v46 = vpop.f32.mrf.mxu1 }
  0xe8   : > { %1059 = vst.msk [vmem:[%s1655_s18 + $0x18] sm:$0xf] %vm1052_vm2, %v1346_v43  ;;  %v1344_v47 = vpack.c.bf16 %v813_v46, %v813_v46  ;;  %v1427_v48 = vpop.f32.mrf.mxu0 }
  0xe9   : > { %703 = vst.msk [vmem:[%s1649_s14 + $0x10] sm:$0xf] %vm698_vm1, %v1312_v45  ;;  %v1315_v49 = vpack.c.bf16 %v1427_v48, %v1427_v48  ;;  %v1467_v50 = vpop.f32.mrf.mxu1 }
  0xea   : > { %1057 = vst.msk [vmem:[%s1655_s18 + $0x10] sm:$0xf] %vm1052_vm2, %v1344_v47  ;;  %v1347_v51 = vpack.c.bf16 %v1467_v50, %v1467_v50  ;;  %v462_v52 = vpop.f32.mrf.mxu0 }
  0xeb   : > { %706 = vst.msk [vmem:[%s1649_s14 + $0x1c] sm:$0xf] %vm698_vm1, %v1315_v49  ;;  %v1313_v53 = vpack.c.bf16 %v462_v52, %v462_v52  ;;  %v816_v54 = vpop.f32.mrf.mxu1 }
  0xec   : > { %1060 = vst.msk [vmem:[%s1655_s18 + $0x1c] sm:$0xf] %vm1052_vm2, %v1347_v51  ;;  %v1345_v55 = vpack.c.bf16 %v816_v54, %v816_v54  ;;  %v1430_v56 = vpop.f32.mrf.mxu0 }
  0xed   : > { %704 = vst.msk [vmem:[%s1649_s14 + $0x14] sm:$0xf] %vm698_vm1, %v1313_v53  ;;  %v1318_v57 = vpack.c.bf16 %v1430_v56, %v1430_v56  ;;  %v1470_v58 = vpop.f32.mrf.mxu1 }
  0xee   : > { %1058 = vst.msk [vmem:[%s1655_s18 + $0x14] sm:$0xf] %vm1052_vm2, %v1345_v55  ;;  %v1350_v59 = vpack.c.bf16 %v1470_v58, %v1470_v58  ;;  %v475_v60 = vpop.f32.mrf.mxu0 }
  0xef   : > { %709 = vst.msk [vmem:[%s1649_s14 + $0x28] sm:$0xf] %vm698_vm1, %v1318_v57  ;;  %v1316_v61 = vpack.c.bf16 %v475_v60, %v475_v60  ;;  %v829_v62 = vpop.f32.mrf.mxu1 }
  0xf0   : > { %1063 = vst.msk [vmem:[%s1655_s18 + $0x28] sm:$0xf] %vm1052_vm2, %v1350_v59  ;;  %v1348_v63 = vpack.c.bf16 %v829_v62, %v829_v62  ;;  %v1431_v0 = vpop.f32.mrf.mxu0 }
  0xf1   : > { %707 = vst.msk [vmem:[%s1649_s14 + $0x20] sm:$0xf] %vm698_vm1, %v1316_v61  ;;  %v1319_v1 = vpack.c.bf16 %v1431_v0, %v1431_v0  ;;  %v1471_v2 = vpop.f32.mrf.mxu1 }
  0xf2   : > { %1061 = vst.msk [vmem:[%s1655_s18 + $0x20] sm:$0xf] %vm1052_vm2, %v1348_v63  ;;  %v1351_v3 = vpack.c.bf16 %v1471_v2, %v1471_v2  ;;  %v478_v4 = vpop.f32.mrf.mxu0 }
  0xf3   : > { %710 = vst.msk [vmem:[%s1649_s14 + $0x2c] sm:$0xf] %vm698_vm1, %v1319_v1  ;;  %v1317_v5 = vpack.c.bf16 %v478_v4, %v478_v4  ;;  %v832_v6 = vpop.f32.mrf.mxu1 }
  0xf4   : > { %1064 = vst.msk [vmem:[%s1655_s18 + $0x2c] sm:$0xf] %vm1052_vm2, %v1351_v3  ;;  %v1349_v7 = vpack.c.bf16 %v832_v6, %v832_v6  ;;  %v1434_v8 = vpop.f32.mrf.mxu0 }
  0xf5   : > { %708 = vst.msk [vmem:[%s1649_s14 + $0x24] sm:$0xf] %vm698_vm1, %v1317_v5  ;;  %v1322_v9 = vpack.c.bf16 %v1434_v8, %v1434_v8  ;;  %v1474_v10 = vpop.f32.mrf.mxu1 }
  0xf6   : > { %1062 = vst.msk [vmem:[%s1655_s18 + $0x24] sm:$0xf] %vm1052_vm2, %v1349_v7  ;;  %v1354_v11 = vpack.c.bf16 %v1474_v10, %v1474_v10  ;;  %v491_v12 = vpop.f32.mrf.mxu0 }
  0xf7   : > { %713 = vst.msk [vmem:[%s1649_s14 + $0x38] sm:$0xf] %vm698_vm1, %v1322_v9  ;;  %v1320_v13 = vpack.c.bf16 %v491_v12, %v491_v12  ;;  %v845_v14 = vpop.f32.mrf.mxu1 }
  0xf8   : > { %1067 = vst.msk [vmem:[%s1655_s18 + $0x38] sm:$0xf] %vm1052_vm2, %v1354_v11  ;;  %v1352_v15 = vpack.c.bf16 %v845_v14, %v845_v14  ;;  %v1435_v16 = vpop.f32.mrf.mxu0 }
  0xf9   : > { %711 = vst.msk [vmem:[%s1649_s14 + $0x30] sm:$0xf] %vm698_vm1, %v1320_v13  ;;  %v1323_v17 = vpack.c.bf16 %v1435_v16, %v1435_v16  ;;  %v1475_v18 = vpop.f32.mrf.mxu1 }
  0xfa   : > { %1065 = vst.msk [vmem:[%s1655_s18 + $0x30] sm:$0xf] %vm1052_vm2, %v1352_v15  ;;  %v1355_v19 = vpack.c.bf16 %v1475_v18, %v1475_v18  ;;  %v494_v20 = vpop.f32.mrf.mxu0 }
  0xfb   : > { %714 = vst.msk [vmem:[%s1649_s14 + $0x3c] sm:$0xf] %vm698_vm1, %v1323_v17  ;;  %v1321_v21 = vpack.c.bf16 %v494_v20, %v494_v20  ;;  %v848_v22 = vpop.f32.mrf.mxu1 }
  0xfc   : > { %1068 = vst.msk [vmem:[%s1655_s18 + $0x3c] sm:$0xf] %vm1052_vm2, %v1355_v19  ;;  %v1353_v23 = vpack.c.bf16 %v848_v22, %v848_v22  ;;  %v1438_v24 = vpop.f32.mrf.mxu0 }
  0xfd   : > { %712 = vst.msk [vmem:[%s1649_s14 + $0x34] sm:$0xf] %vm698_vm1, %v1321_v21  ;;  %v1326_v25 = vpack.c.bf16 %v1438_v24, %v1438_v24  ;;  %v1478_v26 = vpop.f32.mrf.mxu1 }
  0xfe   : > { %1066 = vst.msk [vmem:[%s1655_s18 + $0x34] sm:$0xf] %vm1052_vm2, %v1353_v23  ;;  %v1358_v27 = vpack.c.bf16 %v1478_v26, %v1478_v26  ;;  %v507_v28 = vpop.f32.mrf.mxu0 }
  0xff   : > { %717 = vst.msk [vmem:[%s1649_s14 + $0x48] sm:$0xf] %vm698_vm1, %v1326_v25  ;;  %v1324_v29 = vpack.c.bf16 %v507_v28, %v507_v28  ;;  %v861_v30 = vpop.f32.mrf.mxu1 }
 0x100   : > { %1071 = vst.msk [vmem:[%s1655_s18 + $0x48] sm:$0xf] %vm1052_vm2, %v1358_v27  ;;  %v1356_v31 = vpack.c.bf16 %v861_v30, %v861_v30  ;;  %v1439_v32 = vpop.f32.mrf.mxu0 }
 0x101   : > { %715 = vst.msk [vmem:[%s1649_s14 + $0x40] sm:$0xf] %vm698_vm1, %v1324_v29  ;;  %v1327_v33 = vpack.c.bf16 %v1439_v32, %v1439_v32  ;;  %v1479_v34 = vpop.f32.mrf.mxu1 }
 0x102   : > { %1069 = vst.msk [vmem:[%s1655_s18 + $0x40] sm:$0xf] %vm1052_vm2, %v1356_v31  ;;  %v1359_v35 = vpack.c.bf16 %v1479_v34, %v1479_v34  ;;  %v510_v36 = vpop.f32.mrf.mxu0 }
 0x103   : > { %718 = vst.msk [vmem:[%s1649_s14 + $0x4c] sm:$0xf] %vm698_vm1, %v1327_v33  ;;  %v1325_v37 = vpack.c.bf16 %v510_v36, %v510_v36  ;;  %v864_v38 = vpop.f32.mrf.mxu1 }
 0x104   : > { %1072 = vst.msk [vmem:[%s1655_s18 + $0x4c] sm:$0xf] %vm1052_vm2, %v1359_v35  ;;  %v1357_v39 = vpack.c.bf16 %v864_v38, %v864_v38  ;;  %v1442_v40 = vpop.f32.mrf.mxu0 }
 0x105   : > { %716 = vst.msk [vmem:[%s1649_s14 + $0x44] sm:$0xf] %vm698_vm1, %v1325_v37  ;;  %v1330_v41 = vpack.c.bf16 %v1442_v40, %v1442_v40  ;;  %v1482_v42 = vpop.f32.mrf.mxu1 }
 0x106   : > { %1070 = vst.msk [vmem:[%s1655_s18 + $0x44] sm:$0xf] %vm1052_vm2, %v1357_v39  ;;  %v1362_v43 = vpack.c.bf16 %v1482_v42, %v1482_v42  ;;  %v523_v44 = vpop.f32.mrf.mxu0 }
 0x107   : > { %721 = vst.msk [vmem:[%s1649_s14 + $0x58] sm:$0xf] %vm698_vm1, %v1330_v41  ;;  %v1328_v45 = vpack.c.bf16 %v523_v44, %v523_v44  ;;  %v877_v46 = vpop.f32.mrf.mxu1 }
 0x108   : > { %1075 = vst.msk [vmem:[%s1655_s18 + $0x58] sm:$0xf] %vm1052_vm2, %v1362_v43  ;;  %v1360_v47 = vpack.c.bf16 %v877_v46, %v877_v46  ;;  %v1443_v48 = vpop.f32.mrf.mxu0 }
 0x109   : > { %719 = vst.msk [vmem:[%s1649_s14 + $0x50] sm:$0xf] %vm698_vm1, %v1328_v45  ;;  %v1331_v49 = vpack.c.bf16 %v1443_v48, %v1443_v48  ;;  %v1483_v50 = vpop.f32.mrf.mxu1 }
 0x10a   : > { %1073 = vst.msk [vmem:[%s1655_s18 + $0x50] sm:$0xf] %vm1052_vm2, %v1360_v47  ;;  %v1363_v51 = vpack.c.bf16 %v1483_v50, %v1483_v50  ;;  %v526_v52 = vpop.f32.mrf.mxu0 }
 0x10b   : > { %722 = vst.msk [vmem:[%s1649_s14 + $0x5c] sm:$0xf] %vm698_vm1, %v1331_v49  ;;  %v1329_v53 = vpack.c.bf16 %v526_v52, %v526_v52  ;;  %v880_v54 = vpop.f32.mrf.mxu1 }
 0x10c   : > { %1076 = vst.msk [vmem:[%s1655_s18 + $0x5c] sm:$0xf] %vm1052_vm2, %v1363_v51  ;;  %v1361_v55 = vpack.c.bf16 %v880_v54, %v880_v54  ;;  %v1446_v56 = vpop.f32.mrf.mxu0 }
 0x10d   : > { %720 = vst.msk [vmem:[%s1649_s14 + $0x54] sm:$0xf] %vm698_vm1, %v1329_v53  ;;  %v1334_v57 = vpack.c.bf16 %v1446_v56, %v1446_v56  ;;  %v1486_v58 = vpop.f32.mrf.mxu1 }
 0x10e   : > { %1074 = vst.msk [vmem:[%s1655_s18 + $0x54] sm:$0xf] %vm1052_vm2, %v1361_v55  ;;  %v1366_v59 = vpack.c.bf16 %v1486_v58, %v1486_v58  ;;  %v539_v60 = vpop.f32.mrf.mxu0 }
 0x10f   : > { %725 = vst.msk [vmem:[%s1649_s14 + $0x68] sm:$0xf] %vm698_vm1, %v1334_v57  ;;  %v1332_v61 = vpack.c.bf16 %v539_v60, %v539_v60  ;;  %v893_v62 = vpop.f32.mrf.mxu1 }
 0x110   : > { %1079 = vst.msk [vmem:[%s1655_s18 + $0x68] sm:$0xf] %vm1052_vm2, %v1366_v59  ;;  %v1364_v63 = vpack.c.bf16 %v893_v62, %v893_v62  ;;  %v1447_v0 = vpop.f32.mrf.mxu0 }
 0x111   : > { %723 = vst.msk [vmem:[%s1649_s14 + $0x60] sm:$0xf] %vm698_vm1, %v1332_v61  ;;  %v1335_v1 = vpack.c.bf16 %v1447_v0, %v1447_v0  ;;  %v1487_v2 = vpop.f32.mrf.mxu1 }
 0x112   : > { %1077 = vst.msk [vmem:[%s1655_s18 + $0x60] sm:$0xf] %vm1052_vm2, %v1364_v63  ;;  %v1367_v3 = vpack.c.bf16 %v1487_v2, %v1487_v2  ;;  %v542_v4 = vpop.f32.mrf.mxu0 }
 0x113   : > { %726 = vst.msk [vmem:[%s1649_s14 + $0x6c] sm:$0xf] %vm698_vm1, %v1335_v1  ;;  %v1333_v5 = vpack.c.bf16 %v542_v4, %v542_v4  ;;  %v896_v6 = vpop.f32.mrf.mxu1 }
 0x114   : > { %1080 = vst.msk [vmem:[%s1655_s18 + $0x6c] sm:$0xf] %vm1052_vm2, %v1367_v3  ;;  %v1365_v7 = vpack.c.bf16 %v896_v6, %v896_v6  ;;  %v1450_v8 = vpop.f32.mrf.mxu0 }
 0x115   : > { %724 = vst.msk [vmem:[%s1649_s14 + $0x64] sm:$0xf] %vm698_vm1, %v1333_v5  ;;  %v1338_v9 = vpack.c.bf16 %v1450_v8, %v1450_v8  ;;  %v1490_v10 = vpop.f32.mrf.mxu1 }
 0x116   : > { %1078 = vst.msk [vmem:[%s1655_s18 + $0x64] sm:$0xf] %vm1052_vm2, %v1365_v7  ;;  %v1370_v11 = vpack.c.bf16 %v1490_v10, %v1490_v10  ;;  %v555_v12 = vpop.f32.mrf.mxu0 }
 0x117   : > { %729 = vst.msk [vmem:[%s1649_s14 + $0x78] sm:$0xf] %vm698_vm1, %v1338_v9  ;;  %v1336_v13 = vpack.c.bf16 %v555_v12, %v555_v12  ;;  %v909_v14 = vpop.f32.mrf.mxu1 }
 0x118   : > { %1083 = vst.msk [vmem:[%s1655_s18 + $0x78] sm:$0xf] %vm1052_vm2, %v1370_v11  ;;  %v1368_v15 = vpack.c.bf16 %v909_v14, %v909_v14  ;;  %v1451_v16 = vpop.f32.mrf.mxu0 }
 0x119   : > { %727 = vst.msk [vmem:[%s1649_s14 + $0x70] sm:$0xf] %vm698_vm1, %v1336_v13  ;;  %v1339_v17 = vpack.c.bf16 %v1451_v16, %v1451_v16  ;;  %v1491_v18 = vpop.f32.mrf.mxu1 }
 0x11a   : > { %1081 = vst.msk [vmem:[%s1655_s18 + $0x70] sm:$0xf] %vm1052_vm2, %v1368_v15  ;;  %v1371_v19 = vpack.c.bf16 %v1491_v18, %v1491_v18  ;;  %v558_v20 = vpop.f32.mrf.mxu0 }
 0x11b   : > { %730 = vst.msk [vmem:[%s1649_s14 + $0x7c] sm:$0xf] %vm698_vm1, %v1339_v17  ;;  %v1337_v21 = vpack.c.bf16 %v558_v20, %v558_v20  ;;  %v912_v22 = vpop.f32.mrf.mxu1 }
 0x11c   : > { %1084 = vst.msk [vmem:[%s1655_s18 + $0x7c] sm:$0xf] %vm1052_vm2, %v1371_v19  ;;  %v1369_v23 = vpack.c.bf16 %v912_v22, %v912_v22 }
 0x11d   : > { %728 = vst.msk [vmem:[%s1649_s14 + $0x74] sm:$0xf] %vm698_vm1, %v1337_v21 }
 0x11e   : > { %1082 = vst.msk [vmem:[%s1655_s18 + $0x74] sm:$0xf] %vm1052_vm2, %v1369_v23 }
 0x11f PF: > { %s15_s15 = sadd.s32 1, %s1530_s15  }
 0x120   : > { %p12_p4 = scmp.ge.s32.totalorder %s15_s15, 4  }
 0x122   :  { %14 = sbr.rel (!%p12_p4) target bundleno = 1 (0x1), region = 74 }

// kernel: self_attn_forward.5
= control target key start
LH: loop header
LB: loop body
LE: loop exit
PB: predicated region body
PF: predicated region fallthrough
CT: control target
= control target key end

     0   :  { %10 = vsyncpa [#allocation6], 0  ;;  %s3031_s0 = inlined_call_operand.vmem [shape: bf16[2,256,8], index: 0, kind: input, shape index: {}]   ;;  %s3032_s1 = inlined_call_operand.vmem [shape: bf16[2,64,8], index: 1, kind: input, shape index: {}]   ;;  %s3033_s2 = inlined_call_operand.vmem [shape: bf16[2,64,32], index: 2, kind: input, shape index: {}]   ;;  %s3034_s3 = inlined_call_operand.vmem [shape: f32[2,256,64], index: 3, kind: input, shape index: {}]   ;;  %s3035_s4 = inlined_call_operand.vmem [shape: bf16[32,64], index: 4, kind: input, shape index: {}]   ;;  %s3036_s5 = inlined_call_operand.hbm [shape: f32[2,256,64], index: 5, kind: output, shape index: {}]  }
   0x1   :  { %12 = vsyncpa [#allocation6 + $0x1], 0  ;;  %s2331_s18 = smov 0   ;;  %s2333_s19 = smov 0  }
   0x2   :  { %s2335_s20 = smov 0   ;;  %s2337_s21 = smov 0  }
   0x3   :  { %s2339_s22 = smov 0   ;;  %s2341_s23 = smov 0  }
   0x4   :  { %s2343_s24 = smov 0   ;;  %s2345_s25 = smov 0  }
   0x5 LB: > { %s1829_s26 = sadd.s32 4294967295, %s2293_s25   ;;  %s1830_s27 = sadd.s32 4294967294, %s2293_s25   ;;  %s2293_s25 = sphi %s2345_s25, %s18_s25   ;;  %s2289_s24 = sphi %s2343_s24, %s3062_s24   ;;  %s2285_s23 = sphi %s2341_s23, %s3061_s23   ;;  %s2281_s22 = sphi %s2339_s22, %s3060_s22   ;;  %s2277_s21 = sphi %s2337_s21, %s3059_s21   ;;  %s2273_s20 = sphi %s2335_s20, %s3058_s20   ;;  %s2269_s19 = sphi %s2333_s19, %s3057_s19   ;;  %s2265_s18 = sphi %s2331_s18, %s3056_s18  }
   0x6   : > { %s33_s28 = sadd.s32 1, %s2285_s23  ;;  %s37_s29 = sadd.s32 1, %s2289_s24 }
   0x7   : > { %p35_p0 = scmp.ge.s32.totalorder %s33_s28, 2  ;;  %p189_p1 = scmp.ne.s32.totalorder %s2273_s20, %s2269_s19 }
   0x8   : > { %p190_p2 = scmp.eq.s32.totalorder %s1829_s26, 3  ;;  %p195_p5 = scmp.ne.s32.totalorder %s2269_s19, %s2265_s18 }
   0x9   : > { %s3064_s28 = smov (%p35_p0, %s33_s28), 0  ;;  %s3066_s29 = smov (!%p35_p0, %s37_s29), %s2289_s24 }
   0xa   : > { %s175_s30 = ssub.s32 %s2285_s23, %s3064_s28  ;;  %p2382_p3 = por %p190_p2, %p189_p1 }
   0xb   : > { %p39_p4 = scmp.ge.s32.totalorder %s3066_s29, 2  ;;  %p196_p6 = scmp.eq.s32.totalorder %s1830_s27, 3 }
   0xc   : > { %p1833_p7 = scmp.ge.s32.totalorder %s2293_s25, 1  ;;  %p269_p9 = scmp.lt.s32.totalorder %s2293_s25, 5 }
   0xd   : > { %s3068_s29 = smov (%p39_p4, %s3066_s29), 0  ;;  %p2391_p8 = por %p196_p6, %p195_p5 }
   0xe   : > { %s174_s8 = ssub.s32 %s2289_s24, %s3068_s29  ;;  %s179_s9 = sadd.s32 1, %s2273_s20 }
   0xf   : > { %s176_s10 = sor.u32 %s175_s30, %s174_s8  ;;  %p270_p10 = pnand %p1833_p7, %p269_p9 }
  0x10   : > { %p177_p11 = scmp.eq.s32.totalorder %s176_s10, 0  ;;  %s2403_s12 = sshll.u32 (!%p270_p10), %s2277_s21, 4 }
  0x11   : > { %273 = sbr.rel (%p270_p10) target bundleno = 1092 (0x444), region = 40  ;;  %p329_p12 = scmp.lt.s32.totalorder (!%p270_p10), %s2281_s22, 1 }
  0x12   : > { %s2400_s11 = scalar_select %p177_p11, %s2273_s20, %s179_s9  }
  0x13   : > { %p331_p13 = scmp.lt.s32.totalorder (!%p270_p10), %s2403_s12, 31  ;;  %s325_s21 = sand.u32 (!%p270_p10), 1, %s2269_s19  }
  0x16   : > { %s330_s13 = scalar_select %p329_p12, %s2281_s22, 1  ;;  %vm508_vm0 = vcmask 64512   ;;  %vm374_vm1 = vcmask 7168   ;;  %v2295_v16 = vmov -inf   ;;  %vm658_vm2 = vcmask 523264  }
  0x17   : > { %s332_s14 = scalar_select %p331_p13, %s2403_s12, 31  ;;  %377 = vst.msk [vmem:[#allocation2 + $0x10] sm:$0xff] %vm374_vm1, %v2295_v16  ;;  %375 = vst.msk [vmem:[#allocation2] sm:$0xff] %vm374_vm1, %v2295_v16  ;;  %v2296_v30 = vmov 0   ;;  %v3037_v43 = vmov 0.0   ;;  %vm407_vm3 = vcmask 261120  }
  0x18   : > { %s1836_s15 = sshll.u32 %s330_s13, 5  ;;  %376 = vst.msk [vmem:[#allocation2 + $0x8] sm:$0xff] %vm374_vm1, %v2295_v16  ;;  %378 = vst.msk [vmem:[#allocation2 + $0x18] sm:$0xff] %vm374_vm1, %v2295_v16  ;;  %2086 = vset.pattern.permute.xlu1 %v2296_v30  ;;  %2085 = vset.pattern.permute.xlu0 %v2296_v30  ;;  %s1834_s13 = sshll.u32 %s325_s21, 7 }
  0x19   : > { %s2409_s16 = sadd.s32 %s1836_s15, %s332_s14  ;;  %s346_s27 = scalar_lea.vmem %s3032_s1, %s1836_s15  ;;  %379 = vst.msk [vmem:[#allocation2 + $0x20] sm:$0xff] %vm374_vm1, %v2295_v16  ;;  %380 = vst.msk [vmem:[#allocation2 + $0x28] sm:$0xff] %vm374_vm1, %v2295_v16 }
  0x1a   : > { %s1837_s30 = sshll.u32 %s2409_s16, 2  ;;  %v2087_v0 = vld [vmem:[%s346_s27 + $0x18] sm:$0xff]   ;;  %v2088_v1 = vld [vmem:[%s346_s27 + $0x10] sm:$0xff]   ;;  %v2089_v5 = vld [vmem:[%s346_s27 + $0x8] sm:$0xff]   ;;  %s2426_s14 = scalar_lea.vmem %s3033_s2, %s1836_s15  ;;  %381 = vst.msk [vmem:[#allocation2 + $0x30] sm:$0xff] %vm374_vm1, %v2295_v16 }
  0x1b   : > { %s336_s9 = scalar_lea.vmem %s3031_s0, %s1837_s30  ;;  %2005 = vmatprep.subr.msk.bf16.mxu0 %vm508_vm0, %v2087_v0  ;;  %v543_v2 = vsel %vm508_vm0, %v2087_v0, 0  ;;  %v540_v4 = vsel %vm508_vm0, %v2088_v1, 0  ;;  %v537_v6 = vsel %vm508_vm0, %v2089_v5, 0  ;;  %v2090_v7 = vld [vmem:[%s346_s27] sm:$0xff]   ;;  %382 = vst.msk [vmem:[#allocation2 + $0x38] sm:$0xff] %vm374_vm1, %v2295_v16  ;;  %383 = vst.msk [vmem:[#allocation2 + $0x40] sm:$0xff] %vm374_vm1, %v2295_v16 }
  0x1c   : > { %1930 = vmatpush3.bf16.xpose.msra.mxu0 %v543_v2  ;;  %v2091_v3 = vld [vmem:[%s336_s9] sm:$0xff]   ;;  %v534_v8 = vsel %vm508_vm0, %v2090_v7, 0  ;;  %v2092_v9 = vld [vmem:[%s336_s9 + $0x8] sm:$0xff]   ;;  %v2093_v10 = vld [vmem:[%s336_s9 + $0x10] sm:$0xff]   ;;  %384 = vst.msk [vmem:[#allocation2 + $0x48] sm:$0xff] %vm374_vm1, %v2295_v16  ;;  %s1844_s30 = sshll.u32 %s2409_s16, 3 }
  0x1d   : > { %2006 = vmatprep.subr.msk.bf16.mxu0 %vm508_vm0, %v2088_v1  ;;  %1937 = vmatprep.mubr.msk.bf16.mxu0 %vm508_vm0, %v2091_v3  ;;  %v2094_v11 = vld [vmem:[%s336_s9 + $0x18] sm:$0xff]   ;;  %v2095_v12 = vld [vmem:[%s336_s9 + $0x20] sm:$0xff]   ;;  %v2096_v13 = vld [vmem:[%s336_s9 + $0x28] sm:$0xff]   ;;  %385 = vst.msk [vmem:[#allocation2 + $0x50] sm:$0xff] %vm374_vm1, %v2295_v16  ;;  %s2914_s10 = scalar_lea.vmem %s3034_s3, %s1844_s30  ;;  %s2921_s16 = scalar_lea.vmem [#allocation5], %s1834_s13 }
  0x1e   : > { %v2097_v14 = vld [vmem:[%s336_s9 + $0x30] sm:$0xff]   ;;  %v2098_v15 = vld [vmem:[%s336_s9 + $0x38] sm:$0xff]   ;;  %386 = vst.msk [vmem:[#allocation2 + $0x58] sm:$0xff] %vm374_vm1, %v2295_v16  ;;  %387 = vst.msk [vmem:[#allocation2 + $0x60] sm:$0xff] %vm374_vm1, %v2295_v16  ;;  %s2980_s30 = scalar_lea.sflag [#allocation6], %s325_s21  ;;  %s2298_s9 = smov [#allocation5]  }
  0x1f   : > { %388 = vst.msk [vmem:[#allocation2 + $0x68] sm:$0xff] %vm374_vm1, %v2295_v16  ;;  %389 = vst.msk [vmem:[#allocation2 + $0x70] sm:$0xff] %vm374_vm1, %v2295_v16  ;;  %v2551_v51 = vld [vmem:[#allocation2 + $0x10] sm:$0xff]  ;;  %v2553_v53 = vld [vmem:[#allocation2] sm:$0xff] }
  0x20   : > { %390 = vst.msk [vmem:[#allocation2 + $0x78] sm:$0xff] %vm374_vm1, %v2295_v16  ;;  %391 = vst.msk [vmem:[#allocation3] sm:$0xff] %vm374_vm1, %v3037_v43  ;;  %v2558_v56 = vld [vmem:[#allocation2 + $0x18] sm:$0xff]  ;;  %v2568_v60 = vld [vmem:[#allocation2 + $0x8] sm:$0xff] }
  0x21   : > { %392 = vst.msk [vmem:[#allocation3 + $0x8] sm:$0xff] %vm374_vm1, %v3037_v43  ;;  %393 = vst.msk [vmem:[#allocation3 + $0x10] sm:$0xff] %vm374_vm1, %v3037_v43  ;;  %v2586_v2 = vld [vmem:[#allocation2 + $0x20] sm:$0xff]  ;;  %v2101_v30 = vld [vmem:[%s2426_s14 + $0x8] sm:$0xff]  }
  0x22   : > { %394 = vst.msk [vmem:[#allocation3 + $0x18] sm:$0xff] %vm374_vm1, %v3037_v43  ;;  %395 = vst.msk [vmem:[#allocation3 + $0x20] sm:$0xff] %vm374_vm1, %v3037_v43 }
  0x23   : > { %396 = vst.msk [vmem:[#allocation3 + $0x28] sm:$0xff] %vm374_vm1, %v3037_v43  ;;  %397 = vst.msk [vmem:[#allocation3 + $0x30] sm:$0xff] %vm374_vm1, %v3037_v43 }
  0x24   : > { %1932 = vmatpush3.bf16.xpose.msra.mxu0 %v540_v4  ;;  %398 = vst.msk [vmem:[#allocation3 + $0x38] sm:$0xff] %vm374_vm1, %v3037_v43  ;;  %399 = vst.msk [vmem:[#allocation3 + $0x40] sm:$0xff] %vm374_vm1, %v3037_v43 }
  0x25   : > { %2007 = vmatprep.subr.msk.bf16.mxu0 %vm508_vm0, %v2089_v5  ;;  %400 = vst.msk [vmem:[#allocation3 + $0x48] sm:$0xff] %vm374_vm1, %v3037_v43  ;;  %401 = vst.msk [vmem:[#allocation3 + $0x50] sm:$0xff] %vm374_vm1, %v3037_v43  ;;  %v2592_v5 = vld [vmem:[#allocation2 + $0x38] sm:$0xff] }
  0x26   : > { %402 = vst.msk [vmem:[#allocation3 + $0x58] sm:$0xff] %vm374_vm1, %v3037_v43  ;;  %403 = vst.msk [vmem:[#allocation3 + $0x60] sm:$0xff] %vm374_vm1, %v3037_v43 }
  0x27   : > { %404 = vst.msk [vmem:[#allocation3 + $0x68] sm:$0xff] %vm374_vm1, %v3037_v43  ;;  %405 = vst.msk [vmem:[#allocation3 + $0x70] sm:$0xff] %vm374_vm1, %v3037_v43 }
  0x28   : > { %406 = vst.msk [vmem:[#allocation3 + $0x78] sm:$0xff] %vm374_vm1, %v3037_v43 }
  0x2c   : > { %1934 = vmatpush3.bf16.xpose.msra.mxu0 %v537_v6  ;;  %v2099_v6 = vld [vmem:[%s2426_s14 + $0x18] sm:$0xff]  }
  0x2d   : > { %2008 = vmatprep.subr.msk.bf16.mxu0 %vm508_vm0, %v2090_v7  ;;  %1997 = vmatprep.subr.bf16.mxu1 %v2099_v6 }
  0x2e   : > { %2001 = vmatpush3.bf16.msra.mxu1 %v2099_v6 }
  0x34   : > { %1936 = vmatpush3.bf16.xpose.msra.mxu0 %v534_v8 }
  0x35   : > { %1953 = vmatprep.subr.bf16.mxu0 %v2099_v6 }
  0x3b   : > { %1938 = vmatmul.mubr.msk.bf16.vlgmr.msra.gmra.mxu0 %vm508_vm0, %v2092_v9  ;;  %v2599_v9 = vld [vmem:[#allocation2 + $0x30] sm:$0xff] }
  0x3c   : > { %1941 = vmatprep.mubr.msk.bf16.mxu0 %vm508_vm0, %v2093_v10  ;;  %1954 = vmatpush3.bf16.msra.mxu0 %v2099_v6 }
  0x43   : > { %1942 = vmatmul.mubr.msk.bf16.gmra.mxu0 %vm508_vm0, %v2094_v11 }
  0x44   : > { %1945 = vmatprep.mubr.msk.bf16.mxu0 %vm508_vm0, %v2095_v12 }
  0x4b   : > { %1946 = vmatmul.mubr.msk.bf16.gmra.mxu0 %vm508_vm0, %v2096_v13  ;;  %v2608_v13 = vld [vmem:[#allocation2 + $0x28] sm:$0xff] }
  0x4c   : > { %1949 = vmatprep.mubr.msk.bf16.mxu0 %vm508_vm0, %v2097_v14  ;;  %v2100_v14 = vld [vmem:[%s2426_s14 + $0x10] sm:$0xff]  }
  0x4d   : > { %1955 = vmatprep.subr.bf16.mxu0 %v2100_v14  ;;  %1998 = vmatprep.subr.bf16.mxu1 %v2100_v14 }
  0x4e   : > { %1956 = vmatpush3.bf16.msra.mxu0 %v2100_v14  ;;  %2002 = vmatpush3.bf16.msra.mxu1 %v2100_v14 }
  0x4f   : > { %1957 = vmatprep.subr.bf16.mxu0 %v2101_v30  ;;  %1999 = vmatprep.subr.bf16.mxu1 %v2101_v30 }
  0x52   : > { %1958 = vmatpush3.bf16.msra.mxu0 %v2101_v30  ;;  %2003 = vmatpush3.bf16.msra.mxu1 %v2101_v30 }
  0x53   : > { %1950 = vmatmul.mubr.msk.bf16.gmra.mxu0 %vm508_vm0, %v2098_v15 }
  0xfb   : > { %v2455_v17 = vpop.f32.mrf.mxu0 }
  0xfc   : > { %v665_v18 = vsel %vm658_vm2, %v2455_v17, -inf }
  0xfd   : > { %666 = vmax.xlane.f32.xlu1 %v665_v18  ;;  %v2459_v19 = vpop.f32.mrf.mxu0 }
  0xfe   : > { %v659_v20 = vsel %vm658_vm2, %v2459_v19, -inf }
  0xff   : > { %660 = vmax.xlane.f32.xlu0 %v659_v20  ;;  %v2463_v21 = vpop.f32.mrf.mxu0  ;;  %v2618_v20 = vld [vmem:[#allocation2 + $0x40] sm:$0xff] }
 0x100   : > { %v668_v22 = vsel %vm658_vm2, %v2463_v21, -inf }
 0x101   : > { %669 = vmax.xlane.f32.xlu1 %v668_v22  ;;  %v2467_v23 = vpop.f32.mrf.mxu0 }
 0x102   : > { %v662_v24 = vsel %vm658_vm2, %v2467_v23, -inf }
 0x103   : > { %663 = vmax.xlane.f32.xlu0 %v662_v24  ;;  %v2471_v25 = vpop.f32.mrf.mxu0 }
 0x104   : > { %v677_v32 = vsel %vm658_vm2, %v2471_v25, -inf }
 0x105   : > { %v2473_v26 = vpop.f32.mrf.mxu0 }
 0x106   : > { %v671_v27 = vsel %vm658_vm2, %v2473_v26, -inf }
 0x107   : > { %672 = vmax.xlane.f32.xlu0 %v671_v27  ;;  %v2477_v28 = vpop.f32.mrf.mxu0 }
 0x108   : > { %v680_v29 = vsel %vm658_vm2, %v2477_v28, -inf }
 0x109   : > { %681 = vmax.xlane.f32.xlu1 %v680_v29  ;;  %v2481_v31 = vpop.f32.mrf.mxu0  ;;  %v2628_v29 = vld [vmem:[#allocation2 + $0x58] sm:$0xff] }
 0x10a   : > { %v674_v34 = vsel %vm658_vm2, %v2481_v31, -inf }
 0x10b   : > { %678 = vmax.xlane.f32.xlu0 %v677_v32  ;;  %v2485_v33 = vpop.f32.mrf.mxu0 }
 0x10c   : > { %v689_v39 = vsel %vm658_vm2, %v2485_v33, -inf }
 0x10d   : > { %675 = vmax.xlane.f32.xlu1 %v674_v34  ;;  %v2489_v35 = vpop.f32.mrf.mxu0 }
 0x10e   : > { %v683_v36 = vsel %vm658_vm2, %v2489_v35, -inf }
 0x10f   : > { %684 = vmax.xlane.f32.xlu0 %v683_v36  ;;  %v2493_v37 = vpop.f32.mrf.mxu0 }
 0x110   : > { %v692_v38 = vsel %vm658_vm2, %v2493_v37, -inf }
 0x111   : > { %693 = vmax.xlane.f32.xlu1 %v692_v38  ;;  %v2499_v40 = vpop.f32.mrf.mxu0  ;;  %v2638_v38 = vld [vmem:[#allocation2 + $0x50] sm:$0xff] }
 0x112   : > { %v686_v42 = vsel %vm658_vm2, %v2499_v40, -inf }
 0x113   : > { %690 = vmax.xlane.f32.xlu0 %v689_v39  ;;  %v2501_v41 = vpop.f32.mrf.mxu0 }
 0x114   : > { %v701_v48 = vsel %vm658_vm2, %v2501_v41, -inf }
 0x115   : > { %687 = vmax.xlane.f32.xlu1 %v686_v42  ;;  %v2537_v44 = vpop.f32.mrf.mxu0 }
 0x116   : > { %v695_v45 = vsel %vm658_vm2, %v2537_v44, -inf }
 0x117   : > { %696 = vmax.xlane.f32.xlu0 %v695_v45  ;;  %v2541_v46 = vpop.f32.mrf.mxu0 }
 0x118   : > { %v704_v47 = vsel %vm658_vm2, %v2541_v46, -inf }
 0x119   : > { %705 = vmax.xlane.f32.xlu1 %v704_v47  ;;  %v2547_v49 = vpop.f32.mrf.mxu0  ;;  %v2648_v47 = vld [vmem:[#allocation2 + $0x48] sm:$0xff] }
 0x11a   : > { %v698_v50 = vsel %vm658_vm2, %v2547_v49, -inf }
 0x11b   : > { %702 = vmax.xlane.f32.xlu0 %v701_v48  ;;  %v2102_v48 = vld [vmem:[%s2426_s14] sm:$0xff]   ;;  %s1889_s14 = sshll.u32 %s2281_s22, 5 }
 0x11c   : > { %1959 = vmatprep.subr.bf16.mxu0 %v2102_v48  ;;  %2000 = vmatprep.subr.bf16.mxu1 %v2102_v48  ;;  %s1687_s15 = sadd.s32 %s1889_s14, %s2403_s12  ;;  %s1690_s12 = sshll.u32 %s2921_s16, 4  ;;  %s2974_s12 = int_to_ptr.vmem [resolvable:$true] %s1690_s12 }
 0x11d   : > { %699 = vmax.xlane.f32.xlu1 %v698_v50  ;;  %1960 = vmatpush3.bf16.msra.mxu0 %v2102_v48  ;;  %s1890_s22 = sshll.u32 %s1687_s15, 7  ;;  %s2201_s8 = scalar_lea.vmem %s2974_s12, 2048 }
 0x11e   : > { %2004 = vmatpush3.bf16.msra.mxu1 %v2102_v48  ;;  %v2688_v48 = vld [vmem:[#allocation2 + $0x68] sm:$0xff]  ;;  %s2968_s27 = scalar_lea.hbm %s3036_s5, %s1890_s22  ;;  %p2202_p0 = scmp.ne.s32.totalorder %s2974_s12, %s2201_s8 }
 0x120   : > { %p2203_p1 = pnand %p2202_p0, %p2382_p3 }
 0x122   : > { %p2204_p2 = pneg %p2203_p1 }
 0x186   : > { %v667_v52 = vpop.xlane.xlu1 %666 }
 0x187   : > { %v2556_v54 = vmax.f32 %v2551_v51, %v667_v52 }
 0x188   : > { %v661_v55 = vpop.xlane.xlu0 %660 }
 0x189   : > { %1320 = vst.msk [vmem:[#allocation2 + $0x10] sm:$0xff] %vm374_vm1, %v2556_v54  ;;  %v2565_v58 = vmax.f32 %v2553_v53, %v661_v55  ;;  %783 = vperm.xlu1 %2086, %v2556_v54  }
 0x18a   : > { %v670_v59 = vpop.xlane.xlu1 %669 }
 0x18b   : > { %v723_v61 = vsub.f32 %v2553_v53, %v2565_v58  ;;  %1318 = vst.msk [vmem:[#allocation2] sm:$0xff] %vm374_vm1, %v2565_v58  ;;  %v2575_v62 = vmax.f32 %v2558_v56, %v670_v59  ;;  %773 = vperm.xlu0 %2085, %v2565_v58   ;;  %v2658_v59 = vld [vmem:[#allocation2 + $0x60] sm:$0xff] }
 0x18c   : > { %v664_v63 = vpop.xlane.xlu0 %663 }
 0x18d   : > { %1321 = vst.msk [vmem:[#allocation2 + $0x18] sm:$0xff] %vm374_vm1, %v2575_v62  ;;  %v2583_v1 = vmax.f32 %v2568_v60, %v664_v63  ;;  %788 = vperm.xlu1 %2086, %v2575_v62  }
 0x18f   : > { %v724_v3 = vsub.f32 %v2568_v60, %v2583_v1  ;;  %1319 = vst.msk [vmem:[#allocation2 + $0x8] sm:$0xff] %vm374_vm1, %v2583_v1 }
 0x190   : > { %v673_v4 = vpop.xlane.xlu0 %672 }
 0x191   : > { %v2596_v7 = vmax.f32 %v2586_v2, %v673_v4  ;;  %778 = vperm.xlu1 %2086, %v2583_v1  }
 0x192   : > { %v682_v8 = vpop.xlane.xlu1 %681 }
 0x193   : > { %1322 = vst.msk [vmem:[#allocation2 + $0x20] sm:$0xff] %vm374_vm1, %v2596_v7  ;;  %v2606_v11 = vmax.f32 %v2592_v5, %v682_v8  ;;  %v2668_v8 = vld [vmem:[#allocation2 + $0x78] sm:$0xff]  ;;  %v3043_v60 = vsub.f32 %v2586_v2, %v2596_v7 }
 0x194   : > { %v679_v12 = vpop.xlane.xlu0 %678 }
 0x195   : > { %1325 = vst.msk [vmem:[#allocation2 + $0x38] sm:$0xff] %vm374_vm1, %v2606_v11  ;;  %v2616_v16 = vmax.f32 %v2599_v9, %v679_v12  ;;  %v747_v1 = vmul.f32 1.442695, %v3043_v60  ;;  %v3047_v58 = vsub.f32 %v2592_v5, %v2606_v11 }
 0x196   : > { %v676_v18 = vpop.xlane.xlu1 %675 }
 0x197   : > { %1324 = vst.msk [vmem:[#allocation2 + $0x30] sm:$0xff] %vm374_vm1, %v2616_v16  ;;  %v2625_v24 = vmax.f32 %v2608_v13, %v676_v18  ;;  %803 = vperm.xlu1 %2086, %v2616_v16  }
 0x198   : > { %v685_v27 = vpop.xlane.xlu0 %684 }
 0x199   : > { %1323 = vst.msk [vmem:[#allocation2 + $0x28] sm:$0xff] %vm374_vm1, %v2625_v24  ;;  %v2636_v34 = vmax.f32 %v2618_v20, %v685_v27  ;;  %v2678_v27 = vld [vmem:[#allocation2 + $0x70] sm:$0xff] }
 0x19a   : > { %v694_v36 = vpop.xlane.xlu1 %693 }
 0x19b   : > { %1326 = vst.msk [vmem:[#allocation2 + $0x40] sm:$0xff] %vm374_vm1, %v2636_v34  ;;  %v2645_v42 = vmax.f32 %v2628_v29, %v694_v36  ;;  %793 = vperm.xlu1 %2086, %v2596_v7  }
 0x19c   : > { %v691_v45 = vpop.xlane.xlu0 %690 }
 0x19d   : > { %1329 = vst.msk [vmem:[#allocation2 + $0x58] sm:$0xff] %vm374_vm1, %v2645_v42  ;;  %v2656_v52 = vmax.f32 %v2638_v38, %v691_v45 }
 0x19e   : > { %v688_v55 = vpop.xlane.xlu1 %687 }
 0x19f   : > { %1328 = vst.msk [vmem:[#allocation2 + $0x50] sm:$0xff] %vm374_vm1, %v2656_v52  ;;  %v2665_v4 = vmax.f32 %v2648_v47, %v688_v55  ;;  %798 = vperm.xlu1 %2086, %v2625_v24   ;;  %v3050_v5 = vsub.f32 %v2638_v38, %v2656_v52 }
 0x1a0   : > { %v697_v6 = vpop.xlane.xlu0 %696 }
 0x1a1   : > { %1327 = vst.msk [vmem:[#allocation2 + $0x48] sm:$0xff] %vm374_vm1, %v2665_v4  ;;  %v2675_v14 = vmax.f32 %v2658_v59, %v697_v6  ;;  %818 = vperm.xlu0 %2085, %v2665_v4  }
 0x1a2   : > { %v706_v18 = vpop.xlane.xlu1 %705 }
 0x1a3   : > { %1330 = vst.msk [vmem:[#allocation2 + $0x60] sm:$0xff] %vm374_vm1, %v2675_v14  ;;  %v2685_v36 = vmax.f32 %v2668_v8, %v706_v18  ;;  %808 = vperm.xlu1 %2086, %v2606_v11  }
 0x1a4   : > { %v703_v45 = vpop.xlane.xlu0 %702 }
 0x1a5   : > { %1333 = vst.msk [vmem:[#allocation2 + $0x78] sm:$0xff] %vm374_vm1, %v2685_v36  ;;  %v2695_v6 = vmax.f32 %v2678_v27, %v703_v45  ;;  %828 = vperm.xlu0 %2085, %v2645_v42  }
 0x1a6   : > { %v700_v30 = vpop.xlane.xlu1 %699 }
 0x1a7   : > { %1332 = vst.msk [vmem:[#allocation2 + $0x70] sm:$0xff] %vm374_vm1, %v2695_v6  ;;  %v2703_v50 = vmax.f32 %v2688_v48, %v700_v30  ;;  %813 = vperm.xlu1 %2086, %v2636_v34  }
 0x1a9   : > { %1331 = vst.msk [vmem:[#allocation2 + $0x68] sm:$0xff] %vm374_vm1, %v2703_v50  ;;  %838 = vperm.xlu0 %2085, %v2703_v50   ;;  %v3053_v38 = vsub.f32 %v2688_v48, %v2703_v50 }
 0x1ab   : > { %823 = vperm.xlu1 %2086, %v2656_v52   ;;  %v765_v52 = vmul.f32 1.442695, %v3053_v38 }
 0x1ad   : > { %848 = vperm.xlu0 %2085, %v2685_v36  }
 0x1af   : > { %833 = vperm.xlu1 %2086, %v2675_v14  }
 0x1b3   : > { %843 = vperm.xlu1 %2086, %v2695_v6  }
 0x204   : > { %v784_v30 = vpop.permute.xlu1 %783 }
 0x205   : > { %v853_v39 = vsub.f32 %v2455_v17, %v784_v30 }
 0x206   : > { %v774_v45 = vpop.permute.xlu0 %773 }
 0x207   : > { %v851_v18 = vsub.f32 %v2459_v19, %v774_v45  ;;  %v871_v43 = vmul.f32 1.442695, %v853_v39 }
 0x208   : > { %v789_v63 = vpop.permute.xlu1 %788 }
 0x209   : > { %v867_v12 = vmul.f32 1.442695, %v851_v18  ;;  %v854_v55 = vsub.f32 %v2463_v21, %v789_v63 }
 0x20b   : > { %2105 = vpow2.f32 %v867_v12  ;;  %v873_v15 = vmul.f32 1.442695, %v854_v55 }
 0x20c   : > { %v779_v22 = vpop.permute.xlu1 %778 }
 0x20d   : > { %2107 = vpow2.f32 %v873_v15  ;;  %v852_v32 = vsub.f32 %v2467_v23, %v779_v22 }
 0x20f   : > { %v869_v10 = vmul.f32 1.442695, %v852_v32 }
 0x211   : > { %2109 = vpow2.f32 %v869_v10 }
 0x212   : > { %v804_v0 = vpop.permute.xlu1 %803  ;;  %2111 = vpow2.f32 %v871_v43 }
 0x213   : > { %v857_v57 = vsub.f32 %v2471_v25, %v804_v0 }
 0x215   : > { %v879_v21 = vmul.f32 1.442695, %v857_v57 }
 0x216   : > { %v794_v19 = vpop.permute.xlu1 %793 }
 0x217   : > { %v855_v18 = vsub.f32 %v2473_v26, %v794_v19 }
 0x218   : > { %v2106_v45 = vpop.eup %2105 }
 0x219   : > { %v875_v63 = vmul.f32 1.442695, %v855_v18  ;;  %v931_v17 = vsel %vm658_vm2, %v2106_v45, 0.0 }
 0x21a   : > { %v2108_v12 = vpop.eup %2107  ;;  %932 = vadd.xlane.f32.xlu1 %v931_v17  ;;  %v799_v15 = vpop.permute.xlu1 %798 }
 0x21b   : > { %2113 = vpow2.f32 %v875_v63  ;;  %v856_v23 = vsub.f32 %v2481_v31, %v799_v15  ;;  %v940_v43 = vsel %vm658_vm2, %v2108_v12, 0.0 }
 0x21c   : > { %v819_v22 = vpop.permute.xlu0 %818  ;;  %2115 = vpow2.f32 %v879_v21 }
 0x21d   : > { %v877_v10 = vmul.f32 1.442695, %v856_v23  ;;  %v860_v0 = vsub.f32 %v2499_v40, %v819_v22 }
 0x21e   : > { %v2110_v25 = vpop.eup %2109  ;;  %941 = vadd.xlane.f32.xlu1 %v940_v43  ;;  %v809_v26 = vpop.permute.xlu1 %808 }
 0x21f   : > { %2117 = vpow2.f32 %v877_v10  ;;  %v858_v57 = vsub.f32 %v2477_v28, %v809_v26  ;;  %v934_v32 = vsel %vm658_vm2, %v2110_v25, 0.0  ;;  %v2112_v39 = vpop.eup %2111  ;;  %v1124_v30 = vpack.c.bf16 %v2110_v25, %v2106_v45 }
 0x220   : > { %v829_v55 = vpop.permute.xlu0 %828  ;;  %935 = vadd.xlane.f32.xlu0 %v934_v32  ;;  %v1125_v31 = vpack.c.bf16 %v2108_v12, %v2112_v39  ;;  %v885_v21 = vmul.f32 1.442695, %v860_v0  ;;  %v937_v28 = vsel %vm658_vm2, %v2112_v39, 0.0 }
 0x221   : > { %v881_v19 = vmul.f32 1.442695, %v858_v57  ;;  %v862_v18 = vsub.f32 %v2493_v37, %v829_v55  ;;  %1961 = vmatprep.mubr.msk.bf16.mxu0 %vm658_vm2, %v1124_v30 }
 0x222   : > { %v814_v63 = vpop.permute.xlu1 %813  ;;  %1962 = vmatmul.mubr.msk.bf16.vlgmr.msra.gmra.mxu0 %vm658_vm2, %v1125_v31 }
 0x223   : > { %2119 = vpow2.f32 %v881_v19  ;;  %v859_v40 = vsub.f32 %v2489_v35, %v814_v63  ;;  %v889_v15 = vmul.f32 1.442695, %v862_v18 }
 0x224   : > { %v839_v17 = vpop.permute.xlu0 %838  ;;  %938 = vadd.xlane.f32.xlu0 %v937_v28  ;;  %2121 = vpow2.f32 %v885_v21 }
 0x225   : > { %v883_v23 = vmul.f32 1.442695, %v859_v40  ;;  %v864_v45 = vsub.f32 %v2547_v49, %v839_v17 }
 0x226   : > { %v824_v12 = vpop.permute.xlu1 %823 }
 0x227   : > { %2123 = vpow2.f32 %v883_v23  ;;  %v861_v37 = vsub.f32 %v2485_v33, %v824_v12  ;;  %v893_v26 = vmul.f32 1.442695, %v864_v45 }
 0x228   : > { %v2114_v22 = vpop.eup %2113  ;;  %v849_v10 = vpop.permute.xlu0 %848  ;;  %2125 = vpow2.f32 %v889_v15 }
 0x229   : > { %v887_v43 = vmul.f32 1.442695, %v861_v37  ;;  %v866_v25 = vsub.f32 %v2541_v46, %v849_v10  ;;  %v943_v35 = vsel %vm658_vm2, %v2114_v22, 0.0  ;;  %v2116_v0 = vpop.eup %2115 }
 0x22a   : > { %944 = vadd.xlane.f32.xlu0 %v943_v35  ;;  %v834_v57 = vpop.permute.xlu1 %833  ;;  %v949_v33 = vsel %vm658_vm2, %v2116_v0, 0.0 }
 0x22b   : > { %2127 = vpow2.f32 %v887_v43  ;;  %v863_v32 = vsub.f32 %v2537_v44, %v834_v57  ;;  %v897_v39 = vmul.f32 1.442695, %v866_v25 }
 0x22c   : > { %v2118_v49 = vpop.eup %2117  ;;  %2129 = vpow2.f32 %v893_v26 }
 0x22d   : > { %v891_v55 = vmul.f32 1.442695, %v863_v32  ;;  %v1126_v30 = vpack.c.bf16 %v2118_v49, %v2114_v22  ;;  %v946_v28 = vsel %vm658_vm2, %v2118_v49, 0.0 }
 0x22e   : > { %950 = vadd.xlane.f32.xlu0 %v949_v33  ;;  %v844_v31 = vpop.permute.xlu1 %843  ;;  %v739_v33 = vmul.f32 1.442695, %v723_v61  ;;  %v753_v61 = vmul.f32 1.442695, %v3047_v58 }
 0x22f   : > { %2131 = vpow2.f32 %v891_v55  ;;  %v865_v46 = vsub.f32 %v2501_v41, %v844_v31  ;;  %1965 = vmatprep.mubr.msk.bf16.mxu1 %vm658_vm2, %v1126_v30  ;;  %v3041_v30 = vsub.f32 %v2551_v51, %v2556_v54  ;;  %v3045_v51 = vsub.f32 %v2608_v13, %v2625_v24 }
 0x230   : > { %v2120_v19 = vpop.eup %2119  ;;  %2133 = vpow2.f32 %v897_v39  ;;  %v741_v39 = vmul.f32 1.442695, %v724_v3  ;;  %v3044_v3 = vmov 0.0   ;;  %v3046_v54 = vsub.f32 %v2599_v9, %v2616_v16 }
 0x231   : > { %v895_v18 = vmul.f32 1.442695, %v865_v46  ;;  %v952_v21 = vsel %vm658_vm2, %v2120_v19, 0.0  ;;  %v1127_v44 = vpack.c.bf16 %v2120_v19, %v2116_v0  ;;  %v2122_v63 = vpop.eup %2121  ;;  %v743_v31 = vmul.f32 1.442695, %v3041_v30  ;;  %408 = vst.msk [vmem:[#allocation4] sm:$0xff] %vm407_vm3, %v3044_v3 }
 0x232   : > { %953 = vadd.xlane.f32.xlu1 %v952_v21  ;;  %v958_v43 = vsel %vm658_vm2, %v2122_v63, 0.0  ;;  %v3042_v46 = vsub.f32 %v2558_v56, %v2575_v62  ;;  %409 = vst.msk [vmem:[#allocation4 + $0x8] sm:$0xff] %vm407_vm3, %v3044_v3  ;;  %410 = vst.msk [vmem:[#allocation4 + $0x10] sm:$0xff] %vm407_vm3, %v3044_v3  ;;  %v749_v53 = vmul.f32 1.442695, %v3045_v51  ;;  %v3048_v62 = vsub.f32 %v2618_v20, %v2636_v34  ;;  %v905_v30 = vld [vmem:[#allocation3 + $0x30] sm:$0xff] }
 0x233   : > { %2135 = vpow2.f32 %v895_v18  ;;  %1966 = vmatmul.mubr.msk.bf16.vlgmr.msra.gmra.mxu1 %vm658_vm2, %v1127_v44  ;;  %411 = vst.msk [vmem:[#allocation4 + $0x18] sm:$0xff] %vm407_vm3, %v3044_v3  ;;  %412 = vst.msk [vmem:[#allocation4 + $0x20] sm:$0xff] %vm407_vm3, %v3044_v3  ;;  %v751_v56 = vmul.f32 1.442695, %v3046_v54  ;;  %v3049_v13 = vsub.f32 %v2648_v47, %v2665_v4  ;;  %v759_v9 = vmul.f32 1.442695, %v3050_v5 }
 0x234   : > { %v2124_v40 = vpop.eup %2123  ;;  %2137 = vpow2.f32 %v741_v39  ;;  %v745_v19 = vmul.f32 1.442695, %v3042_v46  ;;  %413 = vst.msk [vmem:[#allocation4 + $0x28] sm:$0xff] %vm407_vm3, %v3044_v3  ;;  %414 = vst.msk [vmem:[#allocation4 + $0x30] sm:$0xff] %vm407_vm3, %v3044_v3  ;;  %v755_v2 = vmul.f32 1.442695, %v3048_v62  ;;  %v3051_v16 = vsub.f32 %v2628_v29, %v2645_v42 }
 0x235   : > { %v955_v17 = vsel %vm658_vm2, %v2124_v40, 0.0  ;;  %v1128_v15 = vpack.c.bf16 %v2122_v63, %v2124_v40  ;;  %v2126_v41 = vpop.eup %2125  ;;  %2139 = vpow2.f32 %v739_v33  ;;  %415 = vst.msk [vmem:[#allocation4 + $0x38] sm:$0xff] %vm407_vm3, %v3044_v3  ;;  %416 = vst.msk [vmem:[#allocation4 + $0x40] sm:$0xff] %vm407_vm3, %v3044_v3  ;;  %v757_v24 = vmul.f32 1.442695, %v3049_v13  ;;  %v906_v54 = vld [vmem:[#allocation3 + $0x38] sm:$0xff] }
 0x236   : > { %947 = vadd.xlane.f32.xlu1 %v946_v28  ;;  %956 = vadd.xlane.f32.xlu0 %v955_v17  ;;  %v964_v45 = vsel %vm658_vm2, %v2126_v41, 0.0  ;;  %2141 = vpow2.f32 %v743_v31  ;;  %417 = vst.msk [vmem:[#allocation4 + $0x48] sm:$0xff] %vm407_vm3, %v3044_v3  ;;  %418 = vst.msk [vmem:[#allocation4 + $0x50] sm:$0xff] %vm407_vm3, %v3044_v3  ;;  %v761_v20 = vmul.f32 1.442695, %v3051_v16  ;;  %v3052_v47 = vsub.f32 %v2658_v59, %v2675_v14  ;;  %v2103_v28 = vld [vmem:[%s3035_s4 + $0x8] sm:$0xff]  }
 0x237   : > { %1969 = vmatprep.mubr.msk.bf16.mxu1 %vm658_vm2, %v1128_v15  ;;  %419 = vst.msk [vmem:[#allocation4 + $0x58] sm:$0xff] %vm407_vm3, %v3044_v3  ;;  %420 = vst.msk [vmem:[#allocation4 + $0x60] sm:$0xff] %vm407_vm3, %v3044_v3  ;;  %2143 = vpow2.f32 %v745_v19  ;;  %1977 = vmatprep.subr.bf16.mxu1 %v2103_v28  ;;  %v899_v17 = vld [vmem:[#allocation3] sm:$0xff]  ;;  %v3054_v19 = vsub.f32 %v2668_v8, %v2685_v36  ;;  %v909_v5 = vld [vmem:[#allocation3 + $0x50] sm:$0xff] }
 0x238   : > { %v2128_v23 = vpop.eup %2127  ;;  %421 = vst.msk [vmem:[#allocation4 + $0x68] sm:$0xff] %vm407_vm3, %v3044_v3  ;;  %422 = vst.msk [vmem:[#allocation4 + $0x70] sm:$0xff] %vm407_vm3, %v3044_v3  ;;  %2145 = vpow2.f32 %v747_v1  ;;  %v763_v4 = vmul.f32 1.442695, %v3052_v47  ;;  %1978 = vmatpush3.bf16.msra.mxu1 %v2103_v28  ;;  %v3055_v1 = vsub.f32 %v2678_v27, %v2695_v6  ;;  %v907_v62 = vld [vmem:[#allocation3 + $0x40] sm:$0xff] }
 0x239   : > { %v961_v12 = vsel %vm658_vm2, %v2128_v23, 0.0  ;;  %v1129_v37 = vpack.c.bf16 %v2126_v41, %v2128_v23  ;;  %v2130_v22 = vpop.eup %2129  ;;  %423 = vst.msk [vmem:[#allocation4 + $0x78] sm:$0xff] %vm407_vm3, %v3044_v3  ;;  %2147 = vpow2.f32 %v749_v53  ;;  %v902_v23 = vld [vmem:[#allocation3 + $0x18] sm:$0xff]  ;;  %v769_v60 = vmul.f32 1.442695, %v3054_v19 }
 0x23a   : > { %965 = vadd.xlane.f32.xlu1 %v964_v45  ;;  %962 = vadd.xlane.f32.xlu0 %v961_v12  ;;  %v970_v55 = vsel %vm658_vm2, %v2130_v22, 0.0  ;;  %2149 = vpow2.f32 %v751_v56  ;;  %v900_v12 = vld [vmem:[#allocation3 + $0x8] sm:$0xff]  ;;  %v767_v3 = vmul.f32 1.442695, %v3055_v1 }
 0x23b   : > { %1970 = vmatmul.mubr.msk.bf16.gmra.mxu1 %vm658_vm2, %v1129_v37  ;;  %2151 = vpow2.f32 %v753_v61 }
 0x23c   : > { %v2132_v10 = vpop.eup %2131  ;;  %2153 = vpow2.f32 %v755_v2  ;;  %v904_v2 = vld [vmem:[#allocation3 + $0x28] sm:$0xff] }
 0x23d   : > { %v967_v25 = vsel %vm658_vm2, %v2132_v10, 0.0  ;;  %v1130_v35 = vpack.c.bf16 %v2130_v22, %v2132_v10  ;;  %v2134_v0 = vpop.eup %2133  ;;  %2155 = vpow2.f32 %v757_v24 }
 0x23e   : > { %959 = vadd.xlane.f32.xlu1 %v958_v43  ;;  %968 = vadd.xlane.f32.xlu0 %v967_v25  ;;  %v976_v57 = vsel %vm658_vm2, %v2134_v0, 0.0  ;;  %2157 = vpow2.f32 %v759_v9  ;;  %v910_v9 = vld [vmem:[#allocation3 + $0x58] sm:$0xff] }
 0x23f   : > { %1973 = vmatprep.mubr.msk.bf16.mxu1 %vm658_vm2, %v1130_v35  ;;  %2159 = vpow2.f32 %v761_v20  ;;  %v901_v35 = vld [vmem:[#allocation3 + $0x10] sm:$0xff] }
 0x240   : > { %v2136_v26 = vpop.eup %2135  ;;  %2161 = vpow2.f32 %v763_v4 }
 0x241   : > { %v973_v32 = vsel %vm658_vm2, %v2136_v26, 0.0  ;;  %v1131_v49 = vpack.c.bf16 %v2134_v0, %v2136_v26  ;;  %v2138_v7 = vpop.eup %2137  ;;  %2163 = vpow2.f32 %v765_v52 }
 0x242   : > { %977 = vadd.xlane.f32.xlu1 %v976_v57  ;;  %974 = vadd.xlane.f32.xlu0 %v973_v32  ;;  %v2140_v18 = vpop.eup %2139  ;;  %v916_v43 = vmul.f32 %v2138_v7, %v900_v12 }
 0x243   : > { %1974 = vmatmul.mubr.msk.bf16.gmra.mxu1 %vm658_vm2, %v1131_v49  ;;  %v2142_v11 = vpop.eup %2141  ;;  %v915_v15 = vmul.f32 %v2140_v18, %v899_v17  ;;  %v903_v49 = vld [vmem:[#allocation3 + $0x20] sm:$0xff] }
 0x244   : > { %v2144_v34 = vpop.eup %2143  ;;  %v917_v26 = vmul.f32 %v2142_v11, %v901_v35 }
 0x245   : > { %v2146_v21 = vpop.eup %2145  ;;  %v918_v37 = vmul.f32 %v2144_v34, %v902_v23 }
 0x246   : > { %971 = vadd.xlane.f32.xlu1 %v970_v55  ;;  %v2829_v44 = vpop.eup %2147  ;;  %v919_v55 = vmul.f32 %v2146_v21, %v903_v49 }
 0x247   : > { %v2150_v29 = vpop.eup %2149 }
 0x248   : > { %v2152_v42 = vpop.eup %2151  ;;  %v921_v51 = vmul.f32 %v2150_v29, %v905_v30 }
 0x249   : > { %v2832_v63 = vpop.eup %2153  ;;  %v922_v8 = vmul.f32 %v2152_v42, %v906_v54 }
 0x24a   : > { %v2834_v59 = vpop.eup %2155  ;;  %v923_v6 = vmul.f32 %v2832_v63, %v907_v62 }
 0x24b   : > { %v2838_v50 = vpop.eup %2157 }
 0x24c   : > { %v2840_v14 = vpop.eup %2159 }
 0x24d   : > { %v2844_v48 = vpop.eup %2161  ;;  %v926_v47 = vmul.f32 %v2840_v14, %v910_v9 }
 0x24e   : > { %v2846_v40 = vpop.eup %2163 }
 0x257   : > { %1035 = vperm.xlu1 %2086, %v2138_v7   ;;  %v920_v7 = vmul.f32 %v2829_v44, %v904_v2  ;;  %v1014_v2 = vld [vmem:[#allocation4 + $0x10] sm:$0xff] }
 0x258   : > { %1030 = vperm.xlu0 %2085, %v2140_v18  }
 0x25b   : > { %1040 = vperm.xlu1 %2086, %v2142_v11  }
 0x25c   : > { %1045 = vperm.xlu0 %2085, %v2144_v34   ;;  %v925_v34 = vmul.f32 %v2838_v50, %v909_v5 }
 0x25f   : > { %1050 = vperm.xlu1 %2086, %v2146_v21  }
 0x260   : > { %1055 = vperm.xlu0 %2085, %v2829_v44   ;;  %v911_v44 = vld [vmem:[#allocation3 + $0x60] sm:$0xff] }
 0x263   : > { %1060 = vperm.xlu1 %2086, %v2150_v29   ;;  %v908_v29 = vld [vmem:[#allocation3 + $0x48] sm:$0xff] }
 0x264   : > { %1065 = vperm.xlu0 %2085, %v2152_v42  }
 0x267   : > { %1070 = vperm.xlu1 %2086, %v2832_v63  }
 0x268   : > { %1075 = vperm.xlu0 %2085, %v2834_v59  }
 0x26b   : > { %1080 = vperm.xlu1 %2086, %v2838_v50   ;;  %v927_v50 = vmul.f32 %v2844_v48, %v911_v44 }
 0x26c   : > { %1085 = vperm.xlu0 %2085, %v2840_v14   ;;  %v924_v14 = vmul.f32 %v2834_v59, %v908_v29 }
 0x26f   : > { %1090 = vperm.xlu1 %2086, %v2844_v48  }
 0x270   : > { %1095 = vperm.xlu0 %2085, %v2846_v40  }
 0x2a3   : > { %v933_v41 = vpop.xlane.xlu1 %932 }
 0x2a4   : > { %v979_v45 = vadd.f32 %v933_v41, %v915_v15  ;;  %v2104_v41 = vld [vmem:[%s3035_s4] sm:$0xff]  }
 0x2a5   : > { %1979 = vmatprep.subr.bf16.mxu1 %v2104_v41 }
 0x2a6   : > { %996 = vst.msk [vmem:[#allocation3] sm:$0xff] %vm374_vm1, %v979_v45  ;;  %1980 = vmatpush3.bf16.msra.mxu1 %v2104_v41  ;;  %v1018_v41 = vld [vmem:[#allocation4 + $0x30] sm:$0xff] }
 0x2a7   : > { %v942_v22 = vpop.xlane.xlu1 %941 }
 0x2a8   : > { %v982_v10 = vadd.f32 %v942_v22, %v918_v37  ;;  %v913_v37 = vld [vmem:[#allocation3 + $0x70] sm:$0xff]  ;;  %v914_v22 = vld [vmem:[#allocation3 + $0x78] sm:$0xff] }
 0x2a9   : > { %v936_v25 = vpop.xlane.xlu0 %935 }
 0x2aa   : > { %999 = vst.msk [vmem:[#allocation3 + $0x18] sm:$0xff] %vm374_vm1, %v982_v10  ;;  %v980_v0 = vadd.f32 %v936_v25, %v916_v43 }
 0x2ac   : > { %997 = vst.msk [vmem:[#allocation3 + $0x8] sm:$0xff] %vm374_vm1, %v980_v0 }
 0x2ad   : > { %v939_v57 = vpop.xlane.xlu0 %938  ;;  %v1353_v61 = vld [vmem:[#allocation3] sm:$0xff] }
 0x2ae   : > { %v981_v32 = vadd.f32 %v939_v57, %v917_v26  ;;  %v912_v57 = vld [vmem:[#allocation3 + $0x68] sm:$0xff] }
 0x2b0   : > { %998 = vst.msk [vmem:[#allocation3 + $0x10] sm:$0xff] %vm374_vm1, %v981_v32 }
 0x2b1   : > { %v1356_v39 = vld [vmem:[#allocation3 + $0x18] sm:$0xff] }
 0x2b2   : > { %2165 = vrcp.f32 %v1356_v39 }
 0x2b3   : > { %v945_v33 = vpop.xlane.xlu0 %944  ;;  %v1354_v31 = vld [vmem:[#allocation3 + $0x8] sm:$0xff] }
 0x2b4   : > { %v983_v46 = vadd.f32 %v945_v33, %v919_v55  ;;  %2167 = vrcp.f32 %v1354_v31  ;;  %v928_v55 = vmul.f32 %v2846_v40, %v912_v57 }
 0x2b6   : > { %1000 = vst.msk [vmem:[#allocation3 + $0x20] sm:$0xff] %vm374_vm1, %v983_v46 }
 0x2b7   : > { %v951_v53 = vpop.xlane.xlu0 %950  ;;  %v1355_v56 = vld [vmem:[#allocation3 + $0x10] sm:$0xff] }
 0x2b8   : > { %v985_v58 = vadd.f32 %v951_v53, %v921_v51  ;;  %2169 = vrcp.f32 %v1355_v56 }
 0x2b9   : > { %2171 = vpow2.f32 %v769_v60 }
 0x2ba   : > { %2173 = vpow2.f32 %v767_v3  ;;  %1002 = vst.msk [vmem:[#allocation3 + $0x30] sm:$0xff] %vm374_vm1, %v985_v58 }
 0x2bb   : > { %v954_v36 = vpop.xlane.xlu1 %953  ;;  %2175 = vrcp.f32 %v1353_v61 }
 0x2bc   : > { %v986_v27 = vadd.f32 %v954_v36, %v922_v8 }
 0x2bd   : > { %v1357_v4 = vld [vmem:[#allocation3 + $0x20] sm:$0xff] }
 0x2be   : > { %1003 = vst.msk [vmem:[#allocation3 + $0x38] sm:$0xff] %vm374_vm1, %v986_v27 }
 0x2bf   : > { %v2166_v13 = vpop.eup %2165  ;;  %v957_v24 = vpop.xlane.xlu0 %956 }
 0x2c0   : > { %v948_v18 = vpop.xlane.xlu1 %947  ;;  %v987_v11 = vadd.f32 %v957_v24, %v923_v6  ;;  %1402 = vperm.xlu0 %2085, %v2166_v13   ;;  %v1012_v6 = vld [vmem:[#allocation4] sm:$0xff] }
 0x2c1   : > { %v984_v16 = vadd.f32 %v948_v18, %v920_v7  ;;  %v1359_v20 = vld [vmem:[#allocation3 + $0x30] sm:$0xff]  ;;  %v2168_v21 = vpop.eup %2167  ;;  %v1015_v18 = vld [vmem:[#allocation4 + $0x18] sm:$0xff] }
 0x2c2   : > { %1004 = vst.msk [vmem:[#allocation3 + $0x40] sm:$0xff] %vm374_vm1, %v987_v11  ;;  %2177 = vrcp.f32 %v1359_v20  ;;  %v1013_v20 = vld [vmem:[#allocation4 + $0x8] sm:$0xff] }
 0x2c3   : > { %1001 = vst.msk [vmem:[#allocation3 + $0x28] sm:$0xff] %vm374_vm1, %v984_v16  ;;  %v963_v38 = vpop.xlane.xlu0 %962  ;;  %2179 = vrcp.f32 %v1357_v4 }
 0x2c4   : > { %v966_v52 = vpop.xlane.xlu1 %965  ;;  %v989_v42 = vadd.f32 %v963_v38, %v925_v34  ;;  %1392 = vperm.xlu0 %2085, %v2168_v21  }
 0x2c5   : > { %v990_v63 = vadd.f32 %v966_v52, %v926_v47  ;;  %v2170_v28 = vpop.eup %2169  ;;  %v1360_v17 = vld [vmem:[#allocation3 + $0x38] sm:$0xff] }
 0x2c6   : > { %v2172_v15 = vpop.eup %2171  ;;  %1006 = vst.msk [vmem:[#allocation3 + $0x50] sm:$0xff] %vm374_vm1, %v989_v42  ;;  %1397 = vperm.xlu1 %2086, %v2170_v28   ;;  %2181 = vrcp.f32 %v1360_v17 }
 0x2c7   : > { %1007 = vst.msk [vmem:[#allocation3 + $0x58] sm:$0xff] %vm374_vm1, %v990_v63  ;;  %v2174_v23 = vpop.eup %2173  ;;  %v969_v45 = vpop.xlane.xlu0 %968  ;;  %v930_v48 = vmul.f32 %v2172_v15, %v914_v22 }
 0x2c8   : > { %v960_v12 = vpop.xlane.xlu1 %959  ;;  %v991_v10 = vadd.f32 %v969_v45, %v927_v50  ;;  %v2176_v25 = vpop.eup %2175  ;;  %v929_v59 = vmul.f32 %v2174_v23, %v913_v37  ;;  %v1019_v37 = vld [vmem:[#allocation4 + $0x38] sm:$0xff] }
 0x2c9   : > { %v988_v43 = vadd.f32 %v960_v12, %v924_v14  ;;  %v1361_v32 = vld [vmem:[#allocation3 + $0x40] sm:$0xff] }
 0x2ca   : > { %v1358_v35 = vld [vmem:[#allocation3 + $0x28] sm:$0xff]  ;;  %1008 = vst.msk [vmem:[#allocation3 + $0x60] sm:$0xff] %vm374_vm1, %v991_v10  ;;  %1387 = vperm.xlu1 %2086, %v2176_v25  }
 0x2cb   : > { %1005 = vst.msk [vmem:[#allocation3 + $0x48] sm:$0xff] %vm374_vm1, %v988_v43  ;;  %2183 = vrcp.f32 %v1358_v35  ;;  %v975_v0 = vpop.xlane.xlu0 %974  ;;  %v1017_v25 = vld [vmem:[#allocation4 + $0x28] sm:$0xff] }
 0x2cc   : > { %v978_v26 = vpop.xlane.xlu1 %977  ;;  %v993_v49 = vadd.f32 %v975_v0, %v929_v59  ;;  %2185 = vrcp.f32 %v1361_v32 }
 0x2cd   : > { %v994_v39 = vadd.f32 %v978_v26, %v930_v48  ;;  %v1363_v33 = vld [vmem:[#allocation3 + $0x50] sm:$0xff] }
 0x2ce   : > { %1010 = vst.msk [vmem:[#allocation3 + $0x70] sm:$0xff] %vm374_vm1, %v993_v49  ;;  %2187 = vrcp.f32 %v1363_v33  ;;  %v1364_v1 = vld [vmem:[#allocation3 + $0x58] sm:$0xff]  ;;  %v1022_v26 = vld [vmem:[#allocation4 + $0x50] sm:$0xff] }
 0x2cf   : > { %1011 = vst.msk [vmem:[#allocation3 + $0x78] sm:$0xff] %vm374_vm1, %v994_v39  ;;  %v2178_v30 = vpop.eup %2177 }
 0x2d0   : > { %v972_v31 = vpop.xlane.xlu1 %971  ;;  %1417 = vperm.xlu1 %2086, %v2178_v30   ;;  %v2180_v60 = vpop.eup %2179 }
 0x2d1   : > { %v992_v46 = vadd.f32 %v972_v31, %v928_v55  ;;  %v1365_v51 = vld [vmem:[#allocation3 + $0x60] sm:$0xff] }
 0x2d2   : > { %v1362_v19 = vld [vmem:[#allocation3 + $0x48] sm:$0xff]  ;;  %v1020_v55 = vld [vmem:[#allocation4 + $0x40] sm:$0xff] }
 0x2d3   : > { %1009 = vst.msk [vmem:[#allocation3 + $0x68] sm:$0xff] %vm374_vm1, %v992_v46  ;;  %2189 = vrcp.f32 %v1362_v19  ;;  %v2182_v3 = vpop.eup %2181  ;;  %v1031_v8 = vpop.permute.xlu0 %1030  ;;  %v1023_v46 = vld [vmem:[#allocation4 + $0x58] sm:$0xff] }
 0x2d4   : > { %1407 = vperm.xlu1 %2086, %v2180_v60   ;;  %1422 = vperm.xlu0 %2085, %v2182_v3   ;;  %2191 = vrcp.f32 %v1364_v1  ;;  %v1036_v54 = vpop.permute.xlu1 %1035  ;;  %v1108_v11 = vmul.f32 %v1031_v8, %v1012_v6  ;;  %v1024_v8 = vld [vmem:[#allocation4 + $0x60] sm:$0xff] }
 0x2d5   : > { %2193 = vrcp.f32 %v1365_v51  ;;  %v1367_v40 = vld [vmem:[#allocation3 + $0x70] sm:$0xff]  ;;  %v1109_v29 = vmul.f32 %v1036_v54, %v1013_v20  ;;  %v1021_v51 = vld [vmem:[#allocation4 + $0x48] sm:$0xff] }
 0x2d6   : > { %2195 = vrcp.f32 %v1367_v40  ;;  %v1368_v61 = vld [vmem:[#allocation3 + $0x78] sm:$0xff] }
 0x2d7   : > { %v1046_v5 = vpop.permute.xlu0 %1045 }
 0x2d8   : > { %v2184_v53 = vpop.eup %2183  ;;  %1100 = vperm.xlu1 %2086, %v2174_v23   ;;  %v1041_v27 = vpop.permute.xlu1 %1040  ;;  %v1111_v21 = vmul.f32 %v1046_v5, %v1015_v18  ;;  %v1016_v23 = vld [vmem:[#allocation4 + $0x20] sm:$0xff] }
 0x2d9   : > { %1412 = vperm.xlu0 %2085, %v2184_v53   ;;  %v2186_v58 = vpop.eup %2185  ;;  %v1110_v13 = vmul.f32 %v1041_v27, %v1014_v2 }
 0x2da   : > { %v1366_v56 = vld [vmem:[#allocation3 + $0x68] sm:$0xff] }
 0x2db   : > { %2197 = vrcp.f32 %v1366_v56  ;;  %v2188_v36 = vpop.eup %2187  ;;  %v1056_v63 = vpop.permute.xlu0 %1055 }
 0x2dc   : > { %1427 = vperm.xlu1 %2086, %v2186_v58   ;;  %2199 = vrcp.f32 %v1368_v61  ;;  %v1051_v34 = vpop.permute.xlu1 %1050  ;;  %v1113_v49 = vmul.f32 %v1056_v63, %v1017_v25 }
 0x2dd   : > { %1105 = vperm.xlu0 %2085, %v2172_v15   ;;  %v1112_v10 = vmul.f32 %v1051_v34, %v1016_v23  ;;  %v1026_v23 = vld [vmem:[#allocation4 + $0x70] sm:$0xff] }
 0x2df   : > { %v1066_v14 = vpop.permute.xlu0 %1065 }
 0x2e0   : > { %v2190_v62 = vpop.eup %2189  ;;  %1437 = vperm.xlu1 %2086, %v2188_v36   ;;  %v1061_v50 = vpop.permute.xlu1 %1060  ;;  %v1115_v48 = vmul.f32 %v1066_v14, %v1019_v37 }
 0x2e1   : > { %1432 = vperm.xlu0 %2085, %v2190_v62   ;;  %v2192_v7 = vpop.eup %2191  ;;  %v1114_v12 = vmul.f32 %v1061_v50, %v1018_v41 }
 0x2e2   : > { %v2194_v24 = vpop.eup %2193  ;;  %v1963_v9 = vpop.f32.mrf.mxu0 }
 0x2e3   : > { %v1287_v16 = vadd.f32 %v1963_v9, %v1110_v13  ;;  %v2196_v4 = vpop.eup %2195  ;;  %v1076_v35 = vpop.permute.xlu0 %1075 }
 0x2e4   : > { %1447 = vperm.xlu1 %2086, %v2194_v24   ;;  %v1222_v47 = vpop.f32.mrf.mxu0  ;;  %v1071_v45 = vpop.permute.xlu1 %1070  ;;  %v1117_v58 = vmul.f32 %v1076_v35, %v1021_v51 }
 0x2e5   : > { %1442 = vperm.xlu0 %2085, %v2192_v7   ;;  %1304 = vst.msk [vmem:[#allocation4 + $0x10] sm:$0xff] %vm407_vm3, %v1287_v16  ;;  %v1285_v38 = vadd.f32 %v1222_v47, %v1108_v11  ;;  %v1116_v1 = vmul.f32 %v1071_v45, %v1020_v55  ;;  %v1025_v7 = vld [vmem:[#allocation4 + $0x68] sm:$0xff] }
 0x2e6   : > { %v1964_v44 = vpop.f32.mrf.mxu0 }
 0x2e7   : > { %1302 = vst.msk [vmem:[#allocation4] sm:$0xff] %vm407_vm3, %v1285_v38  ;;  %v1288_v42 = vadd.f32 %v1964_v44, %v1111_v21  ;;  %v1086_v19 = vpop.permute.xlu0 %1085 }
 0x2e8   : > { %v2198_v52 = vpop.eup %2197  ;;  %1457 = vperm.xlu1 %2086, %v2196_v4   ;;  %v1225_v28 = vpop.f32.mrf.mxu0  ;;  %v1119_v53 = vmul.f32 %v1086_v19, %v1023_v46 }
 0x2e9   : > { %1452 = vperm.xlu0 %2085, %v2198_v52   ;;  %1305 = vst.msk [vmem:[#allocation4 + $0x18] sm:$0xff] %vm407_vm3, %v1288_v42  ;;  %v1286_v17 = vadd.f32 %v1225_v28, %v1109_v29  ;;  %v2200_v15 = vpop.eup %2199  ;;  %v1081_v57 = vpop.permute.xlu1 %1080 }
 0x2ea   : > { %v1118_v30 = vmul.f32 %v1081_v57, %v1022_v26  ;;  %v1027_v26 = vld [vmem:[#allocation4 + $0x78] sm:$0xff] }
 0x2eb   : > { %1303 = vst.msk [vmem:[#allocation4 + $0x8] sm:$0xff] %vm407_vm3, %v1286_v17  ;;  %v1096_v13 = vpop.permute.xlu0 %1095 }
 0x2ec   : > { %v1121_v9 = vmul.f32 %v1096_v13, %v1025_v7  ;;  %v1339_v4 = vld [vmem:[#allocation4 + $0x10] sm:$0xff] }
 0x2ed   : > { %1462 = vperm.xlu0 %2085, %v2200_v15   ;;  %v1091_v36 = vpop.permute.xlu1 %1090 }
 0x2ee   : > { %v1120_v6 = vmul.f32 %v1091_v36, %v1024_v8  ;;  %v1337_v52 = vld [vmem:[#allocation4] sm:$0xff] }
 0x2f0   : > { %v1340_v29 = vld [vmem:[#allocation4 + $0x18] sm:$0xff] }
 0x2f2   : > { %v1338_v21 = vld [vmem:[#allocation4 + $0x8] sm:$0xff] }
 0x2f3   : > { %v1967_v22 = vpop.f32.mrf.mxu1 }
 0x2f4   : > { %v1291_v43 = vadd.f32 %v1967_v22, %v1114_v12 }
 0x2f5   : > { %v1238_v59 = vpop.f32.mrf.mxu1 }
 0x2f6   : > { %1308 = vst.msk [vmem:[#allocation4 + $0x30] sm:$0xff] %vm407_vm3, %v1291_v43  ;;  %v1289_v0 = vadd.f32 %v1238_v59, %v1112_v10 }
 0x2f7   : > { %v1968_v32 = vpop.f32.mrf.mxu1 }
 0x2f8   : > { %1306 = vst.msk [vmem:[#allocation4 + $0x20] sm:$0xff] %vm407_vm3, %v1289_v0  ;;  %v1292_v39 = vadd.f32 %v1968_v32, %v1115_v48 }
 0x2f9   : > { %v1241_v33 = vpop.f32.mrf.mxu1 }
 0x2fa   : > { %1309 = vst.msk [vmem:[#allocation4 + $0x38] sm:$0xff] %vm407_vm3, %v1292_v39  ;;  %v1290_v31 = vadd.f32 %v1241_v33, %v1113_v49 }
 0x2fb   : > { %v1971_v60 = vpop.f32.mrf.mxu1 }
 0x2fc   : > { %1307 = vst.msk [vmem:[#allocation4 + $0x28] sm:$0xff] %vm407_vm3, %v1290_v31  ;;  %v1295_v3 = vadd.f32 %v1971_v60, %v1118_v30 }
 0x2fd   : > { %v1254_v40 = vpop.f32.mrf.mxu1  ;;  %v1343_v25 = vld [vmem:[#allocation4 + $0x30] sm:$0xff] }
 0x2fe   : > { %1312 = vst.msk [vmem:[#allocation4 + $0x50] sm:$0xff] %vm407_vm3, %v1295_v3  ;;  %v1293_v54 = vadd.f32 %v1254_v40, %v1116_v1 }
 0x2ff   : > { %v1972_v56 = vpop.f32.mrf.mxu1  ;;  %v1341_v37 = vld [vmem:[#allocation4 + $0x20] sm:$0xff] }
 0x300   : > { %1310 = vst.msk [vmem:[#allocation4 + $0x40] sm:$0xff] %vm407_vm3, %v1293_v54  ;;  %v1296_v61 = vadd.f32 %v1972_v56, %v1119_v53 }
 0x301   : > { %v1257_v62 = vpop.f32.mrf.mxu1  ;;  %v1344_v45 = vld [vmem:[#allocation4 + $0x38] sm:$0xff] }
 0x302   : > { %1313 = vst.msk [vmem:[#allocation4 + $0x58] sm:$0xff] %vm407_vm3, %v1296_v61  ;;  %v1294_v2 = vadd.f32 %v1257_v62, %v1117_v58 }
 0x303   : > { %v1975_v27 = vpop.f32.mrf.mxu1  ;;  %v1342_v22 = vld [vmem:[#allocation4 + $0x28] sm:$0xff] }
 0x304   : > { %1311 = vst.msk [vmem:[#allocation4 + $0x48] sm:$0xff] %vm407_vm3, %v1294_v2 }
 0x305   : > { %v1270_v24 = vpop.f32.mrf.mxu1  ;;  %v1347_v40 = vld [vmem:[#allocation4 + $0x50] sm:$0xff] }
 0x306   : > { %v1297_v18 = vadd.f32 %v1270_v24, %v1120_v6 }
 0x307   : > { %v1976_v5 = vpop.f32.mrf.mxu1  ;;  %v1345_v31 = vld [vmem:[#allocation4 + $0x40] sm:$0xff] }
 0x308   : > { %1314 = vst.msk [vmem:[#allocation4 + $0x60] sm:$0xff] %vm407_vm3, %v1297_v18 }
 0x309   : > { %v1273_v11 = vpop.f32.mrf.mxu1  ;;  %v1348_v53 = vld [vmem:[#allocation4 + $0x58] sm:$0xff] }
 0x30a   : > { %v1298_v16 = vadd.f32 %v1273_v11, %v1121_v9 }
 0x30b   : > { %v1346_v46 = vld [vmem:[#allocation4 + $0x48] sm:$0xff] }
 0x30c   : > { %1315 = vst.msk [vmem:[#allocation4 + $0x68] sm:$0xff] %vm407_vm3, %v1298_v16 }
 0x30f   : > { %v1349_v36 = vld [vmem:[#allocation4 + $0x60] sm:$0xff] }
 0x313   : > { %v1350_v62 = vld [vmem:[#allocation4 + $0x68] sm:$0xff] }
 0x33b   : > { %v1403_v20 = vpop.permute.xlu0 %1402 }
 0x33c   : > { %v1468_v28 = vmul.f32 %v1403_v20, %v1340_v29  ;;  %v1628_v20 = vld [vmem:[%s2914_s10 + $0x10] sm:$0xff]  ;;  %v1627_v29 = vld [vmem:[%s2914_s10 + $0x8] sm:$0xff] }
 0x33f   : > { %v1393_v47 = vpop.permute.xlu0 %1392 }
 0x340   : > { %v1466_v42 = vmul.f32 %v1393_v47, %v1338_v21  ;;  %v1626_v47 = vld [vmem:[%s2914_s10] sm:$0xff] }
 0x341   : > { %v1398_v34 = vpop.permute.xlu1 %1397 }
 0x342   : > { %v1467_v38 = vmul.f32 %v1398_v34, %v1339_v4 }
 0x344   : > { %v1482_v15 = vpack.c.bf16 %v1468_v28, %v1467_v38  ;;  %v1629_v38 = vld [vmem:[%s2914_s10 + $0x18] sm:$0xff] }
 0x345   : > { %v1388_v44 = vpop.permute.xlu1 %1387 }
 0x346   : > { %v1465_v63 = vmul.f32 %v1388_v44, %v1337_v52 }
 0x348   : > { %v1481_v17 = vpack.c.bf16 %v1466_v42, %v1465_v63 }
 0x34a   : > { %1981 = vmatprep.mubr.msk.bf16.mxu1 %vm407_vm3, %v1481_v17  ;;  %v1632_v17 = vld [vmem:[%s2914_s10 + $0x30] sm:$0xff] }
 0x34b   : > { %1982 = vmatmul.mubr.msk.bf16.vlgmr.msra.gmra.mxu1 %vm407_vm3, %v1482_v15  ;;  %v1418_v50 = vpop.permute.xlu1 %1417 }
 0x34c   : > { %v1471_v0 = vmul.f32 %v1418_v50, %v1343_v25  ;;  %v1630_v50 = vld [vmem:[%s2914_s10 + $0x20] sm:$0xff]  ;;  %v1636_v25 = vld [vmem:[%s2914_s10 + $0x50] sm:$0xff] }
 0x34f   : > { %v1423_v14 = vpop.permute.xlu0 %1422  ;;  %v1408_v41 = vpop.permute.xlu1 %1407 }
 0x350   : > { %v1472_v12 = vmul.f32 %v1423_v14, %v1344_v45  ;;  %v1469_v35 = vmul.f32 %v1408_v41, %v1341_v37  ;;  %v1631_v37 = vld [vmem:[%s2914_s10 + $0x28] sm:$0xff] }
 0x352   : > { %v1484_v49 = vpack.c.bf16 %v1472_v12, %v1471_v0 }
 0x353   : > { %v1101_v43 = vpop.permute.xlu1 %1100 }
 0x354   : > { %v1413_v10 = vpop.permute.xlu0 %1412  ;;  %v1122_v48 = vmul.f32 %v1101_v43, %v1026_v23  ;;  %v1633_v23 = vld [vmem:[%s2914_s10 + $0x38] sm:$0xff] }
 0x355   : > { %v1470_v59 = vmul.f32 %v1413_v10, %v1342_v22 }
 0x356   : > { %v1299_v32 = vadd.f32 %v1975_v27, %v1122_v48 }
 0x357   : > { %v1483_v57 = vpack.c.bf16 %v1470_v59, %v1469_v35  ;;  %v1428_v55 = vpop.permute.xlu1 %1427  ;;  %v1634_v59 = vld [vmem:[%s2914_s10 + $0x40] sm:$0xff] }
 0x358   : > { %v1106_v39 = vpop.permute.xlu0 %1105  ;;  %1316 = vst.msk [vmem:[#allocation4 + $0x70] sm:$0xff] %vm407_vm3, %v1299_v32  ;;  %v1473_v1 = vmul.f32 %v1428_v55, %v1345_v31 }
 0x359   : > { %v1123_v33 = vmul.f32 %v1106_v39, %v1027_v26  ;;  %1985 = vmatprep.mubr.msk.bf16.mxu1 %vm407_vm3, %v1483_v57  ;;  %v1637_v26 = vld [vmem:[%s2914_s10 + $0x58] sm:$0xff] }
 0x35a   : > { %1986 = vmatmul.mubr.msk.bf16.gmra.mxu1 %vm407_vm3, %v1484_v49  ;;  %v1635_v49 = vld [vmem:[%s2914_s10 + $0x48] sm:$0xff] }
 0x35b   : > { %v1300_v30 = vadd.f32 %v1976_v5, %v1123_v33  ;;  %v1438_v60 = vpop.permute.xlu1 %1437  ;;  %v1640_v33 = vld [vmem:[%s2914_s10 + $0x70] sm:$0xff] }
 0x35c   : > { %v1433_v19 = vpop.permute.xlu0 %1432  ;;  %v1475_v58 = vmul.f32 %v1438_v60, %v1347_v40  ;;  %v1639_v40 = vld [vmem:[%s2914_s10 + $0x68] sm:$0xff] }
 0x35d   : > { %1317 = vst.msk [vmem:[#allocation4 + $0x78] sm:$0xff] %vm407_vm3, %v1300_v30  ;;  %v1474_v3 = vmul.f32 %v1433_v19, %v1346_v46  ;;  %v1638_v46 = vld [vmem:[%s2914_s10 + $0x60] sm:$0xff] }
 0x35f   : > { %v1485_v51 = vpack.c.bf16 %v1474_v3, %v1473_v1  ;;  %v1448_v56 = vpop.permute.xlu1 %1447  ;;  %v1351_v24 = vld [vmem:[#allocation4 + $0x70] sm:$0xff]  ;;  %v1641_v1 = vld [vmem:[%s2914_s10 + $0x78] sm:$0xff]  ;;  %s2205_s10 = sshll.u32 %s2298_s9, 4  ;;  %s2206_s10 = int_to_ptr.vmem [resolvable:$false] %s2205_s10 }
 0x360   : > { %v1443_v54 = vpop.permute.xlu0 %1442  ;;  %v1477_v27 = vmul.f32 %v1448_v56, %v1349_v36  ;;  %s2207_s13 = scalar_lea.vmem %s2206_s10, 4096  ;;  %p2208_p4 = scmp.lt.s32.totalorder %s2974_s12, %s2206_s10 }
 0x361   : > { %v1476_v61 = vmul.f32 %v1443_v54, %v1348_v53  ;;  %1989 = vmatprep.mubr.msk.bf16.mxu1 %vm407_vm3, %v1485_v51  ;;  %p2209_p5 = scmp.lt.s32.totalorder %s2207_s13, %s2201_s8 }
 0x363   : > { %v1486_v8 = vpack.c.bf16 %v1476_v61, %v1475_v58  ;;  %v1458_v7 = vpop.permute.xlu1 %1457  ;;  %p2210_p6 = por %p2209_p5, %p2208_p4 }
 0x364   : > { %v1453_v2 = vpop.permute.xlu0 %1452  ;;  %v1352_v18 = vld [vmem:[#allocation4 + $0x78] sm:$0xff]  ;;  %v1479_v9 = vmul.f32 %v1458_v7, %v1351_v24 }
 0x365   : > { %v1478_v6 = vmul.f32 %v1453_v2, %v1350_v62  ;;  %1990 = vmatmul.mubr.msk.bf16.gmra.mxu1 %vm407_vm3, %v1486_v8  ;;  %p2211_p7 = pnand %p2210_p6, %p2204_p2 }
 0x367   : > { %v1487_v13 = vpack.c.bf16 %v1478_v6, %v1477_v27 }
 0x368   : > { %v1463_v5 = vpop.permute.xlu0 %1462 }
 0x369   : > { %v1480_v11 = vmul.f32 %v1463_v5, %v1352_v18  ;;  %1993 = vmatprep.mubr.msk.bf16.mxu1 %vm407_vm3, %v1487_v13 }
 0x36b   : > { %v1488_v16 = vpack.c.bf16 %v1480_v11, %v1479_v9 }
 0x36d   : > { %1994 = vmatmul.mubr.msk.bf16.gmra.mxu1 %vm407_vm3, %v1488_v16 }
 0x40b   : > { %v1983_v34 = vpop.f32.mrf.mxu1 }
 0x40c   : > { %v1644_v4 = vadd.f32 %v1983_v34, %v1628_v20 }
 0x40d   : > { %v1563_v21 = vpop.f32.mrf.mxu1 }
 0x40e   : > { %1660 = vst.msk [vmem:[%s2921_s16 + $0x10] sm:$0xff] %vm658_vm2, %v1644_v4  ;;  %v1642_v52 = vadd.f32 %v1626_v47, %v1563_v21 }
 0x40f   : > { %v1984_v44 = vpop.f32.mrf.mxu1 }
 0x410   : > { %1658 = vst.msk [vmem:[%s2921_s16] sm:$0xff] %vm658_vm2, %v1642_v52  ;;  %v1645_v42 = vadd.f32 %v1984_v44, %v1629_v38 }
 0x411   : > { %v1566_v63 = vpop.f32.mrf.mxu1 }
 0x412   : > { %1661 = vst.msk [vmem:[%s2921_s16 + $0x18] sm:$0xff] %vm658_vm2, %v1645_v42  ;;  %v1643_v28 = vadd.f32 %v1627_v29, %v1566_v63 }
 0x414   : > { %1659 = vst.msk [vmem:[%s2921_s16 + $0x8] sm:$0xff] %vm658_vm2, %v1643_v28 }
 0x41a   : > { %v1987_v15 = vpop.f32.mrf.mxu1 }
 0x41b   : > { %v1648_v14 = vadd.f32 %v1987_v15, %v1632_v17 }
 0x41c   : > { %v1579_v41 = vpop.f32.mrf.mxu1 }
 0x41d   : > { %1664 = vst.msk [vmem:[%s2921_s16 + $0x30] sm:$0xff] %vm658_vm2, %v1648_v14  ;;  %v1646_v45 = vadd.f32 %v1630_v50, %v1579_v41 }
 0x41e   : > { %v1988_v12 = vpop.f32.mrf.mxu1 }
 0x41f   : > { %1662 = vst.msk [vmem:[%s2921_s16 + $0x20] sm:$0xff] %vm658_vm2, %v1646_v45  ;;  %v1649_v22 = vadd.f32 %v1988_v12, %v1633_v23 }
 0x420   : > { %v1582_v10 = vpop.f32.mrf.mxu1 }
 0x421   : > { %1665 = vst.msk [vmem:[%s2921_s16 + $0x38] sm:$0xff] %vm658_vm2, %v1649_v22  ;;  %v1647_v43 = vadd.f32 %v1631_v37, %v1582_v10 }
 0x423   : > { %1663 = vst.msk [vmem:[%s2921_s16 + $0x28] sm:$0xff] %vm658_vm2, %v1647_v43 }
 0x425   : > { %v1991_v35 = vpop.f32.mrf.mxu1 }
 0x426   : > { %v1652_v48 = vadd.f32 %v1991_v35, %v1636_v25 }
 0x427   : > { %v1595_v0 = vpop.f32.mrf.mxu1 }
 0x428   : > { %1668 = vst.msk [vmem:[%s2921_s16 + $0x50] sm:$0xff] %vm658_vm2, %v1652_v48  ;;  %v1650_v57 = vadd.f32 %v1634_v59, %v1595_v0 }
 0x429   : > { %v1992_v32 = vpop.f32.mrf.mxu1 }
 0x42a   : > { %1666 = vst.msk [vmem:[%s2921_s16 + $0x40] sm:$0xff] %vm658_vm2, %v1650_v57  ;;  %v1653_v39 = vadd.f32 %v1992_v32, %v1637_v26 }
 0x42b   : > { %v1598_v55 = vpop.f32.mrf.mxu1 }
 0x42c   : > { %1669 = vst.msk [vmem:[%s2921_s16 + $0x58] sm:$0xff] %vm658_vm2, %v1653_v39  ;;  %v1651_v30 = vadd.f32 %v1635_v49, %v1598_v55 }
 0x42d   : > { %v1995_v31 = vpop.f32.mrf.mxu1 }
 0x42e   : > { %1667 = vst.msk [vmem:[%s2921_s16 + $0x48] sm:$0xff] %vm658_vm2, %v1651_v30  ;;  %v1656_v19 = vadd.f32 %v1995_v31, %v1640_v33 }
 0x42f   : > { %v1611_v60 = vpop.f32.mrf.mxu1 }
 0x430   : > { %1672 = vst.msk [vmem:[%s2921_s16 + $0x70] sm:$0xff] %vm658_vm2, %v1656_v19  ;;  %v1654_v3 = vadd.f32 %v1638_v46, %v1611_v60 }
 0x431   : > { %v1996_v51 = vpop.f32.mrf.mxu1 }
 0x432   : > { %1670 = vst.msk [vmem:[%s2921_s16 + $0x60] sm:$0xff] %vm658_vm2, %v1654_v3  ;;  %v1657_v53 = vadd.f32 %v1996_v51, %v1641_v1 }
 0x433   : > { %v1614_v54 = vpop.f32.mrf.mxu1 }
 0x434   : > { %1673 = vst.msk [vmem:[%s2921_s16 + $0x78] sm:$0xff] %vm658_vm2, %v1657_v53  ;;  %v1655_v56 = vadd.f32 %v1639_v40, %v1614_v54 }
 0x436   : > { %1671 = vst.msk [vmem:[%s2921_s16 + $0x68] sm:$0xff] %vm658_vm2, %v1655_v56 }
 0x437   : > { %2214 = shalt.err (!%p2211_p7)
}
 0x438   : > { %s2215_s21 = scalar_lea.hbm %s2968_s27, 2048  ;;  %s2219_s15 = scalar_lea.hbm %s3036_s5, 8192 }
 0x439   : > { %p2216_p9 = scmp.ne.s32.totalorder %s2968_s27, %s2215_s21  ;;  %p2220_p12 = scmp.lt.s32.totalorder %s2968_s27, %s3036_s5 }
 0x43a   : > { %p2221_p13 = scmp.lt.s32.totalorder %s2219_s15, %s2215_s21 }
 0x43b   : > { %p2217_p10 = pnand %p2216_p9, %p2382_p3 }
 0x43c   : > { %p2222_p0 = por %p2221_p13, %p2220_p12 }
 0x43d   : > { %p2218_p11 = pneg %p2217_p10 }
 0x43f   : > { %p2223_p1 = pnand %p2222_p0, %p2218_p11 }
 0x441   : > { %2226 = shalt.err (!%p2223_p1)
}
 0x442   : > { %s2299_s26 = smov 128   ;;  %s2300_s8 = smov 8  }
 0x443   : > { %2009 = dma.vmem_to_hbm [thread:$0]  (%p2382_p3), %s2974_s12, 2048, %s2968_s27, %s2980_s30, %s2299_s26, %s2299_s26, %s2300_s8  }
 0x444 PF: > { %p2015_p2 = scmp.ge.s32.totalorder %s2293_s25, 2  ;;  %s1705_s9 = sand.u32 1, %s2265_s18  }
 0x445   : > { %s1706_s10 = scalar_lea.sflag [#allocation6], %s1705_s9 }
 0x446   : > { %p2012_p4 = pnand %p2015_p2, %p2391_p8 }
 0x448   : > { %p2013_p5 = pneg %p2012_p4 }
 0x44a   : > { %2260 = dma.done.wait (%p2013_p5), %s1706_s10, 2048  }
 0x44b   : > { %2262 = vsyncadd (%p2013_p5), %s1706_s10, 4294965248  ;;  %s18_s25 = sadd.s32 1, %s2293_s25   ;;  %s3056_s18 = smov %s2269_s19 }
 0x44c   : > { %p15_p6 = scmp.ge.s32.totalorder %s18_s25, 6   ;;  %s3057_s19 = smov %s2273_s20 }
 0x44d   : > { %s3058_s20 = smov %s2400_s11  ;;  %s3059_s21 = smov %s2285_s23 }
 0x44e   : > { %s3060_s22 = smov %s2289_s24  ;;  %s3061_s23 = smov %s3064_s28 }
 0x44f   : > { %s3062_s24 = smov %s3068_s29  ;;  %17 = sbr.rel (!%p15_p6) target bundleno = 5 (0x5), region = 92 }
 0x454   :  { %1711 = vsyncpa [#allocation6], 1 }
 0x455   :  { %1713 = vsyncpa [#allocation6 + $0x1], 1 }

// kernel: self_attn_forward.4
= control target key start
LH: loop header
LB: loop body
LE: loop exit
PB: predicated region body
PF: predicated region fallthrough
CT: control target
= control target key end

     0   :  { %vm3337_vm0 = vcmask 1041409   ;;  %vm3340_vm1 = vcmask 1042434   ;;  %vm3343_vm2 = vcmask 1043459   ;;  %vm3346_vm3 = vcmask 1044484   ;;  %s7284_s0 = inlined_call_operand.vmem [shape: bf16[16,2,8,2,40], index: 0, kind: input, shape index: {}]   ;;  %s7285_s1 = inlined_call_operand.vmem [shape: bf16[16,8,40], index: 1, kind: output, shape index: {}]  }
   0x1   :  { %v8_v0 = vld [vmem:[%s7284_s0] sm:$0x1]  ;;  %v9_v1 = vld [vmem:[%s7284_s0 + $0x1] sm:$0x1]  ;;  %v16_v2 = vld [vmem:[%s7284_s0 + $0x8] sm:$0x1] }
   0x2   :  { %v17_v3 = vld [vmem:[%s7284_s0 + $0x9] sm:$0x1]  ;;  %v10_v4 = vld [vmem:[%s7284_s0 + $0x2] sm:$0x1]  ;;  %v11_v5 = vld [vmem:[%s7284_s0 + $0x3] sm:$0x1]  ;;  %v3900_v44 = vmax.bf16 %v16_v2, %v8_v0 }
   0x3   :  { %v12_v6 = vld [vmem:[%s7284_s0 + $0x4] sm:$0x1]  ;;  %v13_v7 = vld [vmem:[%s7284_s0 + $0x5] sm:$0x1]  ;;  %v18_v8 = vld [vmem:[%s7284_s0 + $0xa] sm:$0x1]  ;;  %v3902_v45 = vmax.bf16 %v17_v3, %v9_v1 }
   0x4   :  { %v19_v9 = vld [vmem:[%s7284_s0 + $0xb] sm:$0x1]  ;;  %v20_v10 = vld [vmem:[%s7284_s0 + $0xc] sm:$0x1]  ;;  %v21_v11 = vld [vmem:[%s7284_s0 + $0xd] sm:$0x1]  ;;  %v3940_v54 = vmax.bf16 %v18_v8, %v10_v4 }
   0x5   :  { %v14_v12 = vld [vmem:[%s7284_s0 + $0x6] sm:$0x1]  ;;  %v15_v13 = vld [vmem:[%s7284_s0 + $0x7] sm:$0x1]  ;;  %v22_v14 = vld [vmem:[%s7284_s0 + $0xe] sm:$0x1]  ;;  %v3942_v55 = vmax.bf16 %v19_v9, %v11_v5  ;;  %v3944_v56 = vmax.bf16 %v20_v10, %v12_v6  ;;  %v3946_v57 = vmax.bf16 %v21_v11, %v13_v7 }
   0x6   :  { %v23_v15 = vld [vmem:[%s7284_s0 + $0xf] sm:$0x1]  ;;  %v24_v16 = vld [vmem:[%s7284_s0 + $0x10] sm:$0x1]  ;;  %v25_v17 = vld [vmem:[%s7284_s0 + $0x11] sm:$0x1]  ;;  %v3980_v2 = vmax.bf16 %v22_v14, %v14_v12 }
   0x7   :  { %v32_v18 = vld [vmem:[%s7284_s0 + $0x18] sm:$0x1]  ;;  %v33_v19 = vld [vmem:[%s7284_s0 + $0x19] sm:$0x1]  ;;  %v26_v20 = vld [vmem:[%s7284_s0 + $0x12] sm:$0x1]  ;;  %v3982_v3 = vmax.bf16 %v23_v15, %v15_v13 }
   0x8   :  { %v27_v21 = vld [vmem:[%s7284_s0 + $0x13] sm:$0x1]  ;;  %v28_v22 = vld [vmem:[%s7284_s0 + $0x14] sm:$0x1]  ;;  %v29_v23 = vld [vmem:[%s7284_s0 + $0x15] sm:$0x1]  ;;  %v3984_v4 = vmax.bf16 %v32_v18, %v24_v16  ;;  %v3986_v5 = vmax.bf16 %v33_v19, %v25_v17 }
   0x9   :  { %v34_v24 = vld [vmem:[%s7284_s0 + $0x1a] sm:$0x1]  ;;  %v35_v25 = vld [vmem:[%s7284_s0 + $0x1b] sm:$0x1]  ;;  %v36_v26 = vld [vmem:[%s7284_s0 + $0x1c] sm:$0x1] }
   0xa   :  { %v37_v27 = vld [vmem:[%s7284_s0 + $0x1d] sm:$0x1]  ;;  %v30_v28 = vld [vmem:[%s7284_s0 + $0x16] sm:$0x1]  ;;  %v31_v29 = vld [vmem:[%s7284_s0 + $0x17] sm:$0x1]  ;;  %v4018_v12 = vmax.bf16 %v34_v24, %v26_v20  ;;  %v4020_v13 = vmax.bf16 %v35_v25, %v27_v21  ;;  %v4022_v14 = vmax.bf16 %v36_v26, %v28_v22 }
   0xb   :  { %v38_v30 = vld [vmem:[%s7284_s0 + $0x1e] sm:$0x1]  ;;  %v39_v31 = vld [vmem:[%s7284_s0 + $0x1f] sm:$0x1]  ;;  %v40_v32 = vld [vmem:[%s7284_s0 + $0x20] sm:$0x1]  ;;  %v4024_v15 = vmax.bf16 %v37_v27, %v29_v23 }
   0xc   :  { %v41_v33 = vld [vmem:[%s7284_s0 + $0x21] sm:$0x1]  ;;  %v48_v34 = vld [vmem:[%s7284_s0 + $0x28] sm:$0x1]  ;;  %v49_v35 = vld [vmem:[%s7284_s0 + $0x29] sm:$0x1]  ;;  %v4066_v24 = vmax.bf16 %v38_v30, %v30_v28  ;;  %v4068_v25 = vmax.bf16 %v39_v31, %v31_v29 }
   0xd   :  { %v3871_v36 = vld [vmem:[%s7284_s0 + $0x22] sm:$0x1]  ;;  %v3876_v37 = vld [vmem:[%s7284_s0 + $0x23] sm:$0x1]  ;;  %v3881_v38 = vld [vmem:[%s7284_s0 + $0x24] sm:$0x1]  ;;  %v4070_v26 = vmax.bf16 %v48_v34, %v40_v32  ;;  %v4072_v27 = vmax.bf16 %v49_v35, %v41_v33 }
   0xe   :  { %v3886_v39 = vld [vmem:[%s7284_s0 + $0x25] sm:$0x1]  ;;  %v50_v40 = vld [vmem:[%s7284_s0 + $0x2a] sm:$0x1]  ;;  %v51_v41 = vld [vmem:[%s7284_s0 + $0x2b] sm:$0x1] }
   0xf   :  { %v52_v42 = vld [vmem:[%s7284_s0 + $0x2c] sm:$0x1]  ;;  %v53_v43 = vld [vmem:[%s7284_s0 + $0x2d] sm:$0x1]  ;;  %v3907_v46 = vld [vmem:[%s7284_s0 + $0x26] sm:$0x1]  ;;  %v4115_v34 = vmax.bf16 %v50_v40, %v3871_v36  ;;  %v4118_v35 = vmax.bf16 %v51_v41, %v3876_v37 }
  0x10   :  { %v3912_v47 = vld [vmem:[%s7284_s0 + $0x27] sm:$0x1]  ;;  %v3917_v48 = vld [vmem:[%s7284_s0 + $0x2e] sm:$0x1]  ;;  %v3922_v49 = vld [vmem:[%s7284_s0 + $0x2f] sm:$0x1] }
  0x11   :  { %v3927_v50 = vld [vmem:[%s7284_s0 + $0x30] sm:$0x1]  ;;  %v3932_v51 = vld [vmem:[%s7284_s0 + $0x31] sm:$0x1]  ;;  %v64_v52 = vld [vmem:[%s7284_s0 + $0x38] sm:$0x1] }
  0x12   :  { %v65_v53 = vld [vmem:[%s7284_s0 + $0x39] sm:$0x1]  ;;  %v3951_v58 = vld [vmem:[%s7284_s0 + $0x32] sm:$0x1]  ;;  %v3956_v59 = vld [vmem:[%s7284_s0 + $0x33] sm:$0x1] }
  0x13   :  { %v3961_v60 = vld [vmem:[%s7284_s0 + $0x34] sm:$0x1]  ;;  %v3966_v61 = vld [vmem:[%s7284_s0 + $0x35] sm:$0x1]  ;;  %v66_v62 = vld [vmem:[%s7284_s0 + $0x3a] sm:$0x1] }
  0x14   :  { %v67_v63 = vld [vmem:[%s7284_s0 + $0x3b] sm:$0x1]  ;;  %v68_v0 = vld [vmem:[%s7284_s0 + $0x3c] sm:$0x1]  ;;  %v69_v1 = vld [vmem:[%s7284_s0 + $0x3d] sm:$0x1] }
  0x15   :  { %v3991_v6 = vld [vmem:[%s7284_s0 + $0x36] sm:$0x1]  ;;  %v3996_v7 = vld [vmem:[%s7284_s0 + $0x37] sm:$0x1]  ;;  %v4001_v8 = vld [vmem:[%s7284_s0 + $0x3e] sm:$0x1] }
  0x16   :  { %v4006_v9 = vld [vmem:[%s7284_s0 + $0x3f] sm:$0x1]  ;;  %v4011_v10 = vld [vmem:[%s7284_s0 + $0x40] sm:$0x1]  ;;  %v4016_v11 = vld [vmem:[%s7284_s0 + $0x48] sm:$0x1] }
  0x17   :  { %7486 = vst [vmem:[#allocation2_spill] sm:$0xff] %v4020_v13  ;;  %7487 = vst [vmem:[#allocation3_spill] sm:$0xff] %v4022_v14  ;;  %v4029_v16 = vld [vmem:[%s7284_s0 + $0x41] sm:$0x1]  ;;  %v4034_v17 = vld [vmem:[%s7284_s0 + $0x42] sm:$0x1] }
  0x18   :  { %7488 = vst [vmem:[#allocation4_spill] sm:$0xff] %v4024_v15  ;;  %v4039_v18 = vld [vmem:[%s7284_s0 + $0x43] sm:$0x1]  ;;  %v4044_v19 = vld [vmem:[%s7284_s0 + $0x44] sm:$0x1]  ;;  %7489 = vst [vmem:[#allocation5_spill] sm:$0xff] %v4066_v24 }
  0x19   :  { %v4049_v20 = vld [vmem:[%s7284_s0 + $0x49] sm:$0x1]  ;;  %v4054_v21 = vld [vmem:[%s7284_s0 + $0x4a] sm:$0x1]  ;;  %v4059_v22 = vld [vmem:[%s7284_s0 + $0x4b] sm:$0x1] }
  0x1a   :  { %v4064_v23 = vld [vmem:[%s7284_s0 + $0x4c] sm:$0x1]  ;;  %7490 = vst [vmem:[#allocation6_spill] sm:$0xff] %v4068_v25  ;;  %7491 = vst [vmem:[#allocation7_spill] sm:$0xff] %v4070_v26  ;;  %v4077_v15 = vld [vmem:[%s7284_s0 + $0x45] sm:$0x1]  ;;  %v4124_v26 = vmax.bf16 %v53_v43, %v3886_v39  ;;  %v4172_v43 = vmax.bf16 %v3922_v49, %v3912_v47 }
  0x1b   :  { %7492 = vst [vmem:[#allocation8_spill] sm:$0xff] %v4072_v27  ;;  %v4082_v14 = vld [vmem:[%s7284_s0 + $0x46] sm:$0x1]  ;;  %v4087_v28 = vld [vmem:[%s7284_s0 + $0x47] sm:$0x1]  ;;  %7493 = vst [vmem:[#allocation9_spill] sm:$0xff] %v4115_v34  ;;  %v4121_v27 = vmax.bf16 %v52_v42, %v3881_v38  ;;  %v4168_v42 = vmax.bf16 %v3917_v48, %v3907_v46 }
  0x1c   :  { %v4092_v29 = vld [vmem:[%s7284_s0 + $0x4d] sm:$0x1]  ;;  %v4097_v30 = vld [vmem:[%s7284_s0 + $0x4e] sm:$0x1]  ;;  %v4102_v31 = vld [vmem:[%s7284_s0 + $0x4f] sm:$0x1] }
  0x1d   :  { %v4107_v32 = vld [vmem:[%s7284_s0 + $0x50] sm:$0x1]  ;;  %v4112_v33 = vld [vmem:[%s7284_s0 + $0x58] sm:$0x1]  ;;  %7494 = vst [vmem:[#allocation10_spill] sm:$0xff] %v4118_v35  ;;  %7495 = vst [vmem:[#allocation11_spill] sm:$0xff] %v4121_v27  ;;  %v4178_v27 = vmax.bf16 %v65_v53, %v3932_v51  ;;  %v4221_v53 = vmax.bf16 %v66_v62, %v3951_v58 }
  0x1e   :  { %7496 = vst [vmem:[#allocation12_spill] sm:$0xff] %v4124_v26  ;;  %v4129_v25 = vld [vmem:[%s7284_s0 + $0x51] sm:$0x1]  ;;  %v4134_v24 = vld [vmem:[%s7284_s0 + $0x52] sm:$0x1]  ;;  %7497 = vst [vmem:[#allocation13_spill] sm:$0xff] %v4168_v42  ;;  %v4175_v26 = vmax.bf16 %v64_v52, %v3927_v50 }
  0x1f   :  { %v4139_v36 = vld [vmem:[%s7284_s0 + $0x53] sm:$0x1]  ;;  %v4144_v37 = vld [vmem:[%s7284_s0 + $0x54] sm:$0x1]  ;;  %v4149_v38 = vld [vmem:[%s7284_s0 + $0x59] sm:$0x1] }
  0x20   :  { %v4154_v39 = vld [vmem:[%s7284_s0 + $0x5a] sm:$0x1]  ;;  %v4159_v40 = vld [vmem:[%s7284_s0 + $0x5b] sm:$0x1]  ;;  %v4164_v41 = vld [vmem:[%s7284_s0 + $0x5c] sm:$0x1] }
  0x21   :  { %7498 = vst [vmem:[#allocation14_spill] sm:$0xff] %v4172_v43  ;;  %7499 = vst [vmem:[#allocation15_spill] sm:$0xff] %v4175_v26  ;;  %v4183_v35 = vld [vmem:[%s7284_s0 + $0x55] sm:$0x1]  ;;  %v4188_v46 = vld [vmem:[%s7284_s0 + $0x56] sm:$0x1]  ;;  %v4227_v26 = vmax.bf16 %v68_v0, %v3961_v60  ;;  %v4230_v43 = vmax.bf16 %v69_v1, %v3966_v61  ;;  %v4274_v0 = vmax.bf16 %v4001_v8, %v3991_v6 }
  0x22   :  { %7500 = vst [vmem:[#allocation16_spill] sm:$0xff] %v4178_v27  ;;  %v4193_v47 = vld [vmem:[%s7284_s0 + $0x57] sm:$0x1]  ;;  %v4198_v48 = vld [vmem:[%s7284_s0 + $0x5d] sm:$0x1]  ;;  %7501 = vst [vmem:[#allocation17_spill] sm:$0xff] %v4221_v53  ;;  %v4224_v27 = vmax.bf16 %v67_v63, %v3956_v59  ;;  %v4278_v1 = vmax.bf16 %v4006_v9, %v3996_v7 }
  0x23   :  { %v4203_v49 = vld [vmem:[%s7284_s0 + $0x5e] sm:$0x1]  ;;  %v4208_v50 = vld [vmem:[%s7284_s0 + $0x5f] sm:$0x1]  ;;  %v4213_v51 = vld [vmem:[%s7284_s0 + $0x60] sm:$0x1] }
  0x24   :  { %v4218_v52 = vld [vmem:[%s7284_s0 + $0x68] sm:$0x1]  ;;  %7502 = vst [vmem:[#allocation18_spill] sm:$0xff] %v4224_v27  ;;  %7503 = vst [vmem:[#allocation19_spill] sm:$0xff] %v4227_v26  ;;  %v4235_v42 = vld [vmem:[%s7284_s0 + $0x61] sm:$0x1]  ;;  %v4326_v26 = vmax.bf16 %v4049_v20, %v4029_v16 }
  0x25   :  { %7504 = vst [vmem:[#allocation20_spill] sm:$0xff] %v4230_v43  ;;  %v4240_v34 = vld [vmem:[%s7284_s0 + $0x62] sm:$0x1]  ;;  %v4245_v58 = vld [vmem:[%s7284_s0 + $0x63] sm:$0x1]  ;;  %7505 = vst [vmem:[#allocation21_spill] sm:$0xff] %v4274_v0  ;;  %v4282_v43 = vmax.bf16 %v4016_v11, %v4011_v10  ;;  %v4338_v0 = vmax.bf16 %v4064_v23, %v4044_v19  ;;  %v4382_v23 = vmax.bf16 %v4092_v29, %v4077_v15 }
  0x26   :  { %v4250_v59 = vld [vmem:[%s7284_s0 + $0x64] sm:$0x1]  ;;  %v4255_v60 = vld [vmem:[%s7284_s0 + $0x69] sm:$0x1]  ;;  %v4260_v61 = vld [vmem:[%s7284_s0 + $0x6a] sm:$0x1] }
  0x27   :  { %v4265_v62 = vld [vmem:[%s7284_s0 + $0x6b] sm:$0x1]  ;;  %v4270_v63 = vld [vmem:[%s7284_s0 + $0x6c] sm:$0x1]  ;;  %7506 = vst [vmem:[#allocation22_spill] sm:$0xff] %v4278_v1  ;;  %7507 = vst [vmem:[#allocation23_spill] sm:$0xff] %v4282_v43  ;;  %v4330_v43 = vmax.bf16 %v4054_v21, %v4034_v17  ;;  %v4334_v1 = vmax.bf16 %v4059_v22, %v4039_v18 }
  0x28   :  { %v4287_v27 = vld [vmem:[%s7284_s0 + $0x65] sm:$0x1]  ;;  %v4292_v53 = vld [vmem:[%s7284_s0 + $0x66] sm:$0x1]  ;;  %v4297_v6 = vld [vmem:[%s7284_s0 + $0x67] sm:$0x1] }
  0x29   :  { %v4302_v7 = vld [vmem:[%s7284_s0 + $0x6d] sm:$0x1]  ;;  %v4307_v8 = vld [vmem:[%s7284_s0 + $0x6e] sm:$0x1]  ;;  %v4312_v9 = vld [vmem:[%s7284_s0 + $0x6f] sm:$0x1] }
  0x2a   :  { %v4317_v10 = vld [vmem:[%s7284_s0 + $0x70] sm:$0x1]  ;;  %v4322_v11 = vld [vmem:[%s7284_s0 + $0x78] sm:$0x1]  ;;  %7508 = vst [vmem:[#allocation24_spill] sm:$0xff] %v4326_v26  ;;  %7509 = vst [vmem:[#allocation25_spill] sm:$0xff] %v4330_v43  ;;  %v4394_v43 = vmax.bf16 %v4112_v33, %v4107_v32  ;;  %v4438_v33 = vmax.bf16 %v4149_v38, %v4129_v25 }
  0x2b   :  { %7510 = vst [vmem:[#allocation26_spill] sm:$0xff] %v4334_v1  ;;  %7511 = vst [vmem:[#allocation27_spill] sm:$0xff] %v4338_v0  ;;  %v4343_v13 = vld [vmem:[%s7284_s0 + $0x71] sm:$0x1]  ;;  %v4348_v16 = vld [vmem:[%s7284_s0 + $0x72] sm:$0x1]  ;;  %v4386_v0 = vmax.bf16 %v4097_v30, %v4082_v14  ;;  %v4390_v1 = vmax.bf16 %v4102_v31, %v4087_v28 }
  0x2c   :  { %v4353_v17 = vld [vmem:[%s7284_s0 + $0x73] sm:$0x1]  ;;  %v4358_v18 = vld [vmem:[%s7284_s0 + $0x74] sm:$0x1]  ;;  %v4363_v19 = vld [vmem:[%s7284_s0 + $0x79] sm:$0x1] }
  0x2d   :  { %v4368_v20 = vld [vmem:[%s7284_s0 + $0x7a] sm:$0x1]  ;;  %v4373_v21 = vld [vmem:[%s7284_s0 + $0x7b] sm:$0x1]  ;;  %v4378_v22 = vld [vmem:[%s7284_s0 + $0x7c] sm:$0x1] }
  0x2e   :  { %7512 = vst [vmem:[#allocation28_spill] sm:$0xff] %v4382_v23  ;;  %7513 = vst [vmem:[#allocation29_spill] sm:$0xff] %v4386_v0  ;;  %v4399_v26 = vld [vmem:[%s7284_s0 + $0x75] sm:$0x1]  ;;  %v4404_v15 = vld [vmem:[%s7284_s0 + $0x76] sm:$0x1]  ;;  %v4450_v0 = vmax.bf16 %v4164_v41, %v4144_v37  ;;  %v4494_v41 = vmax.bf16 %v4198_v48, %v4183_v35 }
  0x2f   :  { %7514 = vst [vmem:[#allocation30_spill] sm:$0xff] %v4390_v1  ;;  %7515 = vst [vmem:[#allocation31_spill] sm:$0xff] %v4394_v43  ;;  %v4409_v14 = vld [vmem:[%s7284_s0 + $0x77] sm:$0x1]  ;;  %v4414_v28 = vld [vmem:[%s7284_s0 + $0x7d] sm:$0x1]  ;;  %v4442_v43 = vmax.bf16 %v4154_v39, %v4134_v24  ;;  %v4446_v1 = vmax.bf16 %v4159_v40, %v4139_v36 }
  0x30   :  { %v4419_v29 = vld [vmem:[%s7284_s0 + $0x7e] sm:$0x1]  ;;  %v4424_v30 = vld [vmem:[%s7284_s0 + $0x7f] sm:$0x1]  ;;  %v4429_v31 = vld [vmem:[%s7284_s0 + $0x80] sm:$0x1] }
  0x31   :  { %v4434_v32 = vld [vmem:[%s7284_s0 + $0x88] sm:$0x1]  ;;  %7516 = vst [vmem:[#allocation32_spill] sm:$0xff] %v4438_v33  ;;  %7517 = vst [vmem:[#allocation33_spill] sm:$0xff] %v4442_v43  ;;  %v4455_v23 = vld [vmem:[%s7284_s0 + $0x81] sm:$0x1]  ;;  %v4506_v43 = vmax.bf16 %v4218_v52, %v4213_v51  ;;  %v4550_v52 = vmax.bf16 %v4255_v60, %v4235_v42 }
  0x32   :  { %7518 = vst [vmem:[#allocation34_spill] sm:$0xff] %v4446_v1  ;;  %7519 = vst [vmem:[#allocation35_spill] sm:$0xff] %v4450_v0  ;;  %v4460_v25 = vld [vmem:[%s7284_s0 + $0x82] sm:$0x1]  ;;  %v4465_v24 = vld [vmem:[%s7284_s0 + $0x83] sm:$0x1]  ;;  %v4498_v0 = vmax.bf16 %v4203_v49, %v4188_v46  ;;  %v4502_v1 = vmax.bf16 %v4208_v50, %v4193_v47 }
  0x33   :  { %v4470_v36 = vld [vmem:[%s7284_s0 + $0x84] sm:$0x1]  ;;  %v4475_v37 = vld [vmem:[%s7284_s0 + $0x89] sm:$0x1]  ;;  %v4480_v38 = vld [vmem:[%s7284_s0 + $0x8a] sm:$0x1] }
  0x34   :  { %v4485_v39 = vld [vmem:[%s7284_s0 + $0x8b] sm:$0x1]  ;;  %v4490_v40 = vld [vmem:[%s7284_s0 + $0x8c] sm:$0x1]  ;;  %7520 = vst [vmem:[#allocation36_spill] sm:$0xff] %v4494_v41  ;;  %7521 = vst [vmem:[#allocation37_spill] sm:$0xff] %v4498_v0  ;;  %v4562_v0 = vmax.bf16 %v4270_v63, %v4250_v59  ;;  %v4606_v63 = vmax.bf16 %v4302_v7, %v4287_v27 }
  0x35   :  { %7522 = vst [vmem:[#allocation38_spill] sm:$0xff] %v4502_v1  ;;  %7523 = vst [vmem:[#allocation39_spill] sm:$0xff] %v4506_v43  ;;  %v4511_v33 = vld [vmem:[%s7284_s0 + $0x85] sm:$0x1]  ;;  %v4516_v35 = vld [vmem:[%s7284_s0 + $0x86] sm:$0x1]  ;;  %v4554_v43 = vmax.bf16 %v4260_v61, %v4240_v34  ;;  %v4558_v1 = vmax.bf16 %v4265_v62, %v4245_v58 }
  0x36   :  { %v4521_v46 = vld [vmem:[%s7284_s0 + $0x87] sm:$0x1]  ;;  %v4526_v47 = vld [vmem:[%s7284_s0 + $0x8d] sm:$0x1]  ;;  %v4531_v48 = vld [vmem:[%s7284_s0 + $0x8e] sm:$0x1] }
  0x37   :  { %v4536_v49 = vld [vmem:[%s7284_s0 + $0x8f] sm:$0x1]  ;;  %v4541_v50 = vld [vmem:[%s7284_s0 + $0x90] sm:$0x1]  ;;  %v4546_v51 = vld [vmem:[%s7284_s0 + $0x98] sm:$0x1] }
  0x38   :  { %7524 = vst [vmem:[#allocation40_spill] sm:$0xff] %v4550_v52  ;;  %7525 = vst [vmem:[#allocation41_spill] sm:$0xff] %v4554_v43  ;;  %v4567_v41 = vld [vmem:[%s7284_s0 + $0x91] sm:$0x1]  ;;  %v4572_v42 = vld [vmem:[%s7284_s0 + $0x92] sm:$0x1]  ;;  %v4618_v43 = vmax.bf16 %v4322_v11, %v4317_v10  ;;  %v4662_v11 = vmax.bf16 %v4363_v19, %v4343_v13 }
  0x39   :  { %7526 = vst [vmem:[#allocation42_spill] sm:$0xff] %v4558_v1  ;;  %7527 = vst [vmem:[#allocation43_spill] sm:$0xff] %v4562_v0  ;;  %v4577_v34 = vld [vmem:[%s7284_s0 + $0x93] sm:$0x1]  ;;  %v4582_v58 = vld [vmem:[%s7284_s0 + $0x94] sm:$0x1]  ;;  %v4610_v0 = vmax.bf16 %v4307_v8, %v4292_v53  ;;  %v4614_v1 = vmax.bf16 %v4312_v9, %v4297_v6 }
  0x3a   :  { %v4587_v59 = vld [vmem:[%s7284_s0 + $0x99] sm:$0x1]  ;;  %v4592_v60 = vld [vmem:[%s7284_s0 + $0x9a] sm:$0x1]  ;;  %v4597_v61 = vld [vmem:[%s7284_s0 + $0x9b] sm:$0x1] }
  0x3b   :  { %v4602_v62 = vld [vmem:[%s7284_s0 + $0x9c] sm:$0x1]  ;;  %7528 = vst [vmem:[#allocation44_spill] sm:$0xff] %v4606_v63  ;;  %7529 = vst [vmem:[#allocation45_spill] sm:$0xff] %v4610_v0  ;;  %v4623_v52 = vld [vmem:[%s7284_s0 + $0x95] sm:$0x1]  ;;  %v4674_v0 = vmax.bf16 %v4378_v22, %v4358_v18  ;;  %v4718_v22 = vmax.bf16 %v4414_v28, %v4399_v26 }
  0x3c   :  { %7530 = vst [vmem:[#allocation46_spill] sm:$0xff] %v4614_v1  ;;  %7531 = vst [vmem:[#allocation47_spill] sm:$0xff] %v4618_v43  ;;  %v4628_v27 = vld [vmem:[%s7284_s0 + $0x96] sm:$0x1]  ;;  %v4633_v53 = vld [vmem:[%s7284_s0 + $0x97] sm:$0x1]  ;;  %v4666_v43 = vmax.bf16 %v4368_v20, %v4348_v16  ;;  %v4670_v1 = vmax.bf16 %v4373_v21, %v4353_v17 }
  0x3d   :  { %v4638_v6 = vld [vmem:[%s7284_s0 + $0x9d] sm:$0x1]  ;;  %v4643_v7 = vld [vmem:[%s7284_s0 + $0x9e] sm:$0x1]  ;;  %v4648_v8 = vld [vmem:[%s7284_s0 + $0x9f] sm:$0x1] }
  0x3e   :  { %v4653_v9 = vld [vmem:[%s7284_s0 + $0xa0] sm:$0x1]  ;;  %v4658_v10 = vld [vmem:[%s7284_s0 + $0xa8] sm:$0x1]  ;;  %7532 = vst [vmem:[#allocation48_spill] sm:$0xff] %v4662_v11  ;;  %7533 = vst [vmem:[#allocation49_spill] sm:$0xff] %v4666_v43  ;;  %v4730_v43 = vmax.bf16 %v4434_v32, %v4429_v31  ;;  %v4774_v32 = vmax.bf16 %v4475_v37, %v4455_v23 }
  0x3f   :  { %7534 = vst [vmem:[#allocation50_spill] sm:$0xff] %v4670_v1  ;;  %7535 = vst [vmem:[#allocation51_spill] sm:$0xff] %v4674_v0  ;;  %v4679_v63 = vld [vmem:[%s7284_s0 + $0xa1] sm:$0x1]  ;;  %v4684_v13 = vld [vmem:[%s7284_s0 + $0xa2] sm:$0x1]  ;;  %v4722_v0 = vmax.bf16 %v4419_v29, %v4404_v15  ;;  %v4726_v1 = vmax.bf16 %v4424_v30, %v4409_v14 }
  0x40   :  { %v4689_v16 = vld [vmem:[%s7284_s0 + $0xa3] sm:$0x1]  ;;  %v4694_v17 = vld [vmem:[%s7284_s0 + $0xa4] sm:$0x1]  ;;  %v4699_v18 = vld [vmem:[%s7284_s0 + $0xa9] sm:$0x1] }
  0x41   :  { %v4704_v19 = vld [vmem:[%s7284_s0 + $0xaa] sm:$0x1]  ;;  %v4709_v20 = vld [vmem:[%s7284_s0 + $0xab] sm:$0x1]  ;;  %v4714_v21 = vld [vmem:[%s7284_s0 + $0xac] sm:$0x1] }
  0x42   :  { %7536 = vst [vmem:[#allocation52_spill] sm:$0xff] %v4718_v22  ;;  %7537 = vst [vmem:[#allocation53_spill] sm:$0xff] %v4722_v0  ;;  %v4735_v11 = vld [vmem:[%s7284_s0 + $0xa5] sm:$0x1]  ;;  %v4740_v26 = vld [vmem:[%s7284_s0 + $0xa6] sm:$0x1]  ;;  %v4786_v0 = vmax.bf16 %v4490_v40, %v4470_v36  ;;  %v4830_v40 = vmax.bf16 %v4526_v47, %v4511_v33 }
  0x43   :  { %7538 = vst [vmem:[#allocation54_spill] sm:$0xff] %v4726_v1  ;;  %7539 = vst [vmem:[#allocation55_spill] sm:$0xff] %v4730_v43  ;;  %v4745_v15 = vld [vmem:[%s7284_s0 + $0xa7] sm:$0x1]  ;;  %v4750_v14 = vld [vmem:[%s7284_s0 + $0xad] sm:$0x1]  ;;  %v4778_v43 = vmax.bf16 %v4480_v38, %v4460_v25  ;;  %v4782_v1 = vmax.bf16 %v4485_v39, %v4465_v24 }
  0x44   :  { %v4755_v28 = vld [vmem:[%s7284_s0 + $0xae] sm:$0x1]  ;;  %v4760_v29 = vld [vmem:[%s7284_s0 + $0xaf] sm:$0x1]  ;;  %v4765_v30 = vld [vmem:[%s7284_s0 + $0xb0] sm:$0x1] }
  0x45   :  { %v4770_v31 = vld [vmem:[%s7284_s0 + $0xb8] sm:$0x1]  ;;  %7540 = vst [vmem:[#allocation56_spill] sm:$0xff] %v4774_v32  ;;  %7541 = vst [vmem:[#allocation57_spill] sm:$0xff] %v4778_v43  ;;  %v4791_v22 = vld [vmem:[%s7284_s0 + $0xb1] sm:$0x1]  ;;  %v4842_v43 = vmax.bf16 %v4546_v51, %v4541_v50  ;;  %v4886_v51 = vmax.bf16 %v4587_v59, %v4567_v41 }
  0x46   :  { %7542 = vst [vmem:[#allocation58_spill] sm:$0xff] %v4782_v1  ;;  %7543 = vst [vmem:[#allocation59_spill] sm:$0xff] %v4786_v0  ;;  %v4796_v23 = vld [vmem:[%s7284_s0 + $0xb2] sm:$0x1]  ;;  %v4801_v25 = vld [vmem:[%s7284_s0 + $0xb3] sm:$0x1]  ;;  %v4834_v0 = vmax.bf16 %v4531_v48, %v4516_v35  ;;  %v4838_v1 = vmax.bf16 %v4536_v49, %v4521_v46 }
  0x47   :  { %v4806_v24 = vld [vmem:[%s7284_s0 + $0xb4] sm:$0x1]  ;;  %v4811_v36 = vld [vmem:[%s7284_s0 + $0xb9] sm:$0x1]  ;;  %v4816_v37 = vld [vmem:[%s7284_s0 + $0xba] sm:$0x1] }
  0x48   :  { %v4821_v38 = vld [vmem:[%s7284_s0 + $0xbb] sm:$0x1]  ;;  %v4826_v39 = vld [vmem:[%s7284_s0 + $0xbc] sm:$0x1]  ;;  %7544 = vst [vmem:[#allocation60_spill] sm:$0xff] %v4830_v40  ;;  %7545 = vst [vmem:[#allocation61_spill] sm:$0xff] %v4834_v0  ;;  %v4898_v0 = vmax.bf16 %v4602_v62, %v4582_v58  ;;  %v4942_v62 = vmax.bf16 %v4638_v6, %v4623_v52 }
  0x49   :  { %7546 = vst [vmem:[#allocation62_spill] sm:$0xff] %v4838_v1  ;;  %7547 = vst [vmem:[#allocation63_spill] sm:$0xff] %v4842_v43  ;;  %v4847_v32 = vld [vmem:[%s7284_s0 + $0xb5] sm:$0x1]  ;;  %v4852_v33 = vld [vmem:[%s7284_s0 + $0xb6] sm:$0x1]  ;;  %v4890_v43 = vmax.bf16 %v4592_v60, %v4572_v42  ;;  %v4894_v1 = vmax.bf16 %v4597_v61, %v4577_v34 }
  0x4a   :  { %v4857_v35 = vld [vmem:[%s7284_s0 + $0xb7] sm:$0x1]  ;;  %v4862_v46 = vld [vmem:[%s7284_s0 + $0xbd] sm:$0x1]  ;;  %v4867_v47 = vld [vmem:[%s7284_s0 + $0xbe] sm:$0x1] }
  0x4b   :  { %v4872_v48 = vld [vmem:[%s7284_s0 + $0xbf] sm:$0x1]  ;;  %v4877_v49 = vld [vmem:[%s7284_s0 + $0xc0] sm:$0x1]  ;;  %v4882_v50 = vld [vmem:[%s7284_s0 + $0xc8] sm:$0x1] }
  0x4c   :  { %7548 = vst [vmem:[#allocation64_spill] sm:$0xff] %v4886_v51  ;;  %7549 = vst [vmem:[#allocation65_spill] sm:$0xff] %v4890_v43  ;;  %v4903_v40 = vld [vmem:[%s7284_s0 + $0xc1] sm:$0x1]  ;;  %v4908_v41 = vld [vmem:[%s7284_s0 + $0xc2] sm:$0x1]  ;;  %v4954_v43 = vmax.bf16 %v4658_v10, %v4653_v9  ;;  %v4988_v10 = vmax.bf16 %v4699_v18, %v4679_v63 }
  0x4d   :  { %7550 = vst [vmem:[#allocation66_spill] sm:$0xff] %v4894_v1  ;;  %7551 = vst [vmem:[#allocation67_spill] sm:$0xff] %v4898_v0  ;;  %v4913_v42 = vld [vmem:[%s7284_s0 + $0xc3] sm:$0x1]  ;;  %v4918_v34 = vld [vmem:[%s7284_s0 + $0xc4] sm:$0x1]  ;;  %v4946_v0 = vmax.bf16 %v4643_v7, %v4628_v27  ;;  %v4950_v1 = vmax.bf16 %v4648_v8, %v4633_v53 }
  0x4e   :  { %v4923_v58 = vld [vmem:[%s7284_s0 + $0xc9] sm:$0x1]  ;;  %v4928_v59 = vld [vmem:[%s7284_s0 + $0xca] sm:$0x1]  ;;  %v4933_v60 = vld [vmem:[%s7284_s0 + $0xcb] sm:$0x1] }
  0x4f   :  { %v4938_v61 = vld [vmem:[%s7284_s0 + $0xcc] sm:$0x1]  ;;  %7552 = vst [vmem:[#allocation68_spill] sm:$0xff] %v4942_v62  ;;  %7553 = vst [vmem:[#allocation69_spill] sm:$0xff] %v4946_v0  ;;  %v4959_v51 = vld [vmem:[%s7284_s0 + $0xc5] sm:$0x1]  ;;  %v5000_v0 = vmax.bf16 %v4714_v21, %v4694_v17  ;;  %v5028_v21 = vmax.bf16 %v4750_v14, %v4735_v11 }
  0x50   :  { %7554 = vst [vmem:[#allocation70_spill] sm:$0xff] %v4950_v1  ;;  %7555 = vst [vmem:[#allocation71_spill] sm:$0xff] %v4954_v43  ;;  %v4964_v52 = vld [vmem:[%s7284_s0 + $0xc6] sm:$0x1]  ;;  %v4969_v27 = vld [vmem:[%s7284_s0 + $0xc7] sm:$0x1]  ;;  %v4992_v43 = vmax.bf16 %v4704_v19, %v4684_v13  ;;  %v4996_v1 = vmax.bf16 %v4709_v20, %v4689_v16 }
  0x51   :  { %v213_v53 = vld [vmem:[%s7284_s0 + $0xcd] sm:$0x1]  ;;  %v214_v6 = vld [vmem:[%s7284_s0 + $0xce] sm:$0x1]  ;;  %v215_v7 = vld [vmem:[%s7284_s0 + $0xcf] sm:$0x1] }
  0x52   :  { %v216_v8 = vld [vmem:[%s7284_s0 + $0xd0] sm:$0x1]  ;;  %v224_v9 = vld [vmem:[%s7284_s0 + $0xd8] sm:$0x1]  ;;  %7556 = vst [vmem:[#allocation72_spill] sm:$0xff] %v4988_v10  ;;  %7557 = vst [vmem:[#allocation73_spill] sm:$0xff] %v4992_v43  ;;  %v5040_v43 = vmax.bf16 %v4770_v31, %v4765_v30  ;;  %v5068_v31 = vmax.bf16 %v4811_v36, %v4791_v22 }
  0x53   :  { %7558 = vst [vmem:[#allocation74_spill] sm:$0xff] %v4996_v1  ;;  %7559 = vst [vmem:[#allocation75_spill] sm:$0xff] %v5000_v0  ;;  %v217_v62 = vld [vmem:[%s7284_s0 + $0xd1] sm:$0x1]  ;;  %v218_v63 = vld [vmem:[%s7284_s0 + $0xd2] sm:$0x1]  ;;  %v5032_v0 = vmax.bf16 %v4755_v28, %v4740_v26  ;;  %v5036_v1 = vmax.bf16 %v4760_v29, %v4745_v15 }
  0x54   :  { %v219_v13 = vld [vmem:[%s7284_s0 + $0xd3] sm:$0x1]  ;;  %v220_v16 = vld [vmem:[%s7284_s0 + $0xd4] sm:$0x1]  ;;  %v225_v17 = vld [vmem:[%s7284_s0 + $0xd9] sm:$0x1] }
  0x55   :  { %v226_v18 = vld [vmem:[%s7284_s0 + $0xda] sm:$0x1]  ;;  %v227_v19 = vld [vmem:[%s7284_s0 + $0xdb] sm:$0x1]  ;;  %v228_v20 = vld [vmem:[%s7284_s0 + $0xdc] sm:$0x1] }
  0x56   :  { %7560 = vst [vmem:[#allocation76_spill] sm:$0xff] %v5028_v21  ;;  %7561 = vst [vmem:[#allocation77_spill] sm:$0xff] %v5032_v0  ;;  %v221_v10 = vld [vmem:[%s7284_s0 + $0xd5] sm:$0x1]  ;;  %v222_v11 = vld [vmem:[%s7284_s0 + $0xd6] sm:$0x1]  ;;  %v5080_v0 = vmax.bf16 %v4826_v39, %v4806_v24  ;;  %v5108_v39 = vmax.bf16 %v4862_v46, %v4847_v32 }
  0x57   :  { %7562 = vst [vmem:[#allocation78_spill] sm:$0xff] %v5036_v1  ;;  %7563 = vst [vmem:[#allocation79_spill] sm:$0xff] %v5040_v43  ;;  %v223_v26 = vld [vmem:[%s7284_s0 + $0xd7] sm:$0x1]  ;;  %v229_v15 = vld [vmem:[%s7284_s0 + $0xdd] sm:$0x1]  ;;  %v5072_v43 = vmax.bf16 %v4816_v37, %v4796_v23  ;;  %v5076_v1 = vmax.bf16 %v4821_v38, %v4801_v25 }
  0x58   :  { %v230_v14 = vld [vmem:[%s7284_s0 + $0xde] sm:$0x1]  ;;  %v231_v28 = vld [vmem:[%s7284_s0 + $0xdf] sm:$0x1]  ;;  %v232_v29 = vld [vmem:[%s7284_s0 + $0xe0] sm:$0x1] }
  0x59   :  { %v240_v30 = vld [vmem:[%s7284_s0 + $0xe8] sm:$0x1]  ;;  %7564 = vst [vmem:[#allocation80_spill] sm:$0xff] %v5068_v31  ;;  %7565 = vst [vmem:[#allocation81_spill] sm:$0xff] %v5072_v43  ;;  %v233_v21 = vld [vmem:[%s7284_s0 + $0xe1] sm:$0x1]  ;;  %v5120_v43 = vmax.bf16 %v4882_v50, %v4877_v49  ;;  %v5145_v49 = vmax.bf16 %v4923_v58, %v4903_v40  ;;  %v5149_v50 = vmax.bf16 %v4928_v59, %v4908_v41 }
  0x5a   :  { %7566 = vst [vmem:[#allocation82_spill] sm:$0xff] %v5076_v1  ;;  %7567 = vst [vmem:[#allocation83_spill] sm:$0xff] %v5080_v0  ;;  %v234_v22 = vld [vmem:[%s7284_s0 + $0xe2] sm:$0x1]  ;;  %v235_v23 = vld [vmem:[%s7284_s0 + $0xe3] sm:$0x1]  ;;  %v5112_v0 = vmax.bf16 %v4867_v47, %v4852_v33  ;;  %v5116_v1 = vmax.bf16 %v4872_v48, %v4857_v35  ;;  %v5172_v58 = vmax.bf16 %v213_v53, %v4959_v51 }
  0x5b   :  { %v236_v25 = vld [vmem:[%s7284_s0 + $0xe4] sm:$0x1]  ;;  %v241_v24 = vld [vmem:[%s7284_s0 + $0xe9] sm:$0x1]  ;;  %v242_v36 = vld [vmem:[%s7284_s0 + $0xea] sm:$0x1]  ;;  %v5178_v59 = vmax.bf16 %v215_v7, %v4969_v27  ;;  %v5197_v53 = vmax.bf16 %v225_v17, %v217_v62  ;;  %v5201_v7 = vmax.bf16 %v227_v19, %v219_v13  ;;  %v5214_v62 = vmax.bf16 %v229_v15, %v221_v10 }
  0x5c   :  { %v243_v37 = vld [vmem:[%s7284_s0 + $0xeb] sm:$0x1]  ;;  %v244_v38 = vld [vmem:[%s7284_s0 + $0xec] sm:$0x1]  ;;  %7568 = vst [vmem:[#allocation84_spill] sm:$0xff] %v5108_v39  ;;  %7569 = vst [vmem:[#allocation85_spill] sm:$0xff] %v5112_v0  ;;  %v5218_v13 = vmax.bf16 %v231_v28, %v223_v26  ;;  %v5231_v10 = vmax.bf16 %v241_v24, %v233_v21 }
  0x5d   :  { %7570 = vst [vmem:[#allocation86_spill] sm:$0xff] %v5116_v1  ;;  %7571 = vst [vmem:[#allocation87_spill] sm:$0xff] %v5120_v43  ;;  %v237_v31 = vld [vmem:[%s7284_s0 + $0xe5] sm:$0x1]  ;;  %v238_v32 = vld [vmem:[%s7284_s0 + $0xe6] sm:$0x1]  ;;  %v5153_v43 = vmax.bf16 %v4933_v60, %v4913_v42  ;;  %v5157_v1 = vmax.bf16 %v4938_v61, %v4918_v34  ;;  %v5175_v34 = vmax.bf16 %v214_v6, %v4964_v52 }
  0x5e   :  { %v239_v33 = vld [vmem:[%s7284_s0 + $0xe7] sm:$0x1]  ;;  %v245_v35 = vld [vmem:[%s7284_s0 + $0xed] sm:$0x1]  ;;  %v246_v46 = vld [vmem:[%s7284_s0 + $0xee] sm:$0x1]  ;;  %v5180_v60 = vmax.bf16 %v224_v9, %v216_v8  ;;  %v5199_v6 = vmax.bf16 %v226_v18, %v218_v63  ;;  %v5203_v8 = vmax.bf16 %v228_v20, %v220_v16  ;;  %v5216_v63 = vmax.bf16 %v230_v14, %v222_v11 }
  0x5f   :  { %v247_v47 = vld [vmem:[%s7284_s0 + $0xef] sm:$0x1]  ;;  %v248_v48 = vld [vmem:[%s7284_s0 + $0xf0] sm:$0x1]  ;;  %7572 = vst [vmem:[#allocation88_spill] sm:$0xff] %v5157_v1  ;;  %7573 = vst [vmem:[#allocation89_spill] sm:$0xff] %v5172_v58  ;;  %v5220_v16 = vmax.bf16 %v240_v30, %v232_v29  ;;  %v5233_v20 = vmax.bf16 %v242_v36, %v234_v22  ;;  %v5235_v11 = vmax.bf16 %v243_v37, %v235_v23 }
  0x60   :  { %v249_v0 = vld [vmem:[%s7284_s0 + $0xf1] sm:$0x1]  ;;  %v250_v40 = vld [vmem:[%s7284_s0 + $0xf2] sm:$0x1]  ;;  %v251_v41 = vld [vmem:[%s7284_s0 + $0xf3] sm:$0x1]  ;;  %v5237_v26 = vmax.bf16 %v244_v38, %v236_v25  ;;  %v5239_v15 = vmax.bf16 %v245_v35, %v237_v31  ;;  %v5241_v14 = vmax.bf16 %v246_v46, %v238_v32  ;;  %v5243_v28 = vmax.bf16 %v247_v47, %v239_v33 }
  0x61   :  { %v252_v42 = vld [vmem:[%s7284_s0 + $0xf4] sm:$0x1]  ;;  %7574 = vst [vmem:[#allocation90_spill] sm:$0xff] %v5178_v59  ;;  %7575 = vst [vmem:[#allocation91_spill] sm:$0xff] %v5180_v60  ;;  %v253_v61 = vld [vmem:[%s7284_s0 + $0xf5] sm:$0x1] }
  0x62   :  { %v254_v1 = vld [vmem:[%s7284_s0 + $0xf6] sm:$0x1]  ;;  %v255_v51 = vld [vmem:[%s7284_s0 + $0xf7] sm:$0x1]  ;;  %v256_v52 = vld [vmem:[%s7284_s0 + $0xf8] sm:$0x1] }
  0x63   :  { %v257_v27 = vld [vmem:[%s7284_s0 + $0xf9] sm:$0x1]  ;;  %v258_v9 = vld [vmem:[%s7284_s0 + $0xfa] sm:$0x1]  ;;  %v259_v60 = vld [vmem:[%s7284_s0 + $0xfb] sm:$0x1]  ;;  %v5245_v29 = vmax.bf16 %v256_v52, %v248_v48 }
  0x64   :  { %v260_v59 = vld [vmem:[%s7284_s0 + $0xfc] sm:$0x1]  ;;  %7576 = vst [vmem:[#allocation92_spill] sm:$0xff] %v5220_v16  ;;  %v261_v17 = vld [vmem:[%s7284_s0 + $0xfd] sm:$0x1]  ;;  %v5247_v30 = vmax.bf16 %v257_v27, %v249_v0  ;;  %v5249_v16 = vmax.bf16 %v258_v9, %v250_v40  ;;  %v5251_v21 = vmax.bf16 %v259_v60, %v251_v41  ;;  %v7577_v48 = vld [vmem:[#allocation2_spill] sm:$0xff] }
  0x65   :  { %v262_v18 = vld [vmem:[%s7284_s0 + $0xfe] sm:$0x1]  ;;  %v263_v19 = vld [vmem:[%s7284_s0 + $0xff] sm:$0x1]  ;;  %v5253_v22 = vmax.bf16 %v260_v59, %v252_v42  ;;  %v5255_v23 = vmax.bf16 %v261_v17, %v253_v61  ;;  %v7578_v41 = vld [vmem:[#allocation3_spill] sm:$0xff]  ;;  %v7667_v40 = vshrl.u32 %v3902_v45, 16 }
  0x66   :  { %v5257_v25 = vmax.bf16 %v262_v18, %v254_v1  ;;  %v5259_v31 = vmax.bf16 %v263_v19, %v255_v51  ;;  %v7579_v59 = vld [vmem:[#allocation4_spill] sm:$0xff]  ;;  %v7580_v61 = vld [vmem:[#allocation5_spill] sm:$0xff]  ;;  %v7653_v38 = vld [vmem:[#allocation78_spill] sm:$0xff]  ;;  %v7666_v1 = vshrl.u32 %v3900_v44, 16  ;;  %v7668_v60 = vshrl.u32 %v3940_v54, 16 }
  0x67   :  { %v7648_v9 = vld [vmem:[#allocation73_spill] sm:$0xff]  ;;  %v7654_v0 = vld [vmem:[#allocation79_spill] sm:$0xff]  ;;  %v7657_v24 = vld [vmem:[#allocation82_spill] sm:$0xff]  ;;  %v5397_v47 = vmax.bf16 %v7667_v40, %v3902_v45  ;;  %v7669_v17 = vshrl.u32 %v3942_v55, 16  ;;  %v7670_v19 = vshrl.u32 %v3944_v56, 16  ;;  %v7672_v40 = vshrl.u32 %v3980_v2, 16 }
  0x68   :  { %v7652_v32 = vld [vmem:[#allocation77_spill] sm:$0xff]  ;;  %v7660_v35 = vld [vmem:[#allocation86_spill] sm:$0xff]  ;;  %v7661_v33 = vld [vmem:[#allocation87_spill] sm:$0xff]  ;;  %v5392_v46 = vmax.bf16 %v7666_v1, %v3900_v44  ;;  %v5402_v51 = vmax.bf16 %v7668_v60, %v3940_v54  ;;  %v7671_v1 = vshrl.u32 %v3946_v57, 16  ;;  %v7673_v60 = vshrl.u32 %v3982_v3, 16 }
  0x69   :  { %v7656_v36 = vld [vmem:[#allocation81_spill] sm:$0xff]  ;;  %v7662_v37 = vld [vmem:[#allocation88_spill] sm:$0xff]  ;;  %v7663_v52 = vld [vmem:[#allocation90_spill] sm:$0xff]  ;;  %v5407_v27 = vmax.bf16 %v7669_v17, %v3942_v55  ;;  %v5412_v44 = vmax.bf16 %v7670_v19, %v3944_v56  ;;  %v5422_v54 = vmax.bf16 %v7672_v40, %v3980_v2  ;;  %v7674_v17 = vshrl.u32 %v3984_v4, 16 }
  0x6a   :  { %v7659_v18 = vld [vmem:[#allocation85_spill] sm:$0xff]  ;;  %v7664_v39 = vld [vmem:[#allocation91_spill] sm:$0xff]  ;;  %v5417_v45 = vmax.bf16 %v7671_v1, %v3946_v57  ;;  %v5427_v55 = vmax.bf16 %v7673_v60, %v3982_v3  ;;  %v7675_v19 = vshrl.u32 %v3986_v5, 16  ;;  %v7676_v1 = vshrl.u32 %v4018_v12, 16 }
  0x6b   :  { %v7665_v58 = vld [vmem:[#allocation92_spill] sm:$0xff]  ;;  %v5432_v56 = vmax.bf16 %v7674_v17, %v3984_v4  ;;  %v7677_v40 = vshrl.u32 %v7577_v48, 16  ;;  %v7679_v60 = vshrl.u32 %v7578_v41, 16  ;;  %v7681_v17 = vshrl.u32 %v7579_v59, 16 }
  0x6c   :  { %v5437_v57 = vmax.bf16 %v7675_v19, %v3986_v5  ;;  %v5442_v2 = vmax.bf16 %v7676_v1, %v4018_v12  ;;  %v7683_v19 = vshrl.u32 %v7580_v61, 16  ;;  %v7685_v1 = vld [vmem:[#allocation6_spill] sm:$0xff]  ;;  %vm3349_vm4 = vcmask 1045509  }
  0x6d   :  { %v5447_v3 = vmax.bf16 %v7677_v40, %v7577_v48  ;;  %v5452_v4 = vmax.bf16 %v7679_v60, %v7578_v41  ;;  %v5457_v5 = vmax.bf16 %v7681_v17, %v7579_v59  ;;  %v7686_v42 = vshrl.u32 %v7685_v1, 16  ;;  %v7688_v40 = vld [vmem:[#allocation7_spill] sm:$0xff]  ;;  %v7691_v60 = vld [vmem:[#allocation8_spill] sm:$0xff]  ;;  %v7694_v17 = vld [vmem:[#allocation9_spill] sm:$0xff] }
  0x6e   :  { %v5462_v12 = vmax.bf16 %v7683_v19, %v7580_v61  ;;  %v7697_v19 = vld [vmem:[#allocation10_spill] sm:$0xff]  ;;  %vm3352_vm5 = vcmask 1046534   ;;  %vm3355_vm6 = vcmask 1047559   ;;  %vm3599_vm7 = vcmask 322560  }
  0x6f   :  { %7678 = vst [vmem:[#allocation2_spill] sm:$0xff] %v5447_v3  ;;  %7680 = vst [vmem:[#allocation3_spill] sm:$0xff] %v5452_v4  ;;  %v5467_v48 = vmax.bf16 %v7686_v42, %v7685_v1  ;;  %v7689_v3 = vshrl.u32 %v7688_v40, 16  ;;  %v7692_v4 = vshrl.u32 %v7691_v60, 16  ;;  %v7700_v1 = vld [vmem:[#allocation11_spill] sm:$0xff] }
  0x70   :  { %7682 = vst [vmem:[#allocation4_spill] sm:$0xff] %v5457_v5  ;;  %7684 = vst [vmem:[#allocation5_spill] sm:$0xff] %v5462_v12  ;;  %v7695_v5 = vshrl.u32 %v7694_v17, 16  ;;  %v7698_v12 = vshrl.u32 %v7697_v19, 16 }
  0x71   :  { %7687 = vst [vmem:[#allocation73_spill] sm:$0xff] %v5467_v48  ;;  %v5472_v41 = vmax.bf16 %v7689_v3, %v7688_v40  ;;  %v5477_v59 = vmax.bf16 %v7692_v4, %v7691_v60  ;;  %v7701_v48 = vshrl.u32 %v7700_v1, 16  ;;  %v7703_v40 = vld [vmem:[#allocation12_spill] sm:$0xff]  ;;  %v7706_v60 = vld [vmem:[#allocation13_spill] sm:$0xff] }
  0x72   :  { %v5482_v61 = vmax.bf16 %v7695_v5, %v7694_v17  ;;  %v5487_v42 = vmax.bf16 %v7698_v12, %v7697_v19  ;;  %v7709_v17 = vld [vmem:[#allocation14_spill] sm:$0xff]  ;;  %v7712_v19 = vld [vmem:[#allocation15_spill] sm:$0xff] }
  0x73   :  { %7690 = vst [vmem:[#allocation77_spill] sm:$0xff] %v5472_v41  ;;  %7693 = vst [vmem:[#allocation78_spill] sm:$0xff] %v5477_v59  ;;  %v5492_v3 = vmax.bf16 %v7701_v48, %v7700_v1  ;;  %v7704_v41 = vshrl.u32 %v7703_v40, 16  ;;  %v7707_v59 = vshrl.u32 %v7706_v60, 16  ;;  %v7715_v1 = vld [vmem:[#allocation16_spill] sm:$0xff] }
  0x74   :  { %7696 = vst [vmem:[#allocation79_spill] sm:$0xff] %v5482_v61  ;;  %7699 = vst [vmem:[#allocation81_spill] sm:$0xff] %v5487_v42  ;;  %v7710_v61 = vshrl.u32 %v7709_v17, 16  ;;  %v7713_v42 = vshrl.u32 %v7712_v19, 16 }
  0x75   :  { %7702 = vst [vmem:[#allocation82_spill] sm:$0xff] %v5492_v3  ;;  %v5497_v4 = vmax.bf16 %v7704_v41, %v7703_v40  ;;  %v5502_v5 = vmax.bf16 %v7707_v59, %v7706_v60  ;;  %v7716_v3 = vshrl.u32 %v7715_v1, 16  ;;  %v7718_v40 = vld [vmem:[#allocation17_spill] sm:$0xff]  ;;  %v7721_v60 = vld [vmem:[#allocation18_spill] sm:$0xff] }
  0x76   :  { %v5507_v12 = vmax.bf16 %v7710_v61, %v7709_v17  ;;  %v5512_v48 = vmax.bf16 %v7713_v42, %v7712_v19  ;;  %v7724_v17 = vld [vmem:[#allocation19_spill] sm:$0xff]  ;;  %v7727_v19 = vld [vmem:[#allocation20_spill] sm:$0xff] }
  0x77   :  { %7705 = vst [vmem:[#allocation85_spill] sm:$0xff] %v5497_v4  ;;  %7708 = vst [vmem:[#allocation86_spill] sm:$0xff] %v5502_v5  ;;  %v5517_v41 = vmax.bf16 %v7716_v3, %v7715_v1  ;;  %v7719_v4 = vshrl.u32 %v7718_v40, 16  ;;  %v7722_v5 = vshrl.u32 %v7721_v60, 16  ;;  %v7730_v1 = vld [vmem:[#allocation21_spill] sm:$0xff] }
  0x78   :  { %7711 = vst [vmem:[#allocation87_spill] sm:$0xff] %v5507_v12  ;;  %7714 = vst [vmem:[#allocation88_spill] sm:$0xff] %v5512_v48  ;;  %v7725_v12 = vshrl.u32 %v7724_v17, 16  ;;  %v7728_v48 = vshrl.u32 %v7727_v19, 16 }
  0x79   :  { %7717 = vst [vmem:[#allocation90_spill] sm:$0xff] %v5517_v41  ;;  %v5522_v59 = vmax.bf16 %v7719_v4, %v7718_v40  ;;  %v5527_v61 = vmax.bf16 %v7722_v5, %v7721_v60  ;;  %v7731_v41 = vshrl.u32 %v7730_v1, 16  ;;  %v7733_v40 = vld [vmem:[#allocation22_spill] sm:$0xff]  ;;  %v7736_v60 = vld [vmem:[#allocation23_spill] sm:$0xff] }
  0x7a   :  { %v5532_v42 = vmax.bf16 %v7725_v12, %v7724_v17  ;;  %v5537_v3 = vmax.bf16 %v7728_v48, %v7727_v19  ;;  %v7739_v17 = vld [vmem:[#allocation24_spill] sm:$0xff]  ;;  %v7742_v19 = vld [vmem:[#allocation25_spill] sm:$0xff] }
  0x7b   :  { %7720 = vst [vmem:[#allocation91_spill] sm:$0xff] %v5522_v59  ;;  %7723 = vst [vmem:[#allocation92_spill] sm:$0xff] %v5527_v61  ;;  %v5542_v4 = vmax.bf16 %v7731_v41, %v7730_v1  ;;  %v7734_v59 = vshrl.u32 %v7733_v40, 16  ;;  %v7737_v61 = vshrl.u32 %v7736_v60, 16  ;;  %v7745_v1 = vld [vmem:[#allocation26_spill] sm:$0xff] }
  0x7c   :  { %7726 = vst [vmem:[#allocation6_spill] sm:$0xff] %v5532_v42  ;;  %7729 = vst [vmem:[#allocation7_spill] sm:$0xff] %v5537_v3  ;;  %v7740_v42 = vshrl.u32 %v7739_v17, 16  ;;  %v7743_v3 = vshrl.u32 %v7742_v19, 16 }
  0x7d   :  { %7732 = vst [vmem:[#allocation8_spill] sm:$0xff] %v5542_v4  ;;  %v5547_v5 = vmax.bf16 %v7734_v59, %v7733_v40  ;;  %v5552_v12 = vmax.bf16 %v7737_v61, %v7736_v60  ;;  %v7746_v4 = vshrl.u32 %v7745_v1, 16  ;;  %v7748_v40 = vld [vmem:[#allocation27_spill] sm:$0xff]  ;;  %v7751_v60 = vld [vmem:[#allocation28_spill] sm:$0xff] }
  0x7e   :  { %v5557_v48 = vmax.bf16 %v7740_v42, %v7739_v17  ;;  %v5562_v41 = vmax.bf16 %v7743_v3, %v7742_v19  ;;  %v7754_v17 = vld [vmem:[#allocation29_spill] sm:$0xff]  ;;  %v7757_v19 = vld [vmem:[#allocation30_spill] sm:$0xff] }
  0x7f   :  { %7735 = vst [vmem:[#allocation9_spill] sm:$0xff] %v5547_v5  ;;  %7738 = vst [vmem:[#allocation10_spill] sm:$0xff] %v5552_v12  ;;  %v5567_v59 = vmax.bf16 %v7746_v4, %v7745_v1  ;;  %v7749_v5 = vshrl.u32 %v7748_v40, 16  ;;  %v7752_v12 = vshrl.u32 %v7751_v60, 16  ;;  %v7760_v1 = vld [vmem:[#allocation31_spill] sm:$0xff] }
  0x80   :  { %7741 = vst [vmem:[#allocation11_spill] sm:$0xff] %v5557_v48  ;;  %7744 = vst [vmem:[#allocation12_spill] sm:$0xff] %v5562_v41  ;;  %v7755_v48 = vshrl.u32 %v7754_v17, 16  ;;  %v7758_v41 = vshrl.u32 %v7757_v19, 16 }
  0x81   :  { %7747 = vst [vmem:[#allocation13_spill] sm:$0xff] %v5567_v59  ;;  %v5572_v61 = vmax.bf16 %v7749_v5, %v7748_v40  ;;  %v5577_v42 = vmax.bf16 %v7752_v12, %v7751_v60  ;;  %v7761_v59 = vshrl.u32 %v7760_v1, 16  ;;  %v7763_v40 = vld [vmem:[#allocation32_spill] sm:$0xff]  ;;  %v7766_v60 = vld [vmem:[#allocation33_spill] sm:$0xff] }
  0x82   :  { %v5582_v3 = vmax.bf16 %v7755_v48, %v7754_v17  ;;  %v5587_v4 = vmax.bf16 %v7758_v41, %v7757_v19  ;;  %v7769_v17 = vld [vmem:[#allocation34_spill] sm:$0xff]  ;;  %v7772_v19 = vld [vmem:[#allocation35_spill] sm:$0xff] }
  0x83   :  { %7750 = vst [vmem:[#allocation14_spill] sm:$0xff] %v5572_v61  ;;  %7753 = vst [vmem:[#allocation15_spill] sm:$0xff] %v5577_v42  ;;  %v5592_v5 = vmax.bf16 %v7761_v59, %v7760_v1  ;;  %v7764_v61 = vshrl.u32 %v7763_v40, 16  ;;  %v7767_v42 = vshrl.u32 %v7766_v60, 16  ;;  %v7775_v1 = vld [vmem:[#allocation36_spill] sm:$0xff] }
  0x84   :  { %7756 = vst [vmem:[#allocation16_spill] sm:$0xff] %v5582_v3  ;;  %7759 = vst [vmem:[#allocation17_spill] sm:$0xff] %v5587_v4  ;;  %v7770_v3 = vshrl.u32 %v7769_v17, 16  ;;  %v7773_v4 = vshrl.u32 %v7772_v19, 16 }
  0x85   :  { %7762 = vst [vmem:[#allocation18_spill] sm:$0xff] %v5592_v5  ;;  %v5597_v12 = vmax.bf16 %v7764_v61, %v7763_v40  ;;  %v5602_v48 = vmax.bf16 %v7767_v42, %v7766_v60  ;;  %v7776_v5 = vshrl.u32 %v7775_v1, 16  ;;  %v7778_v40 = vld [vmem:[#allocation37_spill] sm:$0xff]  ;;  %v7781_v60 = vld [vmem:[#allocation38_spill] sm:$0xff] }
  0x86   :  { %v5607_v41 = vmax.bf16 %v7770_v3, %v7769_v17  ;;  %v5612_v59 = vmax.bf16 %v7773_v4, %v7772_v19  ;;  %v7784_v17 = vld [vmem:[#allocation39_spill] sm:$0xff]  ;;  %v7787_v19 = vld [vmem:[#allocation40_spill] sm:$0xff] }
  0x87   :  { %7765 = vst [vmem:[#allocation19_spill] sm:$0xff] %v5597_v12  ;;  %7768 = vst [vmem:[#allocation20_spill] sm:$0xff] %v5602_v48  ;;  %v5617_v61 = vmax.bf16 %v7776_v5, %v7775_v1  ;;  %v7779_v12 = vshrl.u32 %v7778_v40, 16  ;;  %v7782_v48 = vshrl.u32 %v7781_v60, 16  ;;  %v7790_v1 = vld [vmem:[#allocation41_spill] sm:$0xff] }
  0x88   :  { %7771 = vst [vmem:[#allocation21_spill] sm:$0xff] %v5607_v41  ;;  %7774 = vst [vmem:[#allocation22_spill] sm:$0xff] %v5612_v59  ;;  %v7785_v41 = vshrl.u32 %v7784_v17, 16  ;;  %v7788_v59 = vshrl.u32 %v7787_v19, 16 }
  0x89   :  { %7777 = vst [vmem:[#allocation23_spill] sm:$0xff] %v5617_v61  ;;  %v5622_v42 = vmax.bf16 %v7779_v12, %v7778_v40  ;;  %v5627_v3 = vmax.bf16 %v7782_v48, %v7781_v60  ;;  %v7791_v61 = vshrl.u32 %v7790_v1, 16  ;;  %v7793_v40 = vld [vmem:[#allocation42_spill] sm:$0xff]  ;;  %v7796_v60 = vld [vmem:[#allocation43_spill] sm:$0xff] }
  0x8a   :  { %v5632_v4 = vmax.bf16 %v7785_v41, %v7784_v17  ;;  %v5637_v5 = vmax.bf16 %v7788_v59, %v7787_v19  ;;  %v7799_v17 = vld [vmem:[#allocation44_spill] sm:$0xff]  ;;  %v7802_v19 = vld [vmem:[#allocation45_spill] sm:$0xff] }
  0x8b   :  { %7780 = vst [vmem:[#allocation24_spill] sm:$0xff] %v5622_v42  ;;  %7783 = vst [vmem:[#allocation25_spill] sm:$0xff] %v5627_v3  ;;  %v5642_v12 = vmax.bf16 %v7791_v61, %v7790_v1  ;;  %v7794_v42 = vshrl.u32 %v7793_v40, 16  ;;  %v7797_v3 = vshrl.u32 %v7796_v60, 16  ;;  %v7805_v1 = vld [vmem:[#allocation46_spill] sm:$0xff] }
  0x8c   :  { %7786 = vst [vmem:[#allocation26_spill] sm:$0xff] %v5632_v4  ;;  %7789 = vst [vmem:[#allocation27_spill] sm:$0xff] %v5637_v5  ;;  %v7800_v4 = vshrl.u32 %v7799_v17, 16  ;;  %v7803_v5 = vshrl.u32 %v7802_v19, 16 }
  0x8d   :  { %7792 = vst [vmem:[#allocation28_spill] sm:$0xff] %v5642_v12  ;;  %v5647_v48 = vmax.bf16 %v7794_v42, %v7793_v40  ;;  %v5652_v41 = vmax.bf16 %v7797_v3, %v7796_v60  ;;  %v7806_v12 = vshrl.u32 %v7805_v1, 16  ;;  %v7808_v40 = vld [vmem:[#allocation47_spill] sm:$0xff]  ;;  %v7811_v60 = vld [vmem:[#allocation48_spill] sm:$0xff] }
  0x8e   :  { %v5657_v59 = vmax.bf16 %v7800_v4, %v7799_v17  ;;  %v5662_v61 = vmax.bf16 %v7803_v5, %v7802_v19  ;;  %v7814_v17 = vld [vmem:[#allocation49_spill] sm:$0xff]  ;;  %v7817_v19 = vld [vmem:[#allocation50_spill] sm:$0xff] }
  0x8f   :  { %7795 = vst [vmem:[#allocation29_spill] sm:$0xff] %v5647_v48  ;;  %7798 = vst [vmem:[#allocation30_spill] sm:$0xff] %v5652_v41  ;;  %v5667_v42 = vmax.bf16 %v7806_v12, %v7805_v1  ;;  %v7809_v48 = vshrl.u32 %v7808_v40, 16  ;;  %v7812_v41 = vshrl.u32 %v7811_v60, 16  ;;  %v7820_v1 = vld [vmem:[#allocation51_spill] sm:$0xff] }
  0x90   :  { %7801 = vst [vmem:[#allocation31_spill] sm:$0xff] %v5657_v59  ;;  %7804 = vst [vmem:[#allocation32_spill] sm:$0xff] %v5662_v61  ;;  %v7815_v59 = vshrl.u32 %v7814_v17, 16  ;;  %v7818_v61 = vshrl.u32 %v7817_v19, 16 }
  0x91   :  { %7807 = vst [vmem:[#allocation33_spill] sm:$0xff] %v5667_v42  ;;  %v5672_v3 = vmax.bf16 %v7809_v48, %v7808_v40  ;;  %v5677_v4 = vmax.bf16 %v7812_v41, %v7811_v60  ;;  %v7821_v42 = vshrl.u32 %v7820_v1, 16  ;;  %v7823_v40 = vld [vmem:[#allocation52_spill] sm:$0xff]  ;;  %v7826_v60 = vld [vmem:[#allocation53_spill] sm:$0xff] }
  0x92   :  { %v5682_v5 = vmax.bf16 %v7815_v59, %v7814_v17  ;;  %v5687_v12 = vmax.bf16 %v7818_v61, %v7817_v19  ;;  %v7829_v17 = vld [vmem:[#allocation54_spill] sm:$0xff]  ;;  %v7832_v19 = vld [vmem:[#allocation55_spill] sm:$0xff] }
  0x93   :  { %7810 = vst [vmem:[#allocation34_spill] sm:$0xff] %v5672_v3  ;;  %7813 = vst [vmem:[#allocation35_spill] sm:$0xff] %v5677_v4  ;;  %v5692_v48 = vmax.bf16 %v7821_v42, %v7820_v1  ;;  %v7824_v3 = vshrl.u32 %v7823_v40, 16  ;;  %v7827_v4 = vshrl.u32 %v7826_v60, 16  ;;  %v7835_v1 = vld [vmem:[#allocation56_spill] sm:$0xff] }
  0x94   :  { %7816 = vst [vmem:[#allocation36_spill] sm:$0xff] %v5682_v5  ;;  %7819 = vst [vmem:[#allocation37_spill] sm:$0xff] %v5687_v12  ;;  %v7830_v5 = vshrl.u32 %v7829_v17, 16  ;;  %v7833_v12 = vshrl.u32 %v7832_v19, 16 }
  0x95   :  { %7822 = vst [vmem:[#allocation38_spill] sm:$0xff] %v5692_v48  ;;  %v5697_v41 = vmax.bf16 %v7824_v3, %v7823_v40  ;;  %v5702_v59 = vmax.bf16 %v7827_v4, %v7826_v60  ;;  %v7836_v48 = vshrl.u32 %v7835_v1, 16  ;;  %v7838_v40 = vld [vmem:[#allocation57_spill] sm:$0xff]  ;;  %v7841_v60 = vld [vmem:[#allocation58_spill] sm:$0xff] }
  0x96   :  { %v5707_v61 = vmax.bf16 %v7830_v5, %v7829_v17  ;;  %v5712_v42 = vmax.bf16 %v7833_v12, %v7832_v19  ;;  %v7844_v17 = vld [vmem:[#allocation59_spill] sm:$0xff]  ;;  %v7847_v19 = vld [vmem:[#allocation60_spill] sm:$0xff] }
  0x97   :  { %7825 = vst [vmem:[#allocation39_spill] sm:$0xff] %v5697_v41  ;;  %7828 = vst [vmem:[#allocation40_spill] sm:$0xff] %v5702_v59  ;;  %v5717_v3 = vmax.bf16 %v7836_v48, %v7835_v1  ;;  %v7839_v41 = vshrl.u32 %v7838_v40, 16  ;;  %v7842_v59 = vshrl.u32 %v7841_v60, 16  ;;  %v7850_v1 = vld [vmem:[#allocation61_spill] sm:$0xff] }
  0x98   :  { %7831 = vst [vmem:[#allocation41_spill] sm:$0xff] %v5707_v61  ;;  %7834 = vst [vmem:[#allocation42_spill] sm:$0xff] %v5712_v42  ;;  %v7845_v61 = vshrl.u32 %v7844_v17, 16  ;;  %v7848_v42 = vshrl.u32 %v7847_v19, 16 }
  0x99   :  { %7837 = vst [vmem:[#allocation43_spill] sm:$0xff] %v5717_v3  ;;  %v5722_v4 = vmax.bf16 %v7839_v41, %v7838_v40  ;;  %v5727_v5 = vmax.bf16 %v7842_v59, %v7841_v60  ;;  %v7851_v3 = vshrl.u32 %v7850_v1, 16  ;;  %v7853_v40 = vld [vmem:[#allocation62_spill] sm:$0xff]  ;;  %v7856_v60 = vld [vmem:[#allocation63_spill] sm:$0xff] }
  0x9a   :  { %v5732_v12 = vmax.bf16 %v7845_v61, %v7844_v17  ;;  %v5737_v48 = vmax.bf16 %v7848_v42, %v7847_v19  ;;  %v7859_v17 = vld [vmem:[#allocation64_spill] sm:$0xff]  ;;  %v7862_v19 = vld [vmem:[#allocation65_spill] sm:$0xff] }
  0x9b   :  { %7840 = vst [vmem:[#allocation44_spill] sm:$0xff] %v5722_v4  ;;  %7843 = vst [vmem:[#allocation45_spill] sm:$0xff] %v5727_v5  ;;  %v5742_v41 = vmax.bf16 %v7851_v3, %v7850_v1  ;;  %v7854_v4 = vshrl.u32 %v7853_v40, 16  ;;  %v7857_v5 = vshrl.u32 %v7856_v60, 16  ;;  %v7865_v1 = vld [vmem:[#allocation66_spill] sm:$0xff] }
  0x9c   :  { %7846 = vst [vmem:[#allocation46_spill] sm:$0xff] %v5732_v12  ;;  %7849 = vst [vmem:[#allocation47_spill] sm:$0xff] %v5737_v48  ;;  %v7860_v12 = vshrl.u32 %v7859_v17, 16  ;;  %v7863_v48 = vshrl.u32 %v7862_v19, 16 }
  0x9d   :  { %7852 = vst [vmem:[#allocation48_spill] sm:$0xff] %v5742_v41  ;;  %v5747_v59 = vmax.bf16 %v7854_v4, %v7853_v40  ;;  %v5752_v61 = vmax.bf16 %v7857_v5, %v7856_v60  ;;  %v7866_v41 = vshrl.u32 %v7865_v1, 16  ;;  %v7868_v40 = vld [vmem:[#allocation67_spill] sm:$0xff]  ;;  %v7871_v60 = vld [vmem:[#allocation68_spill] sm:$0xff] }
  0x9e   :  { %v5757_v42 = vmax.bf16 %v7860_v12, %v7859_v17  ;;  %v5762_v3 = vmax.bf16 %v7863_v48, %v7862_v19  ;;  %v7873_v17 = vld [vmem:[#allocation69_spill] sm:$0xff]  ;;  %v7876_v19 = vld [vmem:[#allocation70_spill] sm:$0xff] }
  0x9f   :  { %7855 = vst [vmem:[#allocation49_spill] sm:$0xff] %v5747_v59  ;;  %7858 = vst [vmem:[#allocation50_spill] sm:$0xff] %v5752_v61  ;;  %v5767_v4 = vmax.bf16 %v7866_v41, %v7865_v1  ;;  %v7869_v59 = vshrl.u32 %v7868_v40, 16  ;;  %v7872_v61 = vshrl.u32 %v7871_v60, 16  ;;  %v7879_v1 = vld [vmem:[#allocation71_spill] sm:$0xff] }
  0xa0   :  { %7861 = vst [vmem:[#allocation51_spill] sm:$0xff] %v5757_v42  ;;  %7864 = vst [vmem:[#allocation52_spill] sm:$0xff] %v5762_v3  ;;  %v7874_v42 = vshrl.u32 %v7873_v17, 16  ;;  %v7877_v3 = vshrl.u32 %v7876_v19, 16 }
  0xa1   :  { %7867 = vst [vmem:[#allocation53_spill] sm:$0xff] %v5767_v4  ;;  %v5772_v5 = vmax.bf16 %v7869_v59, %v7868_v40  ;;  %v5777_v12 = vmax.bf16 %v7872_v61, %v7871_v60  ;;  %v7880_v4 = vshrl.u32 %v7879_v1, 16  ;;  %v7882_v40 = vld [vmem:[#allocation72_spill] sm:$0xff]  ;;  %v7884_v60 = vshrl.u32 %v7648_v9, 16 }
  0xa2   :  { %v5782_v48 = vmax.bf16 %v7874_v42, %v7873_v17  ;;  %v5787_v41 = vmax.bf16 %v7877_v3, %v7876_v19  ;;  %v7885_v17 = vld [vmem:[#allocation74_spill] sm:$0xff]  ;;  %v7887_v19 = vld [vmem:[#allocation75_spill] sm:$0xff] }
  0xa3   :  { %7870 = vst [vmem:[#allocation54_spill] sm:$0xff] %v5772_v5  ;;  %v5792_v59 = vmax.bf16 %v7880_v4, %v7879_v1  ;;  %v7883_v5 = vshrl.u32 %v7882_v40, 16  ;;  %v5802_v42 = vmax.bf16 %v7884_v60, %v7648_v9  ;;  %v7890_v1 = vld [vmem:[#allocation76_spill] sm:$0xff]  ;;  %v7893_v60 = vshrl.u32 %v7653_v38, 16 }
  0xa4   :  { %7875 = vst [vmem:[#allocation55_spill] sm:$0xff] %v5782_v48  ;;  %7878 = vst [vmem:[#allocation56_spill] sm:$0xff] %v5787_v41  ;;  %v7886_v48 = vshrl.u32 %v7885_v17, 16  ;;  %v7888_v41 = vshrl.u32 %v7887_v19, 16 }
  0xa5   :  { %7881 = vst [vmem:[#allocation57_spill] sm:$0xff] %v5792_v59  ;;  %v5797_v61 = vmax.bf16 %v7883_v5, %v7882_v40  ;;  %v7891_v59 = vshrl.u32 %v7890_v1, 16  ;;  %v7892_v40 = vshrl.u32 %v7652_v32, 16 }
  0xa6   :  { %v5807_v3 = vmax.bf16 %v7886_v48, %v7885_v17  ;;  %v5812_v4 = vmax.bf16 %v7888_v41, %v7887_v19  ;;  %v5827_v48 = vmax.bf16 %v7893_v60, %v7653_v38  ;;  %v7895_v17 = vshrl.u32 %v7654_v0, 16  ;;  %v7897_v19 = vld [vmem:[#allocation80_spill] sm:$0xff]  ;;  %v7901_v60 = vld [vmem:[#allocation83_spill] sm:$0xff] }
  0xa7   :  { %v5817_v5 = vmax.bf16 %v7891_v59, %v7890_v1  ;;  %v5822_v9 = vmax.bf16 %v7892_v40, %v7652_v32  ;;  %v7899_v1 = vshrl.u32 %v7656_v36, 16  ;;  %v7900_v40 = vshrl.u32 %v7657_v24, 16 }
  0xa8   :  { %7889 = vst [vmem:[#allocation58_spill] sm:$0xff] %v5812_v4  ;;  %7894 = vst [vmem:[#allocation59_spill] sm:$0xff] %v5827_v48  ;;  %v5832_v41 = vmax.bf16 %v7895_v17, %v7654_v0  ;;  %v7898_v4 = vshrl.u32 %v7897_v19, 16  ;;  %v7902_v48 = vshrl.u32 %v7901_v60, 16  ;;  %v7903_v17 = vld [vmem:[#allocation84_spill] sm:$0xff] }
  0xa9   :  { %v5842_v32 = vmax.bf16 %v7899_v1, %v7656_v36  ;;  %v5847_v38 = vmax.bf16 %v7900_v40, %v7657_v24  ;;  %v7906_v1 = vshrl.u32 %v7660_v35, 16  ;;  %v7907_v40 = vshrl.u32 %v7661_v33, 16 }
  0xaa   :  { %7896 = vst [vmem:[#allocation60_spill] sm:$0xff] %v5832_v41  ;;  %v5837_v59 = vmax.bf16 %v7898_v4, %v7897_v19  ;;  %v5852_v0 = vmax.bf16 %v7902_v48, %v7901_v60  ;;  %v7904_v41 = vshrl.u32 %v7903_v17, 16  ;;  %v7905_v19 = vshrl.u32 %v7659_v18, 16 }
  0xab   :  { %v5867_v24 = vmax.bf16 %v7906_v1, %v7660_v35  ;;  %v5872_v48 = vmax.bf16 %v7907_v40, %v7661_v33  ;;  %v7909_v60 = vshrl.u32 %v5145_v49, 16  ;;  %v7912_v1 = vshrl.u32 %v7662_v37, 16  ;;  %v7913_v40 = vld [vmem:[#allocation89_spill] sm:$0xff] }
  0xac   :  { %v5857_v4 = vmax.bf16 %v7904_v41, %v7903_v17  ;;  %v5862_v36 = vmax.bf16 %v7905_v19, %v7659_v18  ;;  %v7910_v17 = vshrl.u32 %v5149_v50, 16  ;;  %v7911_v19 = vshrl.u32 %v5153_v43, 16 }
  0xad   :  { %7908 = vst [vmem:[#allocation61_spill] sm:$0xff] %v5872_v48  ;;  %v5877_v41 = vmax.bf16 %v7909_v60, %v5145_v49  ;;  %v5892_v33 = vmax.bf16 %v7912_v1, %v7662_v37  ;;  %v7914_v48 = vshrl.u32 %v7913_v40, 16  ;;  %v7915_v60 = vshrl.u32 %v5175_v34, 16 }
  0xae   :  { %v5882_v18 = vmax.bf16 %v7910_v17, %v5149_v50  ;;  %v5887_v35 = vmax.bf16 %v7911_v19, %v5153_v43  ;;  %v7916_v17 = vshrl.u32 %v7663_v52, 16  ;;  %v7917_v19 = vshrl.u32 %v7664_v39, 16 }
  0xaf   :  { %v5897_v49 = vmax.bf16 %v7914_v48, %v7913_v40  ;;  %v5902_v50 = vmax.bf16 %v7915_v60, %v5175_v34  ;;  %v7919_v1 = vshrl.u32 %v5197_v53, 16  ;;  %v7921_v40 = vshrl.u32 %v5199_v6, 16 }
  0xb0   :  { %v5907_v43 = vmax.bf16 %v7916_v17, %v7663_v52  ;;  %v5912_v37 = vmax.bf16 %v7917_v19, %v7664_v39  ;;  %v7923_v60 = vshrl.u32 %v5201_v7, 16  ;;  %v7924_v17 = vshrl.u32 %v5203_v8, 16 }
  0xb1   :  { %v5917_v48 = vmax.bf16 %v7919_v1, %v5197_v53  ;;  %v5922_v34 = vmax.bf16 %v7921_v40, %v5199_v6  ;;  %v7925_v19 = vshrl.u32 %v5214_v62, 16  ;;  %v3749_v1 = vmov 1935823168  }
  0xb2   :  { %7918 = vst [vmem:[#allocation62_spill] sm:$0xff] %v5912_v37  ;;  %v5927_v52 = vmax.bf16 %v7923_v60, %v5201_v7  ;;  %v5932_v39 = vmax.bf16 %v7924_v17, %v5203_v8  ;;  %v7926_v37 = vlaneseq  ;;  %v7927_v40 = vshrl.u32 %v5216_v63, 16 }
  0xb3   :  { %7920 = vst [vmem:[#allocation63_spill] sm:$0xff] %v5917_v48  ;;  %7922 = vst [vmem:[#allocation64_spill] sm:$0xff] %v5922_v34  ;;  %v5937_v53 = vmax.bf16 %v7925_v19, %v5214_v62  ;;  %v1417_v48 = vunpack.c.l.s4 %v3749_v1  ;;  %v7928_v7 = vshrl.u32 %v5218_v13, 16  ;;  %v7929_v8 = vshrl.u32 %v7665_v58, 16 }
  0xb4   :  { %v1420_v6 = vshrl.u32 %v7926_v37, 7  ;;  %v5943_v34 = vmax.bf16 %v7927_v40, %v5216_v63  ;;  %v7930_v62 = vshrl.u32 %v5231_v10, 16  ;;  %v7931_v37 = vshrl.u32 %v5233_v20, 16 }
  0xb5   :  { %v5948_v60 = vmax.bf16 %v7928_v7, %v5218_v13  ;;  %v5953_v17 = vmax.bf16 %v7929_v8, %v7665_v58  ;;  %v7932_v1 = vshrl.u32 %v5235_v11, 16  ;;  %v7933_v40 = vshrl.u32 %v5237_v26, 16 }
  0xb6   :  { %v5958_v19 = vmax.bf16 %v7930_v62, %v5231_v10  ;;  %v5963_v63 = vmax.bf16 %v7931_v37, %v5233_v20  ;;  %v1418_v7 = vunpack.c.0.s8 %v1417_v48  ;;  %v7934_v10 = vshrl.u32 %v5239_v15, 16 }
  0xb7   :  { %v5968_v13 = vmax.bf16 %v7932_v1, %v5235_v11  ;;  %v5973_v58 = vmax.bf16 %v7933_v40, %v5237_v26  ;;  %v7935_v20 = vshrl.u32 %v5241_v14, 16  ;;  %v7936_v11 = vshrl.u32 %v5243_v28, 16 }
  0xb8   :  { %v5978_v8 = vmax.bf16 %v7934_v10, %v5239_v15  ;;  %v7937_v26 = vshrl.u32 %v5245_v29, 16  ;;  %v7938_v48 = vshrl.u32 %v5247_v30, 16  ;;  %v7939_v40 = vshrl.u32 %v5249_v16, 16 }
  0xb9   :  { %v5983_v62 = vmax.bf16 %v7935_v20, %v5241_v14  ;;  %v5988_v37 = vmax.bf16 %v7936_v11, %v5243_v28  ;;  %v7940_v10 = vshrl.u32 %v5251_v21, 16  ;;  %v6010_v20 = vsub.s32 %v1418_v7, %v1420_v6 }
  0xba   :  { %v5993_v1 = vmax.bf16 %v7937_v26, %v5245_v29  ;;  %v5998_v15 = vmax.bf16 %v7938_v48, %v5247_v30  ;;  %v6003_v14 = vmax.bf16 %v7939_v40, %v5249_v16  ;;  %v7941_v29 = vshrl.u32 %v5253_v22, 16 }
  0xbb   :  { %v6008_v28 = vmax.bf16 %v7940_v10, %v5251_v21  ;;  %v7942_v30 = vshrl.u32 %v5255_v23, 16  ;;  %v7943_v16 = vshrl.u32 %v5257_v25, 16  ;;  %v7944_v21 = vshrl.u32 %v5259_v31, 16 }
  0xbc   :  { %v6015_v11 = vmax.bf16 %v7941_v29, %v5253_v22  ;;  %v1422_v7 = vrot.slane %v5392_v46, %v6010_v20  ;;  %v1436_v22 = vrot.slane %v5397_v47, %v6010_v20  ;;  %v1464_v40 = vrot.slane %v5407_v27, %v6010_v20 }
  0xbd   :  { %v6020_v26 = vmax.bf16 %v7942_v30, %v5255_v23  ;;  %v6025_v48 = vmax.bf16 %v7943_v16, %v5257_v25  ;;  %v6030_v6 = vmax.bf16 %v7944_v21, %v5259_v31  ;;  %v1450_v23 = vrot.slane %v5402_v51, %v6010_v20 }
  0xbe   :  { %v1478_v25 = vrot.slane %v5412_v44, %v6010_v20  ;;  %v1492_v10 = vrot.slane %v5417_v45, %v6010_v20  ;;  %v1506_v31 = vrot.slane %v5422_v54, %v6010_v20  ;;  %v1520_v46 = vrot.slane %v5427_v55, %v6010_v20 }
  0xbf   :  { %v6049_v47 = vrot.slane %v1422_v7, %v6010_v20  ;;  %v6052_v51 = vrot.slane %v1436_v22, %v6010_v20  ;;  %v6055_v27 = vrot.slane %v1450_v23, %v6010_v20  ;;  %v6058_v44 = vrot.slane %v1464_v40, %v6010_v20  ;;  %v7953_v7 = vld [vmem:[#allocation2_spill] sm:$0xff]  ;;  %v7954_v23 = vld [vmem:[#allocation3_spill] sm:$0xff] }
  0xc0   :  { %v6061_v45 = vrot.slane %v1478_v25, %v6010_v20  ;;  %v6064_v54 = vrot.slane %v1492_v10, %v6010_v20  ;;  %v6067_v55 = vrot.slane %v1506_v31, %v6010_v20  ;;  %v6070_v29 = vrot.slane %v1520_v46, %v6010_v20  ;;  %v7955_v25 = vld [vmem:[#allocation4_spill] sm:$0xff]  ;;  %v7956_v31 = vld [vmem:[#allocation5_spill] sm:$0xff] }
  0xc1   :  { %7945 = vst [vmem:[#allocation65_spill] sm:$0xff] %v6049_v47  ;;  %7946 = vst [vmem:[#allocation66_spill] sm:$0xff] %v6052_v51  ;;  %v1534_v30 = vrot.slane %v5432_v56, %v6010_v20  ;;  %v1548_v16 = vrot.slane %v5437_v57, %v6010_v20  ;;  %v1562_v21 = vrot.slane %v5442_v2, %v6010_v20  ;;  %v7957_v56 = vld [vmem:[#allocation73_spill] sm:$0xff] }
  0xc2   :  { %7947 = vst [vmem:[#allocation67_spill] sm:$0xff] %v6055_v27  ;;  %7948 = vst [vmem:[#allocation68_spill] sm:$0xff] %v6058_v44  ;;  %v1576_v22 = vrot.slane %v7953_v7, %v6010_v20  ;;  %v1590_v40 = vrot.slane %v7954_v23, %v6010_v20  ;;  %v1604_v10 = vrot.slane %v7955_v25, %v6010_v20 }
  0xc3   :  { %7949 = vst [vmem:[#allocation69_spill] sm:$0xff] %v6061_v45  ;;  %7950 = vst [vmem:[#allocation70_spill] sm:$0xff] %v6064_v54  ;;  %v1618_v46 = vrot.slane %v7956_v31, %v6010_v20  ;;  %v6089_v57 = vrot.slane %v1534_v30, %v6010_v20  ;;  %v6092_v2 = vrot.slane %v1548_v16, %v6010_v20  ;;  %v7966_v16 = vld [vmem:[#allocation77_spill] sm:$0xff] }
  0xc4   :  { %7951 = vst [vmem:[#allocation71_spill] sm:$0xff] %v6067_v55  ;;  %7952 = vst [vmem:[#allocation72_spill] sm:$0xff] %v6070_v29  ;;  %v1632_v29 = vrot.slane %v7957_v56, %v6010_v20  ;;  %v6095_v7 = vrot.slane %v1562_v21, %v6010_v20  ;;  %v6098_v23 = vrot.slane %v1576_v22, %v6010_v20  ;;  %v7967_v21 = vld [vmem:[#allocation78_spill] sm:$0xff]  ;;  %v7968_v22 = vld [vmem:[#allocation79_spill] sm:$0xff] }
  0xc5   :  { %7958 = vst [vmem:[#allocation74_spill] sm:$0xff] %v6089_v57  ;;  %7959 = vst [vmem:[#allocation75_spill] sm:$0xff] %v6092_v2  ;;  %v6101_v25 = vrot.slane %v1590_v40, %v6010_v20  ;;  %v6104_v31 = vrot.slane %v1604_v10, %v6010_v20  ;;  %v6107_v56 = vrot.slane %v1618_v46, %v6010_v20  ;;  %v7969_v40 = vld [vmem:[#allocation81_spill] sm:$0xff]  ;;  %v7970_v10 = vld [vmem:[#allocation82_spill] sm:$0xff] }
  0xc6   :  { %7960 = vst [vmem:[#allocation76_spill] sm:$0xff] %v6095_v7  ;;  %7961 = vst [vmem:[#allocation80_spill] sm:$0xff] %v6098_v23  ;;  %v6110_v30 = vrot.slane %v1632_v29, %v6010_v20  ;;  %v1646_v2 = vrot.slane %v7966_v16, %v6010_v20  ;;  %v1660_v7 = vrot.slane %v7967_v21, %v6010_v20  ;;  %v7971_v46 = vld [vmem:[#allocation85_spill] sm:$0xff]  ;;  %v7972_v29 = vld [vmem:[#allocation86_spill] sm:$0xff] }
  0xc7   :  { %7962 = vst [vmem:[#allocation83_spill] sm:$0xff] %v6101_v25  ;;  %7963 = vst [vmem:[#allocation84_spill] sm:$0xff] %v6104_v31  ;;  %v1674_v23 = vrot.slane %v7968_v22, %v6010_v20  ;;  %v1688_v25 = vrot.slane %v7969_v40, %v6010_v20  ;;  %v1702_v31 = vrot.slane %v7970_v10, %v6010_v20  ;;  %v7973_v16 = vld [vmem:[#allocation87_spill] sm:$0xff] }
  0xc8   :  { %7964 = vst [vmem:[#allocation89_spill] sm:$0xff] %v6107_v56  ;;  %7965 = vst [vmem:[#allocation2_spill] sm:$0xff] %v6110_v30  ;;  %v1716_v56 = vrot.slane %v7971_v46, %v6010_v20  ;;  %v1730_v30 = vrot.slane %v7972_v29, %v6010_v20  ;;  %v1744_v57 = vrot.slane %v7973_v16, %v6010_v20 }
  0xc9   :  { %v6129_v21 = vrot.slane %v1646_v2, %v6010_v20  ;;  %v6132_v22 = vrot.slane %v1660_v7, %v6010_v20  ;;  %v6135_v40 = vrot.slane %v1674_v23, %v6010_v20  ;;  %v6138_v10 = vrot.slane %v1688_v25, %v6010_v20  ;;  %v7982_v7 = vld [vmem:[#allocation88_spill] sm:$0xff]  ;;  %v7983_v23 = vld [vmem:[#allocation90_spill] sm:$0xff]  ;;  %v7984_v25 = vld [vmem:[#allocation91_spill] sm:$0xff] }
  0xca   :  { %v6141_v46 = vrot.slane %v1702_v31, %v6010_v20  ;;  %v6144_v29 = vrot.slane %v1716_v56, %v6010_v20  ;;  %v6147_v16 = vrot.slane %v1730_v30, %v6010_v20  ;;  %v6150_v2 = vrot.slane %v1744_v57, %v6010_v20  ;;  %v7985_v31 = vld [vmem:[#allocation92_spill] sm:$0xff]  ;;  %v7986_v56 = vld [vmem:[#allocation6_spill] sm:$0xff]  ;;  %v7987_v30 = vld [vmem:[#allocation7_spill] sm:$0xff] }
  0xcb   :  { %7974 = vst [vmem:[#allocation3_spill] sm:$0xff] %v6129_v21  ;;  %7975 = vst [vmem:[#allocation4_spill] sm:$0xff] %v6132_v22  ;;  %v1758_v22 = vrot.slane %v7982_v7, %v6010_v20  ;;  %v7988_v57 = vld [vmem:[#allocation8_spill] sm:$0xff]  ;;  %v7989_v7 = vld [vmem:[#allocation9_spill] sm:$0xff] }
  0xcc   :  { %7976 = vst [vmem:[#allocation5_spill] sm:$0xff] %v6135_v40  ;;  %7977 = vst [vmem:[#allocation73_spill] sm:$0xff] %v6138_v10  ;;  %v1772_v40 = vrot.slane %v7983_v23, %v6010_v20  ;;  %v1786_v10 = vrot.slane %v7984_v25, %v6010_v20  ;;  %v1856_v21 = vrot.slane %v7989_v7, %v6010_v20 }
  0xcd   :  { %7978 = vst [vmem:[#allocation77_spill] sm:$0xff] %v6141_v46  ;;  %7979 = vst [vmem:[#allocation78_spill] sm:$0xff] %v6144_v29  ;;  %v1800_v46 = vrot.slane %v7985_v31, %v6010_v20  ;;  %v1814_v29 = vrot.slane %v7986_v56, %v6010_v20  ;;  %v6169_v23 = vrot.slane %v1758_v22, %v6010_v20 }
  0xce   :  { %7980 = vst [vmem:[#allocation79_spill] sm:$0xff] %v6147_v16  ;;  %7981 = vst [vmem:[#allocation81_spill] sm:$0xff] %v6150_v2  ;;  %v1828_v16 = vrot.slane %v7987_v30, %v6010_v20  ;;  %v1842_v2 = vrot.slane %v7988_v57, %v6010_v20  ;;  %v6172_v25 = vrot.slane %v1772_v40, %v6010_v20  ;;  %v7998_v40 = vld [vmem:[#allocation10_spill] sm:$0xff] }
  0xcf   :  { %7990 = vst [vmem:[#allocation82_spill] sm:$0xff] %v6169_v23  ;;  %v6175_v31 = vrot.slane %v1786_v10, %v6010_v20  ;;  %v6178_v56 = vrot.slane %v1800_v46, %v6010_v20  ;;  %v6181_v30 = vrot.slane %v1814_v29, %v6010_v20  ;;  %v6190_v22 = vrot.slane %v1856_v21, %v6010_v20  ;;  %v7999_v10 = vld [vmem:[#allocation11_spill] sm:$0xff]  ;;  %v8000_v46 = vld [vmem:[#allocation12_spill] sm:$0xff]  ;;  %v8001_v29 = vld [vmem:[#allocation13_spill] sm:$0xff] }
  0xd0   :  { %7991 = vst [vmem:[#allocation85_spill] sm:$0xff] %v6172_v25  ;;  %v6184_v57 = vrot.slane %v1828_v16, %v6010_v20  ;;  %v6187_v7 = vrot.slane %v1842_v2, %v6010_v20  ;;  %v1870_v25 = vrot.slane %v7998_v40, %v6010_v20  ;;  %v8002_v16 = vld [vmem:[#allocation14_spill] sm:$0xff]  ;;  %v8003_v2 = vld [vmem:[#allocation15_spill] sm:$0xff]  ;;  %v8004_v21 = vld [vmem:[#allocation16_spill] sm:$0xff] }
  0xd1   :  { %7992 = vst [vmem:[#allocation86_spill] sm:$0xff] %v6175_v31  ;;  %7993 = vst [vmem:[#allocation87_spill] sm:$0xff] %v6178_v56  ;;  %v1884_v31 = vrot.slane %v7999_v10, %v6010_v20  ;;  %v1898_v56 = vrot.slane %v8000_v46, %v6010_v20  ;;  %v8005_v40 = vld [vmem:[#allocation17_spill] sm:$0xff] }
  0xd2   :  { %7994 = vst [vmem:[#allocation88_spill] sm:$0xff] %v6181_v30  ;;  %7995 = vst [vmem:[#allocation90_spill] sm:$0xff] %v6184_v57  ;;  %v1912_v30 = vrot.slane %v8001_v29, %v6010_v20  ;;  %v1926_v57 = vrot.slane %v8002_v16, %v6010_v20  ;;  %v1968_v23 = vrot.slane %v8005_v40, %v6010_v20 }
  0xd3   :  { %7996 = vst [vmem:[#allocation91_spill] sm:$0xff] %v6187_v7  ;;  %7997 = vst [vmem:[#allocation92_spill] sm:$0xff] %v6190_v22  ;;  %v1940_v7 = vrot.slane %v8003_v2, %v6010_v20  ;;  %v1954_v22 = vrot.slane %v8004_v21, %v6010_v20  ;;  %v6209_v10 = vrot.slane %v1870_v25, %v6010_v20 }
  0xd4   :  { %v6212_v46 = vrot.slane %v1884_v31, %v6010_v20  ;;  %v6215_v29 = vrot.slane %v1898_v56, %v6010_v20  ;;  %v6218_v16 = vrot.slane %v1912_v30, %v6010_v20  ;;  %v6221_v2 = vrot.slane %v1926_v57, %v6010_v20  ;;  %v8014_v31 = vld [vmem:[#allocation18_spill] sm:$0xff]  ;;  %v8015_v56 = vld [vmem:[#allocation19_spill] sm:$0xff]  ;;  %v8016_v30 = vld [vmem:[#allocation20_spill] sm:$0xff] }
  0xd5   :  { %8006 = vst [vmem:[#allocation6_spill] sm:$0xff] %v6209_v10  ;;  %v6224_v21 = vrot.slane %v1940_v7, %v6010_v20  ;;  %v6227_v40 = vrot.slane %v1954_v22, %v6010_v20  ;;  %v6230_v25 = vrot.slane %v1968_v23, %v6010_v20  ;;  %v8017_v57 = vld [vmem:[#allocation21_spill] sm:$0xff]  ;;  %v8018_v7 = vld [vmem:[#allocation22_spill] sm:$0xff]  ;;  %v8019_v22 = vld [vmem:[#allocation23_spill] sm:$0xff] }
  0xd6   :  { %8007 = vst [vmem:[#allocation7_spill] sm:$0xff] %v6212_v46  ;;  %8008 = vst [vmem:[#allocation8_spill] sm:$0xff] %v6215_v29  ;;  %v1982_v46 = vrot.slane %v8014_v31, %v6010_v20  ;;  %v1996_v29 = vrot.slane %v8015_v56, %v6010_v20  ;;  %v8020_v23 = vld [vmem:[#allocation24_spill] sm:$0xff]  ;;  %v8021_v31 = vld [vmem:[#allocation25_spill] sm:$0xff] }
  0xd7   :  { %8009 = vst [vmem:[#allocation9_spill] sm:$0xff] %v6218_v16  ;;  %8010 = vst [vmem:[#allocation10_spill] sm:$0xff] %v6221_v2  ;;  %v2010_v16 = vrot.slane %v8016_v30, %v6010_v20  ;;  %v2024_v2 = vrot.slane %v8017_v57, %v6010_v20  ;;  %v2080_v10 = vrot.slane %v8021_v31, %v6010_v20 }
  0xd8   :  { %8011 = vst [vmem:[#allocation11_spill] sm:$0xff] %v6224_v21  ;;  %8012 = vst [vmem:[#allocation12_spill] sm:$0xff] %v6227_v40  ;;  %v2038_v21 = vrot.slane %v8018_v7, %v6010_v20  ;;  %v2052_v40 = vrot.slane %v8019_v22, %v6010_v20  ;;  %v6249_v56 = vrot.slane %v1982_v46, %v6010_v20 }
  0xd9   :  { %8013 = vst [vmem:[#allocation13_spill] sm:$0xff] %v6230_v25  ;;  %v2066_v25 = vrot.slane %v8020_v23, %v6010_v20  ;;  %v6252_v30 = vrot.slane %v1996_v29, %v6010_v20  ;;  %v6255_v57 = vrot.slane %v2010_v16, %v6010_v20  ;;  %v6258_v7 = vrot.slane %v2024_v2, %v6010_v20  ;;  %v8030_v29 = vld [vmem:[#allocation26_spill] sm:$0xff]  ;;  %v8031_v16 = vld [vmem:[#allocation27_spill] sm:$0xff]  ;;  %v8032_v2 = vld [vmem:[#allocation28_spill] sm:$0xff] }
  0xda   :  { %8022 = vst [vmem:[#allocation14_spill] sm:$0xff] %v6249_v56  ;;  %v6261_v22 = vrot.slane %v2038_v21, %v6010_v20  ;;  %v6264_v23 = vrot.slane %v2052_v40, %v6010_v20  ;;  %v6270_v46 = vrot.slane %v2080_v10, %v6010_v20  ;;  %v8033_v21 = vld [vmem:[#allocation29_spill] sm:$0xff]  ;;  %v8034_v40 = vld [vmem:[#allocation30_spill] sm:$0xff]  ;;  %v8036_v10 = vld [vmem:[#allocation32_spill] sm:$0xff] }
  0xdb   :  { %8023 = vst [vmem:[#allocation15_spill] sm:$0xff] %v6252_v30  ;;  %8024 = vst [vmem:[#allocation16_spill] sm:$0xff] %v6255_v57  ;;  %v6267_v31 = vrot.slane %v2066_v25, %v6010_v20  ;;  %v2094_v30 = vrot.slane %v8030_v29, %v6010_v20  ;;  %v2108_v57 = vrot.slane %v8031_v16, %v6010_v20  ;;  %v8035_v25 = vld [vmem:[#allocation31_spill] sm:$0xff]  ;;  %v8037_v29 = vld [vmem:[#allocation33_spill] sm:$0xff] }
  0xdc   :  { %8025 = vst [vmem:[#allocation17_spill] sm:$0xff] %v6258_v7  ;;  %8026 = vst [vmem:[#allocation18_spill] sm:$0xff] %v6261_v22  ;;  %v2122_v7 = vrot.slane %v8032_v2, %v6010_v20  ;;  %v2136_v22 = vrot.slane %v8033_v21, %v6010_v20  ;;  %v2192_v56 = vrot.slane %v8037_v29, %v6010_v20 }
  0xdd   :  { %8027 = vst [vmem:[#allocation19_spill] sm:$0xff] %v6264_v23  ;;  %8028 = vst [vmem:[#allocation20_spill] sm:$0xff] %v6267_v31  ;;  %v2150_v23 = vrot.slane %v8034_v40, %v6010_v20  ;;  %v2164_v31 = vrot.slane %v8035_v25, %v6010_v20  ;;  %v6289_v16 = vrot.slane %v2094_v30, %v6010_v20 }
  0xde   :  { %8029 = vst [vmem:[#allocation21_spill] sm:$0xff] %v6270_v46  ;;  %v2178_v46 = vrot.slane %v8036_v10, %v6010_v20  ;;  %v6292_v2 = vrot.slane %v2108_v57, %v6010_v20  ;;  %v6295_v21 = vrot.slane %v2122_v7, %v6010_v20  ;;  %v6298_v40 = vrot.slane %v2136_v22, %v6010_v20  ;;  %v8046_v57 = vld [vmem:[#allocation34_spill] sm:$0xff]  ;;  %v8047_v7 = vld [vmem:[#allocation35_spill] sm:$0xff]  ;;  %v8048_v22 = vld [vmem:[#allocation36_spill] sm:$0xff] }
  0xdf   :  { %8038 = vst [vmem:[#allocation22_spill] sm:$0xff] %v6289_v16  ;;  %v6301_v25 = vrot.slane %v2150_v23, %v6010_v20  ;;  %v6304_v10 = vrot.slane %v2164_v31, %v6010_v20  ;;  %v6310_v30 = vrot.slane %v2192_v56, %v6010_v20  ;;  %v8049_v23 = vld [vmem:[#allocation37_spill] sm:$0xff]  ;;  %v8050_v31 = vld [vmem:[#allocation38_spill] sm:$0xff]  ;;  %v8052_v56 = vld [vmem:[#allocation40_spill] sm:$0xff] }
  0xe0   :  { %8039 = vst [vmem:[#allocation23_spill] sm:$0xff] %v6292_v2  ;;  %8040 = vst [vmem:[#allocation24_spill] sm:$0xff] %v6295_v21  ;;  %v6307_v29 = vrot.slane %v2178_v46, %v6010_v20  ;;  %v2206_v2 = vrot.slane %v8046_v57, %v6010_v20  ;;  %v2220_v21 = vrot.slane %v8047_v7, %v6010_v20  ;;  %v8051_v46 = vld [vmem:[#allocation39_spill] sm:$0xff]  ;;  %v8053_v57 = vld [vmem:[#allocation41_spill] sm:$0xff] }
  0xe1   :  { %8041 = vst [vmem:[#allocation25_spill] sm:$0xff] %v6298_v40  ;;  %8042 = vst [vmem:[#allocation26_spill] sm:$0xff] %v6301_v25  ;;  %v2234_v40 = vrot.slane %v8048_v22, %v6010_v20  ;;  %v2248_v25 = vrot.slane %v8049_v23, %v6010_v20  ;;  %v2304_v16 = vrot.slane %v8053_v57, %v6010_v20 }
  0xe2   :  { %8043 = vst [vmem:[#allocation27_spill] sm:$0xff] %v6304_v10  ;;  %8044 = vst [vmem:[#allocation28_spill] sm:$0xff] %v6307_v29  ;;  %v2262_v10 = vrot.slane %v8050_v31, %v6010_v20  ;;  %v2276_v29 = vrot.slane %v8051_v46, %v6010_v20  ;;  %v6329_v7 = vrot.slane %v2206_v2, %v6010_v20 }
  0xe3   :  { %8045 = vst [vmem:[#allocation29_spill] sm:$0xff] %v6310_v30  ;;  %v2290_v30 = vrot.slane %v8052_v56, %v6010_v20  ;;  %v6332_v22 = vrot.slane %v2220_v21, %v6010_v20  ;;  %v6335_v23 = vrot.slane %v2234_v40, %v6010_v20  ;;  %v6338_v31 = vrot.slane %v2248_v25, %v6010_v20  ;;  %v8062_v21 = vld [vmem:[#allocation42_spill] sm:$0xff]  ;;  %v8063_v40 = vld [vmem:[#allocation43_spill] sm:$0xff]  ;;  %v8064_v25 = vld [vmem:[#allocation44_spill] sm:$0xff] }
  0xe4   :  { %8054 = vst [vmem:[#allocation30_spill] sm:$0xff] %v6329_v7  ;;  %v6341_v46 = vrot.slane %v2262_v10, %v6010_v20  ;;  %v6344_v56 = vrot.slane %v2276_v29, %v6010_v20  ;;  %v6350_v2 = vrot.slane %v2304_v16, %v6010_v20  ;;  %v8065_v10 = vld [vmem:[#allocation45_spill] sm:$0xff]  ;;  %v8066_v29 = vld [vmem:[#allocation46_spill] sm:$0xff]  ;;  %v8068_v16 = vld [vmem:[#allocation48_spill] sm:$0xff] }
  0xe5   :  { %8055 = vst [vmem:[#allocation31_spill] sm:$0xff] %v6332_v22  ;;  %8056 = vst [vmem:[#allocation32_spill] sm:$0xff] %v6335_v23  ;;  %v6347_v57 = vrot.slane %v2290_v30, %v6010_v20  ;;  %v2318_v22 = vrot.slane %v8062_v21, %v6010_v20  ;;  %v2332_v23 = vrot.slane %v8063_v40, %v6010_v20  ;;  %v8067_v30 = vld [vmem:[#allocation47_spill] sm:$0xff]  ;;  %v8069_v21 = vld [vmem:[#allocation49_spill] sm:$0xff] }
  0xe6   :  { %8057 = vst [vmem:[#allocation33_spill] sm:$0xff] %v6338_v31  ;;  %8058 = vst [vmem:[#allocation34_spill] sm:$0xff] %v6341_v46  ;;  %v2346_v31 = vrot.slane %v8064_v25, %v6010_v20  ;;  %v2360_v46 = vrot.slane %v8065_v10, %v6010_v20  ;;  %v2416_v7 = vrot.slane %v8069_v21, %v6010_v20 }
  0xe7   :  { %8059 = vst [vmem:[#allocation35_spill] sm:$0xff] %v6344_v56  ;;  %8060 = vst [vmem:[#allocation36_spill] sm:$0xff] %v6347_v57  ;;  %v2374_v56 = vrot.slane %v8066_v29, %v6010_v20  ;;  %v2388_v57 = vrot.slane %v8067_v30, %v6010_v20  ;;  %v6369_v40 = vrot.slane %v2318_v22, %v6010_v20 }
  0xe8   :  { %8061 = vst [vmem:[#allocation37_spill] sm:$0xff] %v6350_v2  ;;  %v2402_v2 = vrot.slane %v8068_v16, %v6010_v20  ;;  %v6372_v25 = vrot.slane %v2332_v23, %v6010_v20  ;;  %v6375_v10 = vrot.slane %v2346_v31, %v6010_v20  ;;  %v6378_v29 = vrot.slane %v2360_v46, %v6010_v20  ;;  %v8078_v23 = vld [vmem:[#allocation50_spill] sm:$0xff]  ;;  %v8079_v31 = vld [vmem:[#allocation51_spill] sm:$0xff]  ;;  %v8080_v46 = vld [vmem:[#allocation52_spill] sm:$0xff] }
  0xe9   :  { %8070 = vst [vmem:[#allocation38_spill] sm:$0xff] %v6369_v40  ;;  %v6381_v30 = vrot.slane %v2374_v56, %v6010_v20  ;;  %v6384_v16 = vrot.slane %v2388_v57, %v6010_v20  ;;  %v6390_v22 = vrot.slane %v2416_v7, %v6010_v20  ;;  %v8081_v56 = vld [vmem:[#allocation53_spill] sm:$0xff]  ;;  %v8082_v57 = vld [vmem:[#allocation54_spill] sm:$0xff]  ;;  %v8083_v7 = vld [vmem:[#allocation55_spill] sm:$0xff] }
  0xea   :  { %8071 = vst [vmem:[#allocation39_spill] sm:$0xff] %v6372_v25  ;;  %8072 = vst [vmem:[#allocation40_spill] sm:$0xff] %v6375_v10  ;;  %v6387_v21 = vrot.slane %v2402_v2, %v6010_v20  ;;  %v2430_v25 = vrot.slane %v8078_v23, %v6010_v20  ;;  %v2444_v10 = vrot.slane %v8079_v31, %v6010_v20  ;;  %v8084_v23 = vld [vmem:[#allocation56_spill] sm:$0xff] }
  0xeb   :  { %8073 = vst [vmem:[#allocation41_spill] sm:$0xff] %v6378_v29  ;;  %8074 = vst [vmem:[#allocation42_spill] sm:$0xff] %v6381_v30  ;;  %v2458_v29 = vrot.slane %v8080_v46, %v6010_v20  ;;  %v2472_v30 = vrot.slane %v8081_v56, %v6010_v20  ;;  %v2500_v2 = vrot.slane %v5777_v12, %v6010_v20 }
  0xec   :  { %8075 = vst [vmem:[#allocation43_spill] sm:$0xff] %v6384_v16  ;;  %8076 = vst [vmem:[#allocation44_spill] sm:$0xff] %v6387_v21  ;;  %v2486_v16 = vrot.slane %v8082_v57, %v6010_v20  ;;  %v2528_v21 = vrot.slane %v8084_v23, %v6010_v20  ;;  %v6409_v31 = vrot.slane %v2430_v25, %v6010_v20 }
  0xed   :  { %8077 = vst [vmem:[#allocation45_spill] sm:$0xff] %v6390_v22  ;;  %v2514_v22 = vrot.slane %v8083_v7, %v6010_v20  ;;  %v6412_v46 = vrot.slane %v2444_v10, %v6010_v20  ;;  %v6415_v56 = vrot.slane %v2458_v29, %v6010_v20  ;;  %v6418_v57 = vrot.slane %v2472_v30, %v6010_v20  ;;  %v8089_v10 = vld [vmem:[#allocation57_spill] sm:$0xff] }
  0xee   :  { %v6421_v12 = vrot.slane %v2486_v16, %v6010_v20  ;;  %v6424_v7 = vrot.slane %v2500_v2, %v6010_v20  ;;  %v6430_v25 = vrot.slane %v2528_v21, %v6010_v20  ;;  %v2556_v29 = vrot.slane %v5797_v61, %v6010_v20  ;;  %v8090_v2 = vld [vmem:[#allocation58_spill] sm:$0xff]  ;;  %v8182_v55 = vld [vmem:[#allocation35_spill] sm:$0xff] }
  0xef   :  { %8085 = vst [vmem:[#allocation46_spill] sm:$0xff] %v6412_v46  ;;  %v6427_v23 = vrot.slane %v2514_v22, %v6010_v20  ;;  %v2542_v46 = vrot.slane %v8089_v10, %v6010_v20  ;;  %v2570_v30 = vrot.slane %v5802_v42, %v6010_v20  ;;  %v2584_v16 = vrot.slane %v5807_v3, %v6010_v20  ;;  %v8091_v10 = vld [vmem:[#allocation59_spill] sm:$0xff] }
  0xf0   :  { %8086 = vst [vmem:[#allocation47_spill] sm:$0xff] %v6424_v7  ;;  %8088 = vst [vmem:[#allocation49_spill] sm:$0xff] %v6430_v25  ;;  %v2598_v7 = vrot.slane %v8090_v2, %v6010_v20  ;;  %v2612_v22 = vrot.slane %v5817_v5, %v6010_v20  ;;  %v2626_v21 = vrot.slane %v5822_v9, %v6010_v20 }
  0xf1   :  { %8087 = vst [vmem:[#allocation48_spill] sm:$0xff] %v6427_v23  ;;  %v2640_v25 = vrot.slane %v8091_v10, %v6010_v20  ;;  %v6449_v61 = vrot.slane %v2542_v46, %v6010_v20  ;;  %v6452_v42 = vrot.slane %v2556_v29, %v6010_v20  ;;  %v6455_v3 = vrot.slane %v2570_v30, %v6010_v20  ;;  %v8094_v29 = vld [vmem:[#allocation60_spill] sm:$0xff] }
  0xf2   :  { %v6458_v2 = vrot.slane %v2584_v16, %v6010_v20  ;;  %v6461_v5 = vrot.slane %v2598_v7, %v6010_v20  ;;  %v6464_v9 = vrot.slane %v2612_v22, %v6010_v20  ;;  %v6467_v10 = vrot.slane %v2626_v21, %v6010_v20  ;;  %v8186_v47 = vld [vmem:[#allocation40_spill] sm:$0xff]  ;;  %v8187_v51 = vld [vmem:[#allocation41_spill] sm:$0xff] }
  0xf3   :  { %8092 = vst [vmem:[#allocation50_spill] sm:$0xff] %v6452_v42  ;;  %v6470_v46 = vrot.slane %v2640_v25, %v6010_v20  ;;  %v2654_v42 = vrot.slane %v8094_v29, %v6010_v20  ;;  %v2668_v30 = vrot.slane %v5837_v59, %v6010_v20  ;;  %v2682_v16 = vrot.slane %v5842_v32, %v6010_v20  ;;  %v8189_v44 = vld [vmem:[#allocation43_spill] sm:$0xff] }
  0xf4   :  { %v2696_v7 = vrot.slane %v5847_v38, %v6010_v20  ;;  %v2710_v22 = vrot.slane %v5852_v0, %v6010_v20  ;;  %v2724_v21 = vrot.slane %v5857_v4, %v6010_v20  ;;  %v2738_v25 = vrot.slane %v5862_v36, %v6010_v20  ;;  %v8191_v54 = vld [vmem:[#allocation45_spill] sm:$0xff] }
  0xf5   :  { %8093 = vst [vmem:[#allocation51_spill] sm:$0xff] %v6470_v46  ;;  %v2752_v29 = vrot.slane %v5867_v24, %v6010_v20  ;;  %v6489_v59 = vrot.slane %v2654_v42, %v6010_v20  ;;  %v6492_v32 = vrot.slane %v2668_v30, %v6010_v20  ;;  %v6495_v38 = vrot.slane %v2682_v16, %v6010_v20  ;;  %v8097_v30 = vld [vmem:[#allocation61_spill] sm:$0xff] }
  0xf6   :  { %v6498_v0 = vrot.slane %v2696_v7, %v6010_v20  ;;  %v6501_v4 = vrot.slane %v2710_v22, %v6010_v20  ;;  %v6504_v36 = vrot.slane %v2724_v21, %v6010_v20  ;;  %v6507_v24 = vrot.slane %v2738_v25, %v6010_v20 }
  0xf7   :  { %8095 = vst [vmem:[#allocation52_spill] sm:$0xff] %v6489_v59  ;;  %8096 = vst [vmem:[#allocation53_spill] sm:$0xff] %v6492_v32  ;;  %v6510_v42 = vrot.slane %v2752_v29, %v6010_v20  ;;  %v2766_v32 = vrot.slane %v8097_v30, %v6010_v20  ;;  %v2780_v16 = vrot.slane %v5877_v41, %v6010_v20  ;;  %v8193_v40 = vld [vmem:[#allocation47_spill] sm:$0xff]  ;;  %v8194_v27 = vld [vmem:[#allocation49_spill] sm:$0xff] }
  0xf8   :  { %v2794_v7 = vrot.slane %v5882_v18, %v6010_v20  ;;  %v2808_v22 = vrot.slane %v5887_v35, %v6010_v20  ;;  %v2822_v21 = vrot.slane %v5892_v33, %v6010_v20  ;;  %v2836_v25 = vrot.slane %v5897_v49, %v6010_v20  ;;  %v8218_v59 = vld [vmem:[#allocation72_spill] sm:$0xff] }
  0xf9   :  { %v2850_v29 = vrot.slane %v5902_v50, %v6010_v20  ;;  %v2864_v30 = vrot.slane %v5907_v43, %v6010_v20  ;;  %v6529_v41 = vrot.slane %v2766_v32, %v6010_v20  ;;  %v6532_v18 = vrot.slane %v2780_v16, %v6010_v20  ;;  %v8101_v16 = vld [vmem:[#allocation62_spill] sm:$0xff] }
  0xfa   :  { %v6535_v35 = vrot.slane %v2794_v7, %v6010_v20  ;;  %v6538_v33 = vrot.slane %v2808_v22, %v6010_v20  ;;  %v6541_v49 = vrot.slane %v2822_v21, %v6010_v20  ;;  %v6544_v50 = vrot.slane %v2836_v25, %v6010_v20  ;;  %v8102_v7 = vld [vmem:[#allocation63_spill] sm:$0xff]  ;;  %v8103_v22 = vld [vmem:[#allocation64_spill] sm:$0xff]  ;;  %v8195_v45 = vld [vmem:[#allocation50_spill] sm:$0xff] }
  0xfb   :  { %8098 = vst [vmem:[#allocation54_spill] sm:$0xff] %v6532_v18  ;;  %v6547_v43 = vrot.slane %v2850_v29, %v6010_v20  ;;  %v6550_v32 = vrot.slane %v2864_v30, %v6010_v20  ;;  %v2878_v18 = vrot.slane %v8101_v16, %v6010_v20  ;;  %v2920_v21 = vrot.slane %v5927_v52, %v6010_v20 }
  0xfc   :  { %8099 = vst [vmem:[#allocation55_spill] sm:$0xff] %v6535_v35  ;;  %8100 = vst [vmem:[#allocation56_spill] sm:$0xff] %v6538_v33  ;;  %v2892_v35 = vrot.slane %v8102_v7, %v6010_v20  ;;  %v2906_v33 = vrot.slane %v8103_v22, %v6010_v20  ;;  %v2934_v25 = vrot.slane %v5932_v39, %v6010_v20 }
  0xfd   :  { %v2948_v29 = vrot.slane %v5937_v53, %v6010_v20  ;;  %v2962_v30 = vrot.slane %v5943_v34, %v6010_v20  ;;  %v2976_v16 = vrot.slane %v5948_v60, %v6010_v20  ;;  %v6569_v7 = vrot.slane %v2878_v18, %v6010_v20 }
  0xfe   :  { %v6572_v22 = vrot.slane %v2892_v35, %v6010_v20  ;;  %v6575_v52 = vrot.slane %v2906_v33, %v6010_v20  ;;  %v6578_v39 = vrot.slane %v2920_v21, %v6010_v20  ;;  %v6581_v53 = vrot.slane %v2934_v25, %v6010_v20 }
  0xff   :  { %8104 = vst [vmem:[#allocation57_spill] sm:$0xff] %v6569_v7  ;;  %v6584_v34 = vrot.slane %v2948_v29, %v6010_v20  ;;  %v6587_v60 = vrot.slane %v2962_v30, %v6010_v20  ;;  %v6590_v18 = vrot.slane %v2976_v16, %v6010_v20  ;;  %v2990_v35 = vrot.slane %v5953_v17, %v6010_v20 }
 0x100   :  { %8105 = vst [vmem:[#allocation58_spill] sm:$0xff] %v6572_v22  ;;  %8106 = vst [vmem:[#allocation59_spill] sm:$0xff] %v6575_v52  ;;  %v3004_v33 = vrot.slane %v5958_v19, %v6010_v20  ;;  %v3018_v21 = vrot.slane %v5963_v63, %v6010_v20  ;;  %v3032_v25 = vrot.slane %v5968_v13, %v6010_v20  ;;  %v8234_v52 = vld [vmem:[#allocation89_spill] sm:$0xff] }
 0x101   :  { %8107 = vst [vmem:[#allocation60_spill] sm:$0xff] %v6578_v39  ;;  %8108 = vst [vmem:[#allocation61_spill] sm:$0xff] %v6581_v53  ;;  %v3046_v29 = vrot.slane %v5973_v58, %v6010_v20  ;;  %v3060_v30 = vrot.slane %v5978_v8, %v6010_v20  ;;  %v3074_v16 = vrot.slane %v5983_v62, %v6010_v20 }
 0x102   :  { %8109 = vst [vmem:[#allocation62_spill] sm:$0xff] %v6584_v34  ;;  %8110 = vst [vmem:[#allocation63_spill] sm:$0xff] %v6587_v60  ;;  %v3088_v17 = vrot.slane %v5988_v37, %v6010_v20  ;;  %v6609_v19 = vrot.slane %v2990_v35, %v6010_v20  ;;  %v6612_v63 = vrot.slane %v3004_v33, %v6010_v20 }
 0x103   :  { %8111 = vst [vmem:[#allocation64_spill] sm:$0xff] %v6590_v18  ;;  %v6615_v13 = vrot.slane %v3018_v21, %v6010_v20  ;;  %v6618_v58 = vrot.slane %v3032_v25, %v6010_v20  ;;  %v6621_v8 = vrot.slane %v3046_v29, %v6010_v20  ;;  %v6624_v62 = vrot.slane %v3060_v30, %v6010_v20 }
 0x104   :  { %8112 = vst [vmem:[#allocation93_spill] sm:$0xff] %v6609_v19  ;;  %8113 = vst [vmem:[#allocation94_spill] sm:$0xff] %v6612_v63  ;;  %v6627_v37 = vrot.slane %v3074_v16, %v6010_v20  ;;  %v6630_v35 = vrot.slane %v3088_v17, %v6010_v20  ;;  %v3102_v33 = vrot.slane %v5993_v1, %v6010_v20  ;;  %v8214_v19 = vld [vmem:[#allocation70_spill] sm:$0xff]  ;;  %v8216_v63 = vld [vmem:[#allocation71_spill] sm:$0xff] }
 0x105   :  { %8114 = vst [vmem:[#allocation95_spill] sm:$0xff] %v6615_v13  ;;  %8115 = vst [vmem:[#allocation96_spill] sm:$0xff] %v6618_v58  ;;  %v3116_v21 = vrot.slane %v5998_v15, %v6010_v20  ;;  %v3130_v25 = vrot.slane %v6003_v14, %v6010_v20  ;;  %v3144_v29 = vrot.slane %v6008_v28, %v6010_v20  ;;  %v8215_v46 = vunpack.c.l.b16 %v8214_v19 }
 0x106   :  { %8116 = vst [vmem:[#allocation97_spill] sm:$0xff] %v6621_v8  ;;  %8117 = vst [vmem:[#allocation98_spill] sm:$0xff] %v6624_v62  ;;  %v3158_v30 = vrot.slane %v6015_v11, %v6010_v20  ;;  %v3172_v16 = vrot.slane %v6020_v26, %v6010_v20  ;;  %v3186_v17 = vrot.slane %v6025_v48, %v6010_v20  ;;  %v8217_v58 = vunpack.c.l.b16 %v8216_v63 }
 0x107   :  { %8118 = vst [vmem:[#allocation99_spill] sm:$0xff] %v6627_v37  ;;  %8119 = vst [vmem:[#allocation100_spill] sm:$0xff] %v6630_v35  ;;  %v3200_v1 = vrot.slane %v6030_v6, %v6010_v20  ;;  %v6649_v15 = vrot.slane %v3102_v33, %v6010_v20  ;;  %v6652_v14 = vrot.slane %v3116_v21, %v6010_v20  ;;  %v8208_v35 = vld [vmem:[#allocation67_spill] sm:$0xff]  ;;  %v3348_v13 = vrot.slane %v8215_v46, 3 }
 0x108   :  { %v6655_v28 = vrot.slane %v3130_v25, %v6010_v20  ;;  %v6658_v11 = vrot.slane %v3144_v29, %v6010_v20  ;;  %v6661_v26 = vrot.slane %v3158_v30, %v6010_v20  ;;  %v6664_v48 = vrot.slane %v3172_v16, %v6010_v20  ;;  %v8206_v25 = vld [vmem:[#allocation66_spill] sm:$0xff]  ;;  %v8228_v46 = vld [vmem:[#allocation83_spill] sm:$0xff] }
 0x109   :  { %8120 = vst [vmem:[#allocation101_spill] sm:$0xff] %v6649_v15  ;;  %8121 = vst [vmem:[#allocation102_spill] sm:$0xff] %v6652_v14  ;;  %v6667_v6 = vrot.slane %v3186_v17, %v6010_v20  ;;  %v6670_v33 = vrot.slane %v3200_v1, %v6010_v20  ;;  %v8174_v20 = vld [vmem:[#allocation27_spill] sm:$0xff]  ;;  %v8197_v17 = vld [vmem:[#allocation54_spill] sm:$0xff]  ;;  %v8207_v37 = vunpack.c.l.b16 %v8206_v25  ;;  %v8209_v18 = vunpack.c.l.b16 %v8208_v35 }
 0x10a   :  { %8122 = vst [vmem:[#allocation103_spill] sm:$0xff] %v6655_v28  ;;  %8123 = vst [vmem:[#allocation104_spill] sm:$0xff] %v6658_v11  ;;  %v8198_v11 = vld [vmem:[#allocation55_spill] sm:$0xff]  ;;  %v8199_v1 = vld [vmem:[#allocation56_spill] sm:$0xff]  ;;  %v3351_v8 = vrot.slane %v8217_v58, 2  ;;  %v8219_v62 = vunpack.c.l.b16 %v8218_v59  ;;  %v8229_v7 = vunpack.c.l.b16 %v8228_v46 }
 0x10b   :  { %8124 = vst [vmem:[#allocation105_spill] sm:$0xff] %v6661_v26  ;;  %8125 = vst [vmem:[#allocation106_spill] sm:$0xff] %v6664_v48  ;;  %v8192_v48 = vld [vmem:[#allocation46_spill] sm:$0xff]  ;;  %v3336_v28 = vrot.slane %v8207_v37, 7  ;;  %v3339_v29 = vrot.slane %v8209_v18, 6  ;;  %v8210_v15 = vld [vmem:[#allocation68_spill] sm:$0xff] }
 0x10c   :  { %8126 = vst [vmem:[#allocation107_spill] sm:$0xff] %v6667_v6  ;;  %8127 = vst [vmem:[#allocation108_spill] sm:$0xff] %v6670_v33  ;;  %v8184_v6 = vld [vmem:[#allocation37_spill] sm:$0xff]  ;;  %v8185_v33 = vld [vmem:[#allocation39_spill] sm:$0xff]  ;;  %v8211_v30 = vunpack.c.l.b16 %v8210_v15  ;;  %v3354_v23 = vrot.slane %v8219_v62, 1  ;;  %v3363_v63 = vrot.slane %v8229_v7, 4 }
 0x10d   :  { %v8212_v26 = vld [vmem:[#allocation69_spill] sm:$0xff]  ;;  %v8220_v25 = vld [vmem:[#allocation75_spill] sm:$0xff]  ;;  %v8230_v59 = vld [vmem:[#allocation74_spill] sm:$0xff] }
 0x10e   :  { %v3342_v14 = vrot.slane %v8211_v30, 5  ;;  %v8213_v21 = vunpack.c.l.b16 %v8212_v26  ;;  %v8221_v37 = vunpack.c.l.b16 %v8220_v25  ;;  %v8222_v35 = vld [vmem:[#allocation65_spill] sm:$0xff]  ;;  %v8224_v30 = vld [vmem:[#allocation76_spill] sm:$0xff]  ;;  %v8231_v62 = vunpack.c.l.b16 %v8230_v59 }
 0x10f   :  { %v8223_v18 = vunpack.c.l.b16 %v8222_v35  ;;  %v8225_v34 = vunpack.c.l.b16 %v8224_v30  ;;  %v8238_v7 = vld [vmem:[#allocation4_spill] sm:$0xff]  ;;  %v8240_v59 = vld [vmem:[#allocation5_spill] sm:$0xff] }
 0x110   :  { %v3345_v16 = vrot.slane %v8213_v21, 4  ;;  %v3357_v60 = vrot.slane %v8221_v37, 7  ;;  %v8226_v21 = vld [vmem:[#allocation80_spill] sm:$0xff]  ;;  %v8239_v22 = vunpack.c.l.b16 %v8238_v7 }
 0x111   :  { %v3338_v15 = vsel %vm3337_vm0, %v3336_v28, %v8223_v18  ;;  %v3359_v26 = vrot.slane %v8225_v34, 6  ;;  %v8227_v53 = vunpack.c.l.b16 %v8226_v21  ;;  %v8232_v37 = vld [vmem:[#allocation84_spill] sm:$0xff]  ;;  %v8235_v28 = vunpack.c.l.b16 %v8234_v52 }
 0x112   :  { %v3341_v58 = vsel %vm3340_vm1, %v3339_v29, %v3338_v15  ;;  %v3358_v25 = vsel %vm3337_vm0, %v3357_v60, %v8231_v62  ;;  %v8233_v39 = vunpack.c.l.b16 %v8232_v37  ;;  %v3371_v29 = vrot.slane %v8239_v22, 7  ;;  %v8242_v37 = vld [vmem:[#allocation73_spill] sm:$0xff] }
 0x113   :  { %v3361_v19 = vrot.slane %v8227_v53, 5  ;;  %v3367_v18 = vrot.slane %v8235_v28, 2  ;;  %v3344_v34 = vsel %vm3343_vm2, %v3342_v14, %v3341_v58  ;;  %v3360_v30 = vsel %vm3340_vm1, %v3359_v26, %v3358_v25  ;;  %v8236_v53 = vld [vmem:[#allocation2_spill] sm:$0xff]  ;;  %v8244_v58 = vld [vmem:[#allocation3_spill] sm:$0xff] }
 0x114   :  { %v3365_v35 = vrot.slane %v8233_v39, 3  ;;  %v8237_v21 = vunpack.c.l.b16 %v8236_v53  ;;  %v3347_v15 = vsel %vm3346_vm3, %v3345_v16, %v3344_v34  ;;  %v8241_v62 = vunpack.c.l.b16 %v8240_v59 }
 0x115   :  { %v3362_v60 = vsel %vm3343_vm2, %v3361_v19, %v3360_v30  ;;  %v8243_v52 = vunpack.c.l.b16 %v8242_v37  ;;  %v3350_v14 = vsel %vm3349_vm4, %v3348_v13, %v3347_v15  ;;  %v8245_v25 = vunpack.c.l.b16 %v8244_v58  ;;  %v8248_v30 = vld [vmem:[#allocation78_spill] sm:$0xff] }
 0x116   :  { %v3369_v46 = vrot.slane %v8237_v21, 1  ;;  %v3373_v39 = vrot.slane %v8241_v62, 6  ;;  %v3364_v26 = vsel %vm3346_vm3, %v3363_v63, %v3362_v60  ;;  %v8246_v21 = vld [vmem:[#allocation77_spill] sm:$0xff]  ;;  %v3353_v16 = vsel %vm3352_vm5, %v3351_v8, %v3350_v14 }
 0x117   :  { %v3375_v28 = vrot.slane %v8243_v52, 5  ;;  %v3372_v53 = vsel %vm3337_vm0, %v3371_v29, %v8245_v25  ;;  %v8247_v22 = vunpack.c.l.b16 %v8246_v21  ;;  %v3366_v19 = vsel %vm3349_vm4, %v3365_v35, %v3364_v26  ;;  %v8250_v29 = vld [vmem:[#allocation79_spill] sm:$0xff]  ;;  %v8252_v35 = vld [vmem:[#allocation81_spill] sm:$0xff] }
 0x118   :  { %v3374_v34 = vsel %vm3340_vm1, %v3373_v39, %v3372_v53  ;;  %v8249_v59 = vunpack.c.l.b16 %v8248_v30  ;;  %v6858_v13 = vsel %vm3355_vm6, %v3354_v23, %v3353_v16  ;;  %v3368_v63 = vsel %vm3352_vm5, %v3367_v18, %v3366_v19  ;;  %v8254_v26 = vld [vmem:[#allocation85_spill] sm:$0xff]  ;;  %v8256_v53 = vld [vmem:[#allocation86_spill] sm:$0xff]  ;;  %v8260_v19 = vld [vmem:[#allocation88_spill] sm:$0xff] }
 0x119   :  { %v3377_v7 = vrot.slane %v8247_v22, 4  ;;  %v3376_v15 = vsel %vm3343_vm2, %v3375_v28, %v3374_v34  ;;  %v8251_v60 = vunpack.c.l.b16 %v8250_v29  ;;  %v6865_v52 = vsel %vm3355_vm6, %v3369_v46, %v3368_v63  ;;  %v8258_v28 = vld [vmem:[#allocation87_spill] sm:$0xff] }
 0x11a   :  { %v3379_v62 = vrot.slane %v8249_v59, 3  ;;  %v8253_v39 = vunpack.c.l.b16 %v8252_v35  ;;  %v8255_v58 = vunpack.c.l.b16 %v8254_v26  ;;  %v8257_v18 = vunpack.c.l.b16 %v8256_v53  ;;  %v8266_v35 = vld [vmem:[#allocation91_spill] sm:$0xff] }
 0x11b   :  { %v3381_v37 = vrot.slane %v8251_v60, 2  ;;  %v3378_v8 = vsel %vm3346_vm3, %v3377_v7, %v3376_v15  ;;  %v8259_v22 = vunpack.c.l.b16 %v8258_v28  ;;  %v8261_v34 = vunpack.c.l.b16 %v8260_v19  ;;  %v8262_v7 = vld [vmem:[#allocation82_spill] sm:$0xff]  ;;  %v8271_v28 = vld [vmem:[#allocation7_spill] sm:$0xff] }
 0x11c   :  { %v3383_v14 = vrot.slane %v8253_v39, 1  ;;  %v3385_v25 = vrot.slane %v8255_v58, 7  ;;  %v3380_v23 = vsel %vm3349_vm4, %v3379_v62, %v3378_v8  ;;  %v3387_v21 = vrot.slane %v8257_v18, 6  ;;  %v8264_v15 = vld [vmem:[#allocation90_spill] sm:$0xff]  ;;  %v8269_v58 = vld [vmem:[#allocation92_spill] sm:$0xff] }
 0x11d   :  { %v3389_v16 = vrot.slane %v8259_v22, 5  ;;  %v3391_v46 = vrot.slane %v8261_v34, 4  ;;  %v3382_v30 = vsel %vm3352_vm5, %v3381_v37, %v3380_v23  ;;  %v8263_v59 = vunpack.c.l.b16 %v8262_v7  ;;  %v8275_v7 = vld [vmem:[#allocation9_spill] sm:$0xff] }
 0x11e   :  { %v8265_v29 = vunpack.c.l.b16 %v8264_v15  ;;  %v8267_v62 = vunpack.c.l.b16 %v8266_v35  ;;  %v6888_v39 = vsel %vm3355_vm6, %v3383_v14, %v3382_v30  ;;  %v8270_v53 = vunpack.c.l.b16 %v8269_v58  ;;  %v8281_v58 = vld [vmem:[#allocation11_spill] sm:$0xff] }
 0x11f   :  { %v3386_v63 = vsel %vm3337_vm0, %v3385_v25, %v8263_v59  ;;  %8268 = vst [vmem:[#allocation27_spill] sm:$0xff] %v6888_v39  ;;  %v8272_v37 = vunpack.c.l.b16 %v8271_v28  ;;  %v8273_v25 = vld [vmem:[#allocation8_spill] sm:$0xff]  ;;  %v8276_v59 = vunpack.c.l.b16 %v8275_v7  ;;  %v8285_v7 = vld [vmem:[#allocation13_spill] sm:$0xff] }
 0x120   :  { %v3393_v60 = vrot.slane %v8265_v29, 3  ;;  %v3395_v8 = vrot.slane %v8267_v62, 2  ;;  %v3388_v26 = vsel %vm3340_vm1, %v3387_v21, %v3386_v63  ;;  %v3397_v18 = vrot.slane %v8270_v53, 1  ;;  %v8277_v29 = vld [vmem:[#allocation10_spill] sm:$0xff] }
 0x121   :  { %v3399_v23 = vrot.slane %v8272_v37, 7  ;;  %v3390_v22 = vsel %vm3343_vm2, %v3389_v16, %v3388_v26  ;;  %v8274_v19 = vunpack.c.l.b16 %v8273_v25  ;;  %v3403_v15 = vrot.slane %v8276_v59, 5  ;;  %v8279_v21 = vld [vmem:[#allocation6_spill] sm:$0xff]  ;;  %v8283_v37 = vld [vmem:[#allocation12_spill] sm:$0xff] }
 0x122   :  { %v8278_v35 = vunpack.c.l.b16 %v8277_v29  ;;  %v3392_v30 = vsel %vm3346_vm3, %v3391_v46, %v3390_v22  ;;  %v8280_v63 = vunpack.c.l.b16 %v8279_v21  ;;  %v8282_v53 = vunpack.c.l.b16 %v8281_v58  ;;  %v8289_v21 = vld [vmem:[#allocation16_spill] sm:$0xff] }
 0x123   :  { %v3401_v34 = vrot.slane %v8274_v19, 6  ;;  %v8284_v16 = vunpack.c.l.b16 %v8283_v37  ;;  %v3394_v25 = vsel %vm3349_vm4, %v3393_v60, %v3392_v30  ;;  %v8286_v59 = vunpack.c.l.b16 %v8285_v7  ;;  %v8293_v30 = vld [vmem:[#allocation14_spill] sm:$0xff] }
 0x124   :  { %v3405_v14 = vrot.slane %v8278_v35, 4  ;;  %v3400_v62 = vsel %vm3337_vm0, %v3399_v23, %v8280_v63  ;;  %v3407_v28 = vrot.slane %v8282_v53, 3  ;;  %v8287_v35 = vld [vmem:[#allocation15_spill] sm:$0xff]  ;;  %v3396_v22 = vsel %vm3352_vm5, %v3395_v8, %v3394_v25  ;;  %v8291_v53 = vld [vmem:[#allocation17_spill] sm:$0xff] }
 0x125   :  { %v3409_v26 = vrot.slane %v8284_v16, 2  ;;  %v3402_v19 = vsel %vm3340_vm1, %v3401_v34, %v3400_v62  ;;  %v3411_v29 = vrot.slane %v8286_v59, 1  ;;  %v8288_v39 = vunpack.c.l.b16 %v8287_v35 }
 0x126   :  { %v3404_v23 = vsel %vm3343_vm2, %v3403_v15, %v3402_v19  ;;  %v8290_v63 = vunpack.c.l.b16 %v8289_v21  ;;  %v8292_v37 = vunpack.c.l.b16 %v8291_v53  ;;  %v6923_v60 = vsel %vm3355_vm6, %v3397_v18, %v3396_v22  ;;  %v8297_v19 = vld [vmem:[#allocation19_spill] sm:$0xff] }
 0x127   :  { %v3413_v46 = vrot.slane %v8288_v39, 7  ;;  %v3406_v34 = vsel %vm3346_vm3, %v3405_v14, %v3404_v23  ;;  %v8294_v62 = vunpack.c.l.b16 %v8293_v30  ;;  %v8295_v39 = vld [vmem:[#allocation18_spill] sm:$0xff]  ;;  %v8298_v35 = vunpack.c.l.b16 %v8297_v19  ;;  %v8301_v23 = vld [vmem:[#allocation21_spill] sm:$0xff]  ;;  %v8303_v30 = vld [vmem:[#allocation23_spill] sm:$0xff] }
 0x128   :  { %v3415_v58 = vrot.slane %v8290_v63, 6  ;;  %v3417_v16 = vrot.slane %v8292_v37, 5  ;;  %v8296_v59 = vunpack.c.l.b16 %v8295_v39  ;;  %v3408_v15 = vsel %vm3349_vm4, %v3407_v28, %v3406_v34  ;;  %v8299_v63 = vld [vmem:[#allocation20_spill] sm:$0xff]  ;;  %v8307_v19 = vld [vmem:[#allocation25_spill] sm:$0xff] }
 0x129   :  { %v3414_v7 = vsel %vm3337_vm0, %v3413_v46, %v8294_v62  ;;  %v3421_v21 = vrot.slane %v8298_v35, 3  ;;  %v8300_v53 = vunpack.c.l.b16 %v8299_v63  ;;  %v3410_v22 = vsel %vm3352_vm5, %v3409_v26, %v3408_v15  ;;  %v8305_v34 = vld [vmem:[#allocation24_spill] sm:$0xff] }
 0x12a   :  { %v3419_v8 = vrot.slane %v8296_v59, 4  ;;  %v3416_v25 = vsel %vm3340_vm1, %v3415_v58, %v3414_v7  ;;  %v8302_v37 = vunpack.c.l.b16 %v8301_v23  ;;  %v8304_v62 = vunpack.c.l.b16 %v8303_v30  ;;  %v8314_v30 = vld [vmem:[#allocation28_spill] sm:$0xff] }
 0x12b   :  { %v3423_v18 = vrot.slane %v8300_v53, 2  ;;  %v3418_v14 = vsel %vm3343_vm2, %v3417_v16, %v3416_v25  ;;  %v6944_v28 = vsel %vm3355_vm6, %v3411_v29, %v3410_v22  ;;  %v8306_v7 = vunpack.c.l.b16 %v8305_v34  ;;  %v8309_v16 = vld [vmem:[#allocation22_spill] sm:$0xff] }
 0x12c   :  { %v3425_v46 = vrot.slane %v8302_v37, 1  ;;  %v3427_v39 = vrot.slane %v8304_v62, 7  ;;  %v3420_v58 = vsel %vm3346_vm3, %v3419_v8, %v3418_v14  ;;  %v8308_v35 = vunpack.c.l.b16 %v8307_v19  ;;  %v8311_v53 = vld [vmem:[#allocation26_spill] sm:$0xff] }
 0x12d   :  { %v3429_v59 = vrot.slane %v8306_v7, 6  ;;  %v3422_v26 = vsel %vm3349_vm4, %v3421_v21, %v3420_v58  ;;  %v8310_v15 = vunpack.c.l.b16 %v8309_v16  ;;  %v8312_v23 = vunpack.c.l.b16 %v8311_v53  ;;  %v8316_v7 = vld [vmem:[#allocation29_spill] sm:$0xff] }
 0x12e   :  { %v3431_v63 = vrot.slane %v8308_v35, 5  ;;  %v8313_v29 = vunpack.c.l.b16 %v8174_v20  ;;  %v3424_v8 = vsel %vm3352_vm5, %v3423_v18, %v3422_v26  ;;  %v8315_v62 = vunpack.c.l.b16 %v8314_v30  ;;  %v8318_v35 = vld [vmem:[#allocation31_spill] sm:$0xff]  ;;  %v8320_v20 = vld [vmem:[#allocation32_spill] sm:$0xff] }
 0x12f   :  { %v3428_v25 = vsel %vm3337_vm0, %v3427_v39, %v8310_v15  ;;  %v3433_v37 = vrot.slane %v8312_v23, 4  ;;  %v8317_v19 = vunpack.c.l.b16 %v8316_v7  ;;  %v6966_v58 = vsel %vm3355_vm6, %v3425_v46, %v3424_v8 }
 0x130   :  { %v3435_v22 = vrot.slane %v8313_v29, 3  ;;  %v3430_v14 = vsel %vm3340_vm1, %v3429_v59, %v3428_v25  ;;  %v3437_v34 = vrot.slane %v8315_v62, 2  ;;  %v8319_v16 = vunpack.c.l.b16 %v8318_v35  ;;  %v8322_v59 = vld [vmem:[#allocation33_spill] sm:$0xff]  ;;  %v8324_v29 = vld [vmem:[#allocation34_spill] sm:$0xff]  ;;  %v8329_v35 = vld [vmem:[#allocation36_spill] sm:$0xff] }
 0x131   :  { %v3439_v21 = vrot.slane %v8317_v19, 1  ;;  %v3432_v39 = vsel %vm3343_vm2, %v3431_v63, %v3430_v14  ;;  %v8321_v53 = vunpack.c.l.b16 %v8320_v20  ;;  %v8323_v26 = vunpack.c.l.b16 %v8322_v59  ;;  %v8327_v63 = vld [vmem:[#allocation30_spill] sm:$0xff] }
 0x132   :  { %v3441_v15 = vrot.slane %v8319_v16, 7  ;;  %v3434_v18 = vsel %vm3346_vm3, %v3433_v37, %v3432_v39  ;;  %v8325_v30 = vunpack.c.l.b16 %v8324_v29  ;;  %v8326_v7 = vunpack.c.l.b16 %v8182_v55 }
 0x133   :  { %v3443_v23 = vrot.slane %v8321_v53, 6  ;;  %v3445_v25 = vrot.slane %v8323_v26, 5  ;;  %v3436_v8 = vsel %vm3349_vm4, %v3435_v22, %v3434_v18  ;;  %v8328_v14 = vunpack.c.l.b16 %v8327_v63 }
 0x134   :  { %v3447_v62 = vrot.slane %v8325_v30, 4  ;;  %v3449_v46 = vrot.slane %v8326_v7, 3  ;;  %v8330_v16 = vunpack.c.l.b16 %v8329_v35  ;;  %v8331_v37 = vunpack.c.l.b16 %v8184_v6  ;;  %v8335_v6 = vld [vmem:[#allocation42_spill] sm:$0xff]  ;;  %v8340_v35 = vld [vmem:[#allocation44_spill] sm:$0xff] }
 0x135   :  { %v3442_v19 = vsel %vm3337_vm0, %v3441_v15, %v8328_v14  ;;  %v3438_v53 = vsel %vm3352_vm5, %v3437_v34, %v3436_v8  ;;  %v8332_v26 = vunpack.c.l.b16 %v8185_v33  ;;  %v8333_v29 = vunpack.c.l.b16 %v8186_v47 }
 0x136   :  { %v3451_v20 = vrot.slane %v8330_v16, 2  ;;  %v3453_v39 = vrot.slane %v8331_v37, 1  ;;  %v3444_v59 = vsel %vm3340_vm1, %v3443_v23, %v3442_v19  ;;  %v6995_v18 = vsel %vm3355_vm6, %v3439_v21, %v3438_v53  ;;  %v8337_v23 = vld [vmem:[#allocation38_spill] sm:$0xff] }
 0x137   :  { %v3455_v55 = vrot.slane %v8332_v26, 7  ;;  %v3457_v22 = vrot.slane %v8333_v29, 6  ;;  %v3446_v15 = vsel %vm3343_vm2, %v3445_v25, %v3444_v59  ;;  %v8334_v30 = vunpack.c.l.b16 %v8187_v51 }
 0x138   :  { %v8336_v63 = vunpack.c.l.b16 %v8335_v6  ;;  %v3448_v34 = vsel %vm3346_vm3, %v3447_v62, %v3446_v15  ;;  %v8338_v8 = vunpack.c.l.b16 %v8337_v23  ;;  %v8339_v47 = vunpack.c.l.b16 %v8189_v44 }
 0x139   :  { %v3459_v7 = vrot.slane %v8334_v30, 5  ;;  %v8341_v21 = vunpack.c.l.b16 %v8340_v35  ;;  %v3450_v25 = vsel %vm3349_vm4, %v3449_v46, %v3448_v34  ;;  %v8342_v37 = vunpack.c.l.b16 %v8191_v54  ;;  %v8349_v34 = vld [vmem:[#allocation48_spill] sm:$0xff] }
 0x13a   :  { %v3461_v14 = vrot.slane %v8336_v63, 4  ;;  %v3456_v33 = vsel %vm3337_vm0, %v3455_v55, %v8338_v8  ;;  %v3463_v19 = vrot.slane %v8339_v47, 3  ;;  %v8343_v59 = vunpack.c.l.b16 %v8192_v48 }
 0x13b   :  { %v3465_v16 = vrot.slane %v8341_v21, 2  ;;  %v3458_v51 = vsel %vm3340_vm1, %v3457_v22, %v3456_v33  ;;  %v3467_v53 = vrot.slane %v8342_v37, 1  ;;  %v3452_v26 = vsel %vm3352_vm5, %v3451_v20, %v3450_v25 }
 0x13c   :  { %v3469_v62 = vrot.slane %v8343_v59, 7  ;;  %v3460_v55 = vsel %vm3343_vm2, %v3459_v7, %v3458_v51  ;;  %v8344_v44 = vunpack.c.l.b16 %v6415_v56  ;;  %v8345_v15 = vunpack.c.l.b16 %v6418_v57 }
 0x13d   :  { %v7023_v46 = vsel %vm3355_vm6, %v3453_v39, %v3452_v26  ;;  %v3462_v22 = vsel %vm3346_vm3, %v3461_v14, %v3460_v55  ;;  %v8346_v54 = vunpack.c.l.b16 %v6409_v31  ;;  %v8347_v6 = vunpack.c.l.b16 %v6421_v12 }
 0x13e   :  { %v3471_v29 = vrot.slane %v8344_v44, 6  ;;  %v3473_v30 = vrot.slane %v8345_v15, 5  ;;  %v3464_v7 = vsel %vm3349_vm4, %v3463_v19, %v3462_v22  ;;  %v8348_v63 = vunpack.c.l.b16 %v8193_v40  ;;  %v8359_v44 = vld [vmem:[#allocation51_spill] sm:$0xff] }
 0x13f   :  { %v3470_v48 = vsel %vm3337_vm0, %v3469_v62, %v8346_v54  ;;  %v3475_v20 = vrot.slane %v8347_v6, 4  ;;  %v8350_v23 = vunpack.c.l.b16 %v8349_v34  ;;  %v3466_v8 = vsel %vm3352_vm5, %v3465_v16, %v3464_v7 }
 0x140   :  { %v3472_v56 = vsel %vm3340_vm1, %v3471_v29, %v3470_v48  ;;  %v3477_v57 = vrot.slane %v8348_v63, 3  ;;  %v8351_v31 = vunpack.c.l.b16 %v8194_v27  ;;  %v8352_v12 = vunpack.c.l.b16 %v8195_v45 }
 0x141   :  { %v3479_v39 = vrot.slane %v8350_v23, 2  ;;  %v3474_v14 = vsel %vm3343_vm2, %v3473_v30, %v3472_v56  ;;  %v7044_v19 = vsel %vm3355_vm6, %v3467_v53, %v3466_v8  ;;  %v8353_v40 = vunpack.c.l.b16 %v6455_v3  ;;  %v8367_v23 = vld [vmem:[#allocation52_spill] sm:$0xff] }
 0x142   :  { %v3481_v33 = vrot.slane %v8351_v31, 1  ;;  %v3483_v47 = vrot.slane %v8352_v12, 7  ;;  %v3476_v35 = vsel %vm3346_vm3, %v3475_v20, %v3474_v14  ;;  %v8354_v25 = vunpack.c.l.b16 %v6458_v2 }
 0x143   :  { %v3485_v21 = vrot.slane %v8353_v40, 6  ;;  %v3478_v16 = vsel %vm3349_vm4, %v3477_v57, %v3476_v35  ;;  %v8355_v37 = vunpack.c.l.b16 %v6449_v61  ;;  %v8356_v45 = vunpack.c.l.b16 %v6461_v5  ;;  %v8361_v5 = vld [vmem:[#allocation53_spill] sm:$0xff] }
 0x144   :  { %v3487_v51 = vrot.slane %v8354_v25, 5  ;;  %v8357_v53 = vunpack.c.l.b16 %v6464_v9  ;;  %v3480_v26 = vsel %vm3352_vm5, %v3479_v39, %v3478_v16  ;;  %v8358_v55 = vunpack.c.l.b16 %v6467_v10 }
 0x145   :  { %v3484_v27 = vsel %vm3337_vm0, %v3483_v47, %v8355_v37  ;;  %v3489_v59 = vrot.slane %v8356_v45, 4  ;;  %v8360_v29 = vunpack.c.l.b16 %v8359_v44  ;;  %v7066_v61 = vsel %vm3355_vm6, %v3481_v33, %v3480_v26  ;;  %v8379_v26 = vld [vmem:[#allocation58_spill] sm:$0xff]  ;;  %v8381_v44 = vld [vmem:[#allocation59_spill] sm:$0xff] }
 0x146   :  { %v3491_v62 = vrot.slane %v8357_v53, 3  ;;  %v3486_v3 = vsel %vm3340_vm1, %v3485_v21, %v3484_v27  ;;  %v3493_v2 = vrot.slane %v8358_v55, 2  ;;  %v8362_v22 = vunpack.c.l.b16 %v8361_v5 }
 0x147   :  { %v3495_v15 = vrot.slane %v8360_v29, 1  ;;  %v3488_v30 = vsel %vm3343_vm2, %v3487_v51, %v3486_v3  ;;  %v8363_v9 = vunpack.c.l.b16 %v6495_v38  ;;  %v8364_v20 = vunpack.c.l.b16 %v6498_v0 }
 0x148   :  { %v3497_v54 = vrot.slane %v8362_v22, 7  ;;  %v3490_v6 = vsel %vm3346_vm3, %v3489_v59, %v3488_v30  ;;  %v8365_v7 = vunpack.c.l.b16 %v6501_v4  ;;  %v8366_v63 = vunpack.c.l.b16 %v6504_v36 }
 0x149   :  { %v3499_v48 = vrot.slane %v8363_v9, 6  ;;  %v3501_v10 = vrot.slane %v8364_v20, 5  ;;  %v3492_v34 = vsel %vm3349_vm4, %v3491_v62, %v3490_v6  ;;  %v8368_v39 = vunpack.c.l.b16 %v8367_v23 }
 0x14a   :  { %v3503_v56 = vrot.slane %v8365_v7, 4  ;;  %v3505_v57 = vrot.slane %v8366_v63, 3  ;;  %v8369_v38 = vunpack.c.l.b16 %v6507_v24  ;;  %v8370_v31 = vunpack.c.l.b16 %v6510_v42 }
 0x14b   :  { %v3498_v8 = vsel %vm3337_vm0, %v3497_v54, %v8368_v39  ;;  %v3494_v0 = vsel %vm3352_vm5, %v3493_v2, %v3492_v34  ;;  %v8371_v12 = vunpack.c.l.b16 %v8197_v17  ;;  %v8372_v47 = vunpack.c.l.b16 %v8198_v11  ;;  %v8391_v34 = vld [vmem:[#allocation63_spill] sm:$0xff] }
 0x14c   :  { %v3507_v14 = vrot.slane %v8369_v38, 2  ;;  %v3509_v33 = vrot.slane %v8370_v31, 1  ;;  %v3500_v4 = vsel %vm3340_vm1, %v3499_v48, %v3498_v8  ;;  %v7095_v40 = vsel %vm3355_vm6, %v3495_v15, %v3494_v0  ;;  %v8383_v15 = vld [vmem:[#allocation60_spill] sm:$0xff]  ;;  %v8387_v48 = vld [vmem:[#allocation61_spill] sm:$0xff]  ;;  %v8395_v0 = vld [vmem:[#allocation94_spill] sm:$0xff] }
 0x14d   :  { %v3511_v36 = vrot.slane %v8371_v12, 7  ;;  %v3513_v35 = vrot.slane %v8372_v47, 6  ;;  %v3502_v21 = vsel %vm3343_vm2, %v3501_v10, %v3500_v4  ;;  %v8373_v24 = vunpack.c.l.b16 %v8199_v1 }
 0x14e   :  { %v8374_v42 = vunpack.c.l.b16 %v6541_v49  ;;  %v3504_v16 = vsel %vm3346_vm3, %v3503_v56, %v3502_v21  ;;  %v8375_v37 = vunpack.c.l.b16 %v6529_v41  ;;  %v8376_v11 = vunpack.c.l.b16 %v6544_v50  ;;  %v8389_v56 = vld [vmem:[#allocation62_spill] sm:$0xff] }
 0x14f   :  { %v3515_v25 = vrot.slane %v8373_v24, 5  ;;  %v8377_v45 = vunpack.c.l.b16 %v6547_v43  ;;  %v3506_v53 = vsel %vm3349_vm4, %v3505_v57, %v3504_v16  ;;  %v8378_v62 = vunpack.c.l.b16 %v6550_v32  ;;  %v8385_v32 = vld [vmem:[#allocation57_spill] sm:$0xff] }
 0x150   :  { %v3517_v51 = vrot.slane %v8374_v42, 4  ;;  %v3512_v17 = vsel %vm3337_vm0, %v3511_v36, %v8375_v37  ;;  %v3519_v27 = vrot.slane %v8376_v11, 3  ;;  %v8380_v3 = vunpack.c.l.b16 %v8379_v26  ;;  %v8401_v37 = vld [vmem:[#allocation93_spill] sm:$0xff] }
 0x151   :  { %v3521_v59 = vrot.slane %v8377_v45, 2  ;;  %v3514_v1 = vsel %vm3340_vm1, %v3513_v35, %v3512_v17  ;;  %v3523_v49 = vrot.slane %v8378_v62, 1  ;;  %v3508_v41 = vsel %vm3352_vm5, %v3507_v14, %v3506_v53  ;;  %v8393_v14 = vld [vmem:[#allocation64_spill] sm:$0xff]  ;;  %v8397_v35 = vld [vmem:[#allocation95_spill] sm:$0xff]  ;;  %v8405_v53 = vld [vmem:[#allocation98_spill] sm:$0xff] }
 0x152   :  { %v3525_v55 = vrot.slane %v8380_v3, 7  ;;  %v3516_v2 = vsel %vm3343_vm2, %v3515_v25, %v3514_v1  ;;  %v8382_v50 = vunpack.c.l.b16 %v8381_v44  ;;  %v8384_v43 = vunpack.c.l.b16 %v8383_v15  ;;  %v8399_v25 = vld [vmem:[#allocation96_spill] sm:$0xff]  ;;  %v8407_v3 = vld [vmem:[#allocation99_spill] sm:$0xff] }
 0x153   :  { %v7123_v5 = vsel %vm3355_vm6, %v3509_v33, %v3508_v41  ;;  %v3518_v22 = vsel %vm3346_vm3, %v3517_v51, %v3516_v2  ;;  %v8386_v54 = vunpack.c.l.b16 %v8385_v32  ;;  %v8388_v6 = vunpack.c.l.b16 %v8387_v48  ;;  %v8409_v2 = vld [vmem:[#allocation100_spill] sm:$0xff]  ;;  %v8413_v32 = vld [vmem:[#allocation103_spill] sm:$0xff] }
 0x154   :  { %v3527_v29 = vrot.slane %v8382_v50, 6  ;;  %v3529_v30 = vrot.slane %v8384_v43, 5  ;;  %v3520_v10 = vsel %vm3349_vm4, %v3519_v27, %v3518_v22  ;;  %v8390_v63 = vunpack.c.l.b16 %v8389_v56  ;;  %v8403_v27 = vld [vmem:[#allocation97_spill] sm:$0xff]  ;;  %v8411_v43 = vld [vmem:[#allocation102_spill] sm:$0xff] }
 0x155   :  { %v3526_v9 = vsel %vm3337_vm0, %v3525_v55, %v8386_v54  ;;  %v3531_v20 = vrot.slane %v8388_v6, 4  ;;  %v8392_v23 = vunpack.c.l.b16 %v8391_v34  ;;  %v3522_v8 = vsel %vm3352_vm5, %v3521_v59, %v3520_v10  ;;  %v8415_v6 = vld [vmem:[#allocation104_spill] sm:$0xff] }
 0x156   :  { %v3528_v7 = vsel %vm3340_vm1, %v3527_v29, %v3526_v9  ;;  %v3533_v57 = vrot.slane %v8390_v63, 3  ;;  %v8394_v31 = vunpack.c.l.b16 %v8393_v14  ;;  %v8396_v4 = vunpack.c.l.b16 %v8395_v0 }
 0x157   :  { %v3535_v39 = vrot.slane %v8392_v23, 2  ;;  %v3530_v38 = vsel %vm3343_vm2, %v3529_v30, %v3528_v7  ;;  %v7144_v36 = vsel %vm3355_vm6, %v3523_v49, %v3522_v8  ;;  %v8398_v21 = vunpack.c.l.b16 %v8397_v35  ;;  %v8417_v7 = vld [vmem:[#allocation105_spill] sm:$0xff] }
 0x158   :  { %v3537_v33 = vrot.slane %v8394_v31, 1  ;;  %v3539_v12 = vrot.slane %v8396_v4, 7  ;;  %v3532_v47 = vsel %vm3346_vm3, %v3531_v20, %v3530_v38  ;;  %v8400_v42 = vunpack.c.l.b16 %v8399_v25  ;;  %v8421_v8 = vld [vmem:[#allocation101_spill] sm:$0xff]  ;;  %v8423_v31 = vld [vmem:[#allocation107_spill] sm:$0xff]  ;;  %v8425_v4 = vld [vmem:[#allocation108_spill] sm:$0xff] }
 0x159   :  { %v3541_v24 = vrot.slane %v8398_v21, 6  ;;  %v3534_v16 = vsel %vm3349_vm4, %v3533_v57, %v3532_v47  ;;  %v8402_v17 = vunpack.c.l.b16 %v8401_v37  ;;  %v8404_v45 = vunpack.c.l.b16 %v8403_v27  ;;  %v8419_v57 = vld [vmem:[#allocation106_spill] sm:$0xff] }
 0x15a   :  { %v3543_v51 = vrot.slane %v8400_v42, 5  ;;  %v8406_v1 = vunpack.c.l.b16 %v8405_v53  ;;  %v3536_v49 = vsel %vm3352_vm5, %v3535_v39, %v3534_v16  ;;  %v8408_v55 = vunpack.c.l.b16 %v8407_v3  ;;  %v8427_v16 = vld [vmem:[#allocation27_spill] sm:$0xff] }
 0x15b   :  { %v3540_v11 = vsel %vm3337_vm0, %v3539_v12, %v8402_v17  ;;  %v3545_v59 = vrot.slane %v8404_v45, 4  ;;  %v8410_v44 = vunpack.c.l.b16 %v8409_v2  ;;  %v3538_v29 = vsel %vm3355_vm6, %v3537_v33, %v3536_v49 }
 0x15c   :  { %v3547_v62 = vrot.slane %v8406_v1, 3  ;;  %v3542_v26 = vsel %vm3340_vm1, %v3541_v24, %v3540_v11  ;;  %v3549_v41 = vrot.slane %v8408_v55, 2  ;;  %v8412_v30 = vunpack.c.l.b16 %v8411_v43 }
 0x15d   :  { %v3551_v50 = vrot.slane %v8410_v44, 1  ;;  %v3544_v15 = vsel %vm3343_vm2, %v3543_v51, %v3542_v26  ;;  %v8414_v54 = vunpack.c.l.b16 %v8413_v32  ;;  %v8416_v20 = vunpack.c.l.b16 %v8415_v6 }
 0x15e   :  { %v3553_v22 = vrot.slane %v8412_v30, 7  ;;  %v3546_v48 = vsel %vm3346_vm3, %v3545_v59, %v3544_v15  ;;  %v8418_v56 = vunpack.c.l.b16 %v8417_v7  ;;  %v8420_v34 = vunpack.c.l.b16 %v8419_v57 }
 0x15f   :  { %v3555_v9 = vrot.slane %v8414_v54, 6  ;;  %v3557_v10 = vrot.slane %v8416_v20, 5  ;;  %v3548_v39 = vsel %vm3349_vm4, %v3547_v62, %v3546_v48  ;;  %v8422_v38 = vunpack.c.l.b16 %v8421_v8 }
 0x160   :  { %v3559_v63 = vrot.slane %v8418_v56, 4  ;;  %v3561_v23 = vrot.slane %v8420_v34, 3  ;;  %v8424_v33 = vunpack.c.l.b16 %v8423_v31  ;;  %v8426_v12 = vunpack.c.l.b16 %v8425_v4 }
 0x161   :  { %v3554_v14 = vsel %vm3337_vm0, %v3553_v22, %v8422_v38  ;;  %v3550_v35 = vsel %vm3352_vm5, %v3549_v41, %v3548_v39  ;;  %v3567_v24 = vpack.c.b16 %v6858_v13, %v6858_v13  ;;  %v3568_v25 = vpack.c.b16 %v6865_v52, %v6865_v52 }
 0x162   :  { %v3563_v0 = vrot.slane %v8424_v33, 2  ;;  %v3565_v47 = vrot.slane %v8426_v12, 1  ;;  %v3556_v21 = vsel %vm3340_vm1, %v3555_v9, %v3554_v14  ;;  %v3552_v42 = vsel %vm3355_vm6, %v3551_v50, %v3550_v35 }
 0x163   :  { %v3558_v51 = vsel %vm3343_vm2, %v3557_v10, %v3556_v21  ;;  %v3569_v37 = vpack.c.b16 %v8427_v16, %v8427_v16  ;;  %v3570_v17 = vpack.c.b16 %v6923_v60, %v6923_v60  ;;  %v3571_v27 = vpack.c.b16 %v6944_v28, %v6944_v28  ;;  %3600 = vst.msk [vmem:[%s7285_s1] sm:$0xf] %vm3599_vm7, %v3567_v24 }
 0x164   :  { %v3560_v11 = vsel %vm3346_vm3, %v3559_v63, %v3558_v51  ;;  %v3572_v13 = vpack.c.b16 %v6966_v58, %v6966_v58  ;;  %v3573_v52 = vpack.c.b16 %v6995_v18, %v6995_v18  ;;  %v3574_v59 = vpack.c.b16 %v7023_v46, %v7023_v46  ;;  %3601 = vst.msk [vmem:[%s7285_s1 + $0x4] sm:$0xf] %vm3599_vm7, %v3568_v25 }
 0x165   :  { %v3562_v45 = vsel %vm3349_vm4, %v3561_v23, %v3560_v11  ;;  %v3575_v53 = vpack.c.b16 %v7044_v19, %v7044_v19  ;;  %v3576_v60 = vpack.c.b16 %v7066_v61, %v7066_v61  ;;  %v3577_v28 = vpack.c.b16 %v7095_v40, %v7095_v40  ;;  %3602 = vst.msk [vmem:[%s7285_s1 + $0x8] sm:$0xf] %vm3599_vm7, %v3569_v37 }
 0x166   :  { %v3564_v1 = vsel %vm3352_vm5, %v3563_v0, %v3562_v45  ;;  %v3578_v58 = vpack.c.b16 %v7123_v5, %v7123_v5  ;;  %v3579_v18 = vpack.c.b16 %v7144_v36, %v7144_v36  ;;  %v3580_v46 = vpack.c.b16 %v3538_v29, %v3538_v29  ;;  %3603 = vst.msk [vmem:[%s7285_s1 + $0xc] sm:$0xf] %vm3599_vm7, %v3570_v17 }
 0x167   :  { %v3566_v62 = vsel %vm3355_vm6, %v3565_v47, %v3564_v1  ;;  %v3581_v49 = vpack.c.b16 %v3552_v42, %v3552_v42  ;;  %3604 = vst.msk [vmem:[%s7285_s1 + $0x10] sm:$0xf] %vm3599_vm7, %v3571_v27  ;;  %3605 = vst.msk [vmem:[%s7285_s1 + $0x14] sm:$0xf] %vm3599_vm7, %v3572_v13 }
 0x168   :  { %v3582_v19 = vpack.c.b16 %v3566_v62, %v3566_v62  ;;  %3606 = vst.msk [vmem:[%s7285_s1 + $0x18] sm:$0xf] %vm3599_vm7, %v3573_v52  ;;  %3607 = vst.msk [vmem:[%s7285_s1 + $0x1c] sm:$0xf] %vm3599_vm7, %v3574_v59 }
 0x169   :  { %3608 = vst.msk [vmem:[%s7285_s1 + $0x20] sm:$0xf] %vm3599_vm7, %v3575_v53  ;;  %3609 = vst.msk [vmem:[%s7285_s1 + $0x24] sm:$0xf] %vm3599_vm7, %v3576_v60 }
 0x16a   :  { %3610 = vst.msk [vmem:[%s7285_s1 + $0x28] sm:$0xf] %vm3599_vm7, %v3577_v28  ;;  %3611 = vst.msk [vmem:[%s7285_s1 + $0x2c] sm:$0xf] %vm3599_vm7, %v3578_v58 }
 0x16b   :  { %3612 = vst.msk [vmem:[%s7285_s1 + $0x30] sm:$0xf] %vm3599_vm7, %v3579_v18  ;;  %3613 = vst.msk [vmem:[%s7285_s1 + $0x34] sm:$0xf] %vm3599_vm7, %v3580_v46 }
 0x16c   :  { %3614 = vst.msk [vmem:[%s7285_s1 + $0x38] sm:$0xf] %vm3599_vm7, %v3581_v49  ;;  %3615 = vst.msk [vmem:[%s7285_s1 + $0x3c] sm:$0xf] %vm3599_vm7, %v3582_v19 }

</bundles_post_ra>
